<compile_context>
chip_gen: v6e
topology: v6e:2x2x1
jax: 0.10.0
libtpu: 0.0.40
codegen_flags: <defaults>
</compile_context>

<pallas_src>
import functools

import jax
import jax.numpy as jnp
import numpy as np
from jax.experimental import pallas as pl
from jax.experimental.pallas import tpu as pltpu


_DIRECTIONS = ((0.0, 0.0), (0.0, 1.0), (0.0, -1.0), (1.0, 0.0), (1.0, 1.0),
               (1.0, -1.0), (-1.0, 0.0), (-1.0, 1.0), (-1.0, -1.0))


def _round_up(x, m):
    return (x + m - 1) // m * m


def _device_info():
    """(vmem_capacity_bytes, tensorcores_per_chip) with conservative fallbacks."""
    kind = ""
    try:
        kind = (getattr(jax.devices()[0], "device_kind", "") or "").lower()
    except Exception:
        pass
    vmem = None
    try:
        vmem = getattr(pltpu.get_tpu_info(), "vmem_capacity_bytes", None)
    except Exception:
        vmem = None
    if vmem is None:
        if "v7" in kind:
            vmem = 64 << 20
        elif kind:
            vmem = 128 << 20       # v5e / v6e
        else:
            vmem = 64 << 20        # unknown -> conservative
    cores = 2 if "v7" in kind else 1
    return int(vmem), cores


def _pick_query_tile(HW, C, H, vmem_cap, n_cores, batch):
    """Lane tile over output pixels (multiple of 128), sized from device VMEM."""
    hw128 = _round_up(HW, 128)
    # Bytes of VMEM inside the deform kernel that scale with one query lane
    # (t + its reshaped product + acc in f32, din/out blocks double-buffered, ax/ay).
    per_lane = 12 * C * H + 8 * (27 + 2 * C) + 4 * (H + 16) + 128
    budget = max(2 << 20, int(vmem_cap * 0.30))
    tq = max(128, min(hw128, (budget // per_lane) // 128 * 128))
    nq = -(-hw128 // tq)
    if batch * nq < n_cores and tq > 128:      # keep both TensorCores busy (v7x)
        want_nq = -(-n_cores // max(1, batch))
        tq = max(128, (hw128 // want_nq) // 128 * 128)
    hwq = _round_up(HW, tq)                    # grid divides exactly; pad/slice in wrapper
    return tq, hwq


# --------------------------------------------------------------------------------------
# Pallas kernel 1: 3x3 same-padding conv.  The 9 shifted taps are built in-kernel from a
# flat (W+1)-zero-padded input with static lane slices (+ row-wrap masks), so there is no
# 9x im2col HBM intermediate.  9 accumulating MXU dots, f32 accumulation.
# --------------------------------------------------------------------------------------
def _conv_kernel(x_ref, w_ref, b_ref, m_ref, o_ref, *, W, HW):
    # x_ref : (1, C, HW + 2*(W+1))  flat input, zero-padded by W+1 on each side
    # w_ref : (9, Co, C)            tap-major weights (tap = kh*3 + kw)
    # b_ref : (Co, 1) f32           bias
    # m_ref : (2, HW)               row-wrap masks: [0] = (w > 0), [1] = (w < W-1)
    # o_ref : (1, Co, HW) f32
    pad = W + 1
    x = x_ref[0]
    acc = None
    tap = 0
    for dh in (-1, 0, 1):
        for dw in (-1, 0, 1):
            start = pad + dh * W + dw               # static slice start
            xs = x[:, start:start + HW]             # (C, HW)
            if dw == -1:
                xs = xs * m_ref[0:1, :]             # source column w-1 invalid at w == 0
            elif dw == 1:
                xs = xs * m_ref[1:2, :]             # source column w+1 invalid at w == W-1
            d = jnp.dot(w_ref[tap], xs, preferred_element_type=jnp.float32)
            acc = d if acc is None else acc + d
            tap += 1
    o_ref[0] = acc + b_ref[...]


def conv3x3_flat(x_flat, w_oihw, bias, H, W, *, compute_dtype, vmem_limit):
    """3x3 / stride-1 / pad-1 conv: (B, C, H*W) -> (B, Co, H*W), f32 output."""
    B, C, HW = x_flat.shape
    Co = w_oihw.shape[0]
    pad = W + 1

    xp = jnp.pad(x_flat, ((0, 0), (0, 0), (pad, pad))).astype(compute_dtype)
    w_taps = jnp.transpose(w_oihw, (2, 3, 0, 1)).reshape(9, Co, C).astype(compute_dtype)
    b_mat = bias.reshape(Co, 1).astype(jnp.float32)
    wcol = jnp.arange(HW, dtype=jnp.int32) % W
    wmask = jnp.stack([(wcol > 0), (wcol < W - 1)]).astype(compute_dtype)     # (2, HW)

    kern = functools.partial(_conv_kernel, W=W, HW=HW)
    # TODO(synk): for very large images / B==1 on 2-TC chips, add a Co (or image-row) grid
    # axis so the conv also exposes a second parallel dimension.
    return pl.pallas_call(
        kern,
        out_shape=jax.ShapeDtypeStruct((B, Co, HW), jnp.float32),
        grid=(B,),
        in_specs=[
            pl.BlockSpec((1, C, HW + 2 * pad), lambda b: (b, 0, 0)),
            pl.BlockSpec((9, Co, C), lambda b: (0, 0, 0)),
            pl.BlockSpec((Co, 1), lambda b: (0, 0)),
            pl.BlockSpec((2, HW), lambda b: (0, 0)),
        ],
        out_specs=pl.BlockSpec((1, Co, HW), lambda b: (b, 0, 0)),
        compiler_params=pltpu.CompilerParams(
            dimension_semantics=("parallel",),
            vmem_limit_bytes=vmem_limit),
    )(xp, w_taps, b_mat, wmask)


# --------------------------------------------------------------------------------------
# Pallas kernel 2: grid_sample (bilinear, zeros, align_corners=False) + sigmoid modulation
# + sum over the 9 direction slots, done separably per direction:
#     T_r = (C*H, W) @ Ax_r(W, TQ)   (MXU, bf16 in / f32 acc)
#     out += sum_h Ay_r[h, q] * T_r[c, h, q]
# Corner weights that fall outside the image match no row/column, which implements the
# zeros padding with no explicit clipping.  Everything accumulates in traced locals
# (no VMEM scratch read-modify-write).
# --------------------------------------------------------------------------------------
def _deform_kernel(x_ref, din_ref, o_ref, *, H, W, C):
    # x_ref  : (1, C*H, W) bf16   input features (row-major over (c, h))
    # din_ref: (1, 27, TQ) f32    rows 0..8 = x-coord, 9..17 = y-coord, 18..26 = mod logits
    # o_ref  : (1, C, TQ) f32
    nd = 9
    x2d = x_ref[0]
    din = din_ref[0]
    colw = jax.lax.broadcasted_iota(jnp.int32, (W, 1), 0).astype(jnp.float32)
    colh = jax.lax.broadcasted_iota(jnp.int32, (H, 1), 0).astype(jnp.float32)

    acc = None
    for k in range(nd):
        gx = din[k:k + 1, :]                                   # (1, TQ)
        gy = din[nd + k:nd + k + 1, :]
        modw = jax.nn.sigmoid(din[2 * nd + k:2 * nd + k + 1, :])

        # align_corners=False un-normalization; coord 0 indexes W, coord 1 indexes H.
        ix = ((gx + 1.0) * float(W) - 1.0) * 0.5
        iy = ((gy + 1.0) * float(H) - 1.0) * 0.5
        x0 = jnp.floor(ix)
        y0 = jnp.floor(iy)
        wx1 = ix - x0
        wx0 = 1.0 - wx1
        wy1 = iy - y0
        wy0 = 1.0 - wy1

        # Column / row selection weights; out-of-range corners match nothing -> zeros pad.
        ax = (jnp.where(colw == x0, wx0, 0.0) +
              jnp.where(colw == x0 + 1.0, wx1, 0.0))           # (W, TQ)
        ay = (jnp.where(colh == y0, wy0, 0.0) +
              jnp.where(colh == y0 + 1.0, wy1, 0.0)) * modw    # (H, TQ), f32 (modulated)

        t = jnp.dot(x2d, ax.astype(jnp.bfloat16),
                    preferred_element_type=jnp.float32)        # (C*H, TQ) f32
        contrib = jnp.sum(t.reshape(C, H, -1) * ay[None, :, :], axis=1)   # (C, TQ)
        acc = contrib if acc is None else acc + contrib
    o_ref[0] = acc


def deform_sample(x2d, din, H, W, C, tq, vmem_limit):
    # x2d: (B, C*H, W) bf16   din: (B, 27, HWq) f32, HWq a multiple of tq
    B = x2d.shape[0]
    hwq = din.shape[2]
    nq = hwq // tq
    kern = functools.partial(_deform_kernel, H=H, W=W, C=C)
    return pl.pallas_call(
        kern,
        out_shape=jax.ShapeDtypeStruct((B, C, hwq), jnp.float32),
        grid=(B, nq),
        in_specs=[
            # Block index constant across q -> fetched once per batch (could also use
            # pipeline_mode=pl.Buffered(1) to drop the second buffer).
            pl.BlockSpec((1, C * H, W), lambda b, q: (b, 0, 0)),
            pl.BlockSpec((1, 27, tq), lambda b, q: (b, 0, q)),
        ],
        out_specs=pl.BlockSpec((1, C, tq), lambda b, q: (b, 0, q)),
        compiler_params=pltpu.CompilerParams(
            dimension_semantics=("parallel", "parallel"),
            vmem_limit_bytes=vmem_limit),
    )(x2d, din)


# --------------------------------------------------------------------------------------
# Full forward (hot paths in the two Pallas kernels; only tiny elementwise glue in XLA)
# --------------------------------------------------------------------------------------
def deform_conv2d_forward(x_nchw, params):
    B, C, H, W = x_nchw.shape
    nd, HW = 9, H * W

    vmem_cap, n_cores = _device_info()
    vmem_limit = int(min(max(32 << 20, int(vmem_cap * 0.6)), int(vmem_cap * 0.85)))
    tq, hwq = _pick_query_tile(HW, C, H, vmem_cap, n_cores, B)

    x_flat = x_nchw.reshape(B, C, HW).astype(jnp.float32)

    # alpha*conv1(x) + (1-alpha)*conv2(x) == conv(x; alpha*W1 + (1-alpha)*W2): fold them,
    # and fold the modulation conv in as 9 extra output channels (one 27-channel conv).
    alpha = params["alpha"].astype(jnp.float32)
    w_off = alpha * params["off1_w"] + (1.0 - alpha) * params["off2_w"]      # (18, C, 3, 3)
    b_off = alpha * params["off1_b"] + (1.0 - alpha) * params["off2_b"]
    w_all = jnp.concatenate([w_off, params["mod_w"]], axis=0)                # (27, C, 3, 3)
    b_all = jnp.concatenate([b_off, params["mod_b"]], axis=0)                # (27,)

    # Offset/modulation conv kept with f32 operands so sampling coords are not quantised.
    feat = conv3x3_flat(x_flat, w_all, b_all, H, W,
                        compute_dtype=jnp.float32, vmem_limit=vmem_limit)    # (B, 27, HW)

    # Sampling locations, torch convention: coord0 = row-index grid + offset chans 0..8,
    # coord1 = col-index grid + offset chans 9..17 (coord0 is later unnormalised by W).
    p = jnp.arange(HW, dtype=jnp.int32)
    base0 = (p // W).astype(jnp.float32)[None, None, :]                      # (1, 1, HW)
    base1 = (p % W).astype(jnp.float32)[None, None, :]
    dirs = jnp.asarray(_DIRECTIONS, jnp.float32)                             # (9, 2)
    a0 = base0 + dirs[:, 0][None, :, None] + feat[:, 0:nd, :]                # (B, 9, HW)
    a1 = base1 + dirs[:, 1][None, :, None] + feat[:, nd:2 * nd, :]           # (B, 9, HW)

    # Reproduce torch's raw .view(B,H,W*9,2).view(B*9,H,W,2) re-interpretation:
    # the (pixel, direction) element order is re-split as (slot k, output pixel).
    gx = jnp.transpose(a0, (0, 2, 1)).reshape(B, nd, HW)
    gy = jnp.transpose(a1, (0, 2, 1)).reshape(B, nd, HW)
    din = jnp.concatenate([gx, gy, feat[:, 2 * nd:, :]], axis=1)             # (B, 27, HW)
    if hwq > HW:
        din = jnp.pad(din, ((0, 0), (0, 0), (0, hwq - HW)))                  # lane-dense tiles

    x2d = x_nchw.reshape(B, C * H, W).astype(jnp.bfloat16)                   # bf16 for MXU
    sampled = deform_sample(x2d, din, H, W, C, tq, vmem_limit)               # (B, C, hwq)
    sampled = sampled[:, :, :HW]

    Co = params["conv_weight"].shape[0]
    zero_b = jnp.zeros((Co,), jnp.float32)
    out = conv3x3_flat(sampled, params["conv_weight"], zero_b, H, W,
                       compute_dtype=jnp.bfloat16, vmem_limit=vmem_limit)    # (B, Co, HW)
    return out.reshape(B, Co, H, W)


# --------------------------------------------------------------------------------------
# Pure-JAX reference (mirrors the PyTorch code path) for a correctness check
# --------------------------------------------------------------------------------------
def _make_grid(H, W):
    directions = jnp.asarray(_DIRECTIONS, jnp.float32)
    hh, ww = jnp.meshgrid(jnp.arange(H, dtype=jnp.float32),
                          jnp.arange(W, dtype=jnp.float32), indexing="ij")
    base = jnp.stack([hh, ww], axis=-1)                         # (H, W, 2)
    return base[:, :, None, :] + directions[None, None, :, :]   # (H, W, 9, 2)


def _conv2d_nchw_ref(x, w, b=None):
    out = jax.lax.conv_general_dilated(
        x, w, window_strides=(1, 1), padding=((1, 1), (1, 1)),
        dimension_numbers=("NCHW", "OIHW", "NCHW"),
        precision=jax.lax.Precision.HIGHEST)
    if b is not None:
        out = out + b[None, :, None, None]
    return out


def _grid_sample_ref(x, grid):
    N, C, H, W = x.shape
    gx, gy = grid[..., 0], grid[..., 1]
    ix = ((gx + 1.0) * W - 1.0) * 0.5
    iy = ((gy + 1.0) * H - 1.0) * 0.5
    x0 = jnp.floor(ix); y0 = jnp.floor(iy)
    x1 = x0 + 1.0; y1 = y0 + 1.0

    xf = x.reshape(N, C, H * W)

    def gather(xc, yc):
        valid = (xc >= 0) & (xc <= W - 1) & (yc >= 0) & (yc <= H - 1)
        xi = jnp.clip(xc, 0, W - 1).astype(jnp.int32)
        yi = jnp.clip(yc, 0, H - 1).astype(jnp.int32)
        idx = (yi * W + xi).reshape(N, 1, -1)
        idx = jnp.broadcast_to(idx, (N, C, idx.shape[-1]))
        g = jnp.take_along_axis(xf, idx, axis=2).reshape(N, C, *xc.shape[1:])
        return g * valid[:, None].astype(x.dtype)

    w00 = ((x1 - ix) * (y1 - iy))[:, None]
    w01 = ((ix - x0) * (y1 - iy))[:, None]
    w10 = ((x1 - ix) * (iy - y0))[:, None]
    w11 = ((ix - x0) * (iy - y0))[:, None]
    return (gather(x0, y0) * w00 + gather(x1, y0) * w01 +
            gather(x0, y1) * w10 + gather(x1, y1) * w11)


def ref_forward(x, params):
    B, C, H, W = x.shape
    nd = 9
    off1 = _conv2d_nchw_ref(x, params["off1_w"], params["off1_b"])
    off2 = _conv2d_nchw_ref(x, params["off2_w"], params["off2_b"])
    mod = _conv2d_nchw_ref(x, params["mod_w"], params["mod_b"])
    off1 = off1.reshape(B, 2, nd, H, W).transpose(0, 3, 4, 2, 1)
    off2 = off2.reshape(B, 2, nd, H, W).transpose(0, 3, 4, 2, 1)
    mod = jax.nn.sigmoid(mod.reshape(B, nd, H, W).transpose(0, 2, 3, 1))
    grid_pts = _make_grid(H, W)
    alpha = params["alpha"]
    samp = grid_pts[None] + alpha * off1 + (1.0 - alpha) * off2
    samp = samp.reshape(B, H, W * nd, 2).reshape(B * nd, H, W, 2)
    x_exp = jnp.broadcast_to(x[:, None], (B, nd, C, H, W)).reshape(B * nd, C, H, W)
    sf = _grid_sample_ref(x_exp, samp)
    sf = sf.reshape(B, nd, C, H, W).transpose(0, 2, 3, 4, 1)
    sf = (sf * mod[:, None]).sum(-1)
    return _conv2d_nchw_ref(sf, params["conv_weight"])


# --------------------------------------------------------------------------------------
if __name__ == "__main__":
    B, C_in, C_out, H, W = 2, 4, 8, 16, 16

    key = jax.random.PRNGKey(0)
    ks = jax.random.split(key, 9)
    params = {
        "conv_weight": jax.random.normal(ks[0], (C_out, C_in, 3, 3), jnp.float32),
        "off1_w": 0.1 * jax.random.normal(ks[1], (18, C_in, 3, 3), jnp.float32),
        "off1_b": 0.1 * jax.random.normal(ks[2], (18,), jnp.float32),
        "off2_w": 0.1 * jax.random.normal(ks[3], (18, C_in, 3, 3), jnp.float32),
        "off2_b": 0.1 * jax.random.normal(ks[4], (18,), jnp.float32),
        "mod_w": 0.1 * jax.random.normal(ks[5], (9, C_in, 3, 3), jnp.float32),
        "mod_b": 0.1 * jax.random.normal(ks[6], (9,), jnp.float32),
        "alpha": jax.random.uniform(ks[7], (), jnp.float32),
    }
    x = jax.random.normal(ks[8], (B, C_in, H, W), jnp.float32)

    out = jax.jit(deform_conv2d_forward)(x, params)
    out = jax.block_until_ready(out)
    assert out.shape == (B, C_out, H, W), out.shape

    ref = jax.block_until_ready(ref_forward(x, params))
    max_err = float(jnp.max(jnp.abs(out - ref)))
    scale = float(jnp.max(jnp.abs(ref)))
    # bf16 MXU operands (f32 accumulation) in the gather matmul & final conv -> rel. tol.
    assert np.isfinite(max_err) and max_err < 1e-2 + 2e-2 * max(1.0, scale), (max_err, scale)

    print("KERNEL_OK")
</pallas_src>

<mosaic_0001>
module attributes {stable_mosaic.version = 11 : i64} {
  func.func @_conv_kernel(%arg0: i32, %arg1: memref<1x4x290xf32, #tpu.memory_space<vmem>>, %arg2: memref<9x27x4xf32, #tpu.memory_space<vmem>>, %arg3: memref<27x1xf32, #tpu.memory_space<vmem>>, %arg4: memref<2x256xf32, #tpu.memory_space<vmem>>, %arg5: memref<1x27x256xf32, #tpu.memory_space<vmem>>) attributes {dimension_semantics = [#tpu.dimension_semantics<parallel>], iteration_bounds = array<i64: 2>, scalar_prefetch = 0 : i64, scratch_operands = 0 : i64, tpu.core_type = #tpu.core_type<tc>, window_params = [{transform_indices = @transform_0, window_bounds = array<i64: 1, 4, 290>}, {pipeline_mode = #tpu.pipeline_mode<synchronous>, transform_indices = @transform_1, window_bounds = array<i64: 9, 27, 4>}, {pipeline_mode = #tpu.pipeline_mode<synchronous>, transform_indices = @transform_2, window_bounds = array<i64: 27, 1>}, {pipeline_mode = #tpu.pipeline_mode<synchronous>, transform_indices = @transform_3, window_bounds = array<i64: 2, 256>}, {transform_indices = @transform_4, window_bounds = array<i64: 1, 27, 256>}]} {
    %c0 = arith.constant 0 : index
    %c0_0 = arith.constant 0 : index
    %c0_1 = arith.constant 0 : index
    %0 = vector.load %arg1[%c0, %c0_0, %c0_1] : memref<1x4x290xf32, #tpu.memory_space<vmem>>, vector<1x4x290xf32>
    %1 = vector.shape_cast %0 : vector<1x4x290xf32> to vector<4x290xf32>
    %2 = vector.extract_strided_slice %1 {offsets = [0, 0], sizes = [4, 256], strides = [1, 1]} : vector<4x290xf32> to vector<4x256xf32>
    %c0_2 = arith.constant 0 : index
    %c0_3 = arith.constant 0 : index
    %3 = vector.load %arg4[%c0_2, %c0_3] : memref<2x256xf32, #tpu.memory_space<vmem>>, vector<1x256xf32>
    %4 = vector.broadcast %3 : vector<1x256xf32> to vector<4x256xf32>
    %5 = arith.mulf %2, %4 : vector<4x256xf32>
    %c0_4 = arith.constant 0 : index
    %c0_5 = arith.constant 0 : index
    %c0_6 = arith.constant 0 : index
    %6 = vector.load %arg2[%c0_4, %c0_5, %c0_6] : memref<9x27x4xf32, #tpu.memory_space<vmem>>, vector<1x27x4xf32>
    %7 = vector.shape_cast %6 : vector<1x27x4xf32> to vector<27x4xf32>
    %cst = arith.constant dense<0.000000e+00> : vector<27x256xf32>
    %8 = tpu.matmul %7, %5, %cst {dimension_numbers = #tpu.dot_dimension_numbers<[1], [0], [0], [1], [0, 0, 1, 1], [], []>} : vector<27x4xf32>, vector<4x256xf32>, vector<27x256xf32> -> vector<27x256xf32>
    %9 = vector.extract_strided_slice %1 {offsets = [0, 1], sizes = [4, 256], strides = [1, 1]} : vector<4x290xf32> to vector<4x256xf32>
    %c1 = arith.constant 1 : index
    %c0_7 = arith.constant 0 : index
    %c0_8 = arith.constant 0 : index
    %10 = vector.load %arg2[%c1, %c0_7, %c0_8] : memref<9x27x4xf32, #tpu.memory_space<vmem>>, vector<1x27x4xf32>
    %11 = vector.shape_cast %10 : vector<1x27x4xf32> to vector<27x4xf32>
    %cst_9 = arith.constant dense<0.000000e+00> : vector<27x256xf32>
    %12 = tpu.matmul %11, %9, %cst_9 {dimension_numbers = #tpu.dot_dimension_numbers<[1], [0], [0], [1], [0, 0, 1, 1], [], []>} : vector<27x4xf32>, vector<4x256xf32>, vector<27x256xf32> -> vector<27x256xf32>
    %13 = arith.addf %8, %12 : vector<27x256xf32>
    %14 = vector.extract_strided_slice %1 {offsets = [0, 2], sizes = [4, 256], strides = [1, 1]} : vector<4x290xf32> to vector<4x256xf32>
    %c1_10 = arith.constant 1 : index
    %c0_11 = arith.constant 0 : index
    %15 = vector.load %arg4[%c1_10, %c0_11] : memref<2x256xf32, #tpu.memory_space<vmem>>, vector<1x256xf32>
    %16 = vector.broadcast %15 : vector<1x256xf32> to vector<4x256xf32>
    %17 = arith.mulf %14, %16 : vector<4x256xf32>
    %c2 = arith.constant 2 : index
    %c0_12 = arith.constant 0 : index
    %c0_13 = arith.constant 0 : index
    %18 = vector.load %arg2[%c2, %c0_12, %c0_13] : memref<9x27x4xf32, #tpu.memory_space<vmem>>, vector<1x27x4xf32>
    %19 = vector.shape_cast %18 : vector<1x27x4xf32> to vector<27x4xf32>
    %cst_14 = arith.constant dense<0.000000e+00> : vector<27x256xf32>
    %20 = tpu.matmul %19, %17, %cst_14 {dimension_numbers = #tpu.dot_dimension_numbers<[1], [0], [0], [1], [0, 0, 1, 1], [], []>} : vector<27x4xf32>, vector<4x256xf32>, vector<27x256xf32> -> vector<27x256xf32>
    %21 = arith.addf %13, %20 : vector<27x256xf32>
    %22 = vector.extract_strided_slice %1 {offsets = [0, 16], sizes = [4, 256], strides = [1, 1]} : vector<4x290xf32> to vector<4x256xf32>
    %c0_15 = arith.constant 0 : index
    %c0_16 = arith.constant 0 : index
    %23 = vector.load %arg4[%c0_15, %c0_16] : memref<2x256xf32, #tpu.memory_space<vmem>>, vector<1x256xf32>
    %24 = vector.broadcast %23 : vector<1x256xf32> to vector<4x256xf32>
    %25 = arith.mulf %22, %24 : vector<4x256xf32>
    %c3 = arith.constant 3 : index
    %c0_17 = arith.constant 0 : index
    %c0_18 = arith.constant 0 : index
    %26 = vector.load %arg2[%c3, %c0_17, %c0_18] : memref<9x27x4xf32, #tpu.memory_space<vmem>>, vector<1x27x4xf32>
    %27 = vector.shape_cast %26 : vector<1x27x4xf32> to vector<27x4xf32>
    %cst_19 = arith.constant dense<0.000000e+00> : vector<27x256xf32>
    %28 = tpu.matmul %27, %25, %cst_19 {dimension_numbers = #tpu.dot_dimension_numbers<[1], [0], [0], [1], [0, 0, 1, 1], [], []>} : vector<27x4xf32>, vector<4x256xf32>, vector<27x256xf32> -> vector<27x256xf32>
    %29 = arith.addf %21, %28 : vector<27x256xf32>
    %30 = vector.extract_strided_slice %1 {offsets = [0, 17], sizes = [4, 256], strides = [1, 1]} : vector<4x290xf32> to vector<4x256xf32>
    %c4 = arith.constant 4 : index
    %c0_20 = arith.constant 0 : index
    %c0_21 = arith.constant 0 : index
    %31 = vector.load %arg2[%c4, %c0_20, %c0_21] : memref<9x27x4xf32, #tpu.memory_space<vmem>>, vector<1x27x4xf32>
    %32 = vector.shape_cast %31 : vector<1x27x4xf32> to vector<27x4xf32>
    %cst_22 = arith.constant dense<0.000000e+00> : vector<27x256xf32>
    %33 = tpu.matmul %32, %30, %cst_22 {dimension_numbers = #tpu.dot_dimension_numbers<[1], [0], [0], [1], [0, 0, 1, 1], [], []>} : vector<27x4xf32>, vector<4x256xf32>, vector<27x256xf32> -> vector<27x256xf32>
    %34 = arith.addf %29, %33 : vector<27x256xf32>
    %35 = vector.extract_strided_slice %1 {offsets = [0, 18], sizes = [4, 256], strides = [1, 1]} : vector<4x290xf32> to vector<4x256xf32>
    %c1_23 = arith.constant 1 : index
    %c0_24 = arith.constant 0 : index
    %36 = vector.load %arg4[%c1_23, %c0_24] : memref<2x256xf32, #tpu.memory_space<vmem>>, vector<1x256xf32>
    %37 = vector.broadcast %36 : vector<1x256xf32> to vector<4x256xf32>
    %38 = arith.mulf %35, %37 : vector<4x256xf32>
    %c5 = arith.constant 5 : index
    %c0_25 = arith.constant 0 : index
    %c0_26 = arith.constant 0 : index
    %39 = vector.load %arg2[%c5, %c0_25, %c0_26] : memref<9x27x4xf32, #tpu.memory_space<vmem>>, vector<1x27x4xf32>
    %40 = vector.shape_cast %39 : vector<1x27x4xf32> to vector<27x4xf32>
    %cst_27 = arith.constant dense<0.000000e+00> : vector<27x256xf32>
    %41 = tpu.matmul %40, %38, %cst_27 {dimension_numbers = #tpu.dot_dimension_numbers<[1], [0], [0], [1], [0, 0, 1, 1], [], []>} : vector<27x4xf32>, vector<4x256xf32>, vector<27x256xf32> -> vector<27x256xf32>
    %42 = arith.addf %34, %41 : vector<27x256xf32>
    %43 = vector.extract_strided_slice %1 {offsets = [0, 32], sizes = [4, 256], strides = [1, 1]} : vector<4x290xf32> to vector<4x256xf32>
    %c0_28 = arith.constant 0 : index
    %c0_29 = arith.constant 0 : index
    %44 = vector.load %arg4[%c0_28, %c0_29] : memref<2x256xf32, #tpu.memory_space<vmem>>, vector<1x256xf32>
    %45 = vector.broadcast %44 : vector<1x256xf32> to vector<4x256xf32>
    %46 = arith.mulf %43, %45 : vector<4x256xf32>
    %c6 = arith.constant 6 : index
    %c0_30 = arith.constant 0 : index
    %c0_31 = arith.constant 0 : index
    %47 = vector.load %arg2[%c6, %c0_30, %c0_31] : memref<9x27x4xf32, #tpu.memory_space<vmem>>, vector<1x27x4xf32>
    %48 = vector.shape_cast %47 : vector<1x27x4xf32> to vector<27x4xf32>
    %cst_32 = arith.constant dense<0.000000e+00> : vector<27x256xf32>
    %49 = tpu.matmul %48, %46, %cst_32 {dimension_numbers = #tpu.dot_dimension_numbers<[1], [0], [0], [1], [0, 0, 1, 1], [], []>} : vector<27x4xf32>, vector<4x256xf32>, vector<27x256xf32> -> vector<27x256xf32>
    %50 = arith.addf %42, %49 : vector<27x256xf32>
    %51 = vector.extract_strided_slice %1 {offsets = [0, 33], sizes = [4, 256], strides = [1, 1]} : vector<4x290xf32> to vector<4x256xf32>
    %c7 = arith.constant 7 : index
    %c0_33 = arith.constant 0 : index
    %c0_34 = arith.constant 0 : index
    %52 = vector.load %arg2[%c7, %c0_33, %c0_34] : memref<9x27x4xf32, #tpu.memory_space<vmem>>, vector<1x27x4xf32>
    %53 = vector.shape_cast %52 : vector<1x27x4xf32> to vector<27x4xf32>
    %cst_35 = arith.constant dense<0.000000e+00> : vector<27x256xf32>
    %54 = tpu.matmul %53, %51, %cst_35 {dimension_numbers = #tpu.dot_dimension_numbers<[1], [0], [0], [1], [0, 0, 1, 1], [], []>} : vector<27x4xf32>, vector<4x256xf32>, vector<27x256xf32> -> vector<27x256xf32>
    %55 = arith.addf %50, %54 : vector<27x256xf32>
    %56 = vector.extract_strided_slice %1 {offsets = [0, 34], sizes = [4, 256], strides = [1, 1]} : vector<4x290xf32> to vector<4x256xf32>
    %c1_36 = arith.constant 1 : index
    %c0_37 = arith.constant 0 : index
    %57 = vector.load %arg4[%c1_36, %c0_37] : memref<2x256xf32, #tpu.memory_space<vmem>>, vector<1x256xf32>
    %58 = vector.broadcast %57 : vector<1x256xf32> to vector<4x256xf32>
    %59 = arith.mulf %56, %58 : vector<4x256xf32>
    %c8 = arith.constant 8 : index
    %c0_38 = arith.constant 0 : index
    %c0_39 = arith.constant 0 : index
    %60 = vector.load %arg2[%c8, %c0_38, %c0_39] : memref<9x27x4xf32, #tpu.memory_space<vmem>>, vector<1x27x4xf32>
    %61 = vector.shape_cast %60 : vector<1x27x4xf32> to vector<27x4xf32>
    %cst_40 = arith.constant dense<0.000000e+00> : vector<27x256xf32>
    %62 = tpu.matmul %61, %59, %cst_40 {dimension_numbers = #tpu.dot_dimension_numbers<[1], [0], [0], [1], [0, 0, 1, 1], [], []>} : vector<27x4xf32>, vector<4x256xf32>, vector<27x256xf32> -> vector<27x256xf32>
    %63 = arith.addf %55, %62 : vector<27x256xf32>
    %c0_41 = arith.constant 0 : index
    %c0_42 = arith.constant 0 : index
    %64 = vector.load %arg3[%c0_41, %c0_42] : memref<27x1xf32, #tpu.memory_space<vmem>>, vector<27x1xf32>
    %65 = vector.broadcast %64 : vector<27x1xf32> to vector<27x256xf32>
    %66 = arith.addf %63, %65 : vector<27x256xf32>
    %c0_43 = arith.constant 0 : index
    %c0_44 = arith.constant 0 : index
    %c0_45 = arith.constant 0 : index
    %67 = vector.load %arg5[%c0_43, %c0_44, %c0_45] : memref<1x27x256xf32, #tpu.memory_space<vmem>>, vector<1x27x256xf32>
    %68 = vector.shape_cast %67 : vector<1x27x256xf32> to vector<27x256xf32>
    %69 = vector.shape_cast %66 : vector<27x256xf32> to vector<1x27x256xf32>
    tpu.vector_store %arg5[%c0_43, %c0_44, %c0_45], %69 {strides = array<i32>} : memref<1x27x256xf32, #tpu.memory_space<vmem>>, vector<1x27x256xf32>,
    return
  }
  func.func @transform_0(%arg0: i32) -> (i32, i32, i32) {
    %c0_i32 = arith.constant 0 : i32
    %c0_i32_0 = arith.constant 0 : i32
    %c0_i32_1 = arith.constant 0 : i32
    return %arg0, %c0_i32, %c0_i32_0 : i32, i32, i32
  }
  func.func @transform_1(%arg0: i32) -> (i32, i32, i32) {
    %c0_i32 = arith.constant 0 : i32
    %c0_i32_0 = arith.constant 0 : i32
    %c0_i32_1 = arith.constant 0 : i32
    %c0_i32_2 = arith.constant 0 : i32
    return %c0_i32, %c0_i32_0, %c0_i32_1 : i32, i32, i32
  }
  func.func @transform_2(%arg0: i32) -> (i32, i32) {
    %c0_i32 = arith.constant 0 : i32
    %c0_i32_0 = arith.constant 0 : i32
    %c0_i32_1 = arith.constant 0 : i32
    return %c0_i32, %c0_i32_0 : i32, i32
  }
  func.func @transform_3(%arg0: i32) -> (i32, i32) {
    %c0_i32 = arith.constant 0 : i32
    %c0_i32_0 = arith.constant 0 : i32
    %c0_i32_1 = arith.constant 0 : i32
    return %c0_i32, %c0_i32_0 : i32, i32
  }
  func.func @transform_4(%arg0: i32) -> (i32, i32, i32) {
    %c0_i32 = arith.constant 0 : i32
    %c0_i32_0 = arith.constant 0 : i32
    %c0_i32_1 = arith.constant 0 : i32
    return %arg0, %c0_i32, %c0_i32_0 : i32, i32, i32
  }
}

module attributes {stable_mosaic.version = 11 : i64} {
  func.func @_deform_kernel(%arg0: i32, %arg1: i32, %arg2: memref<1x64x16xbf16, #tpu.memory_space<vmem>>, %arg3: memref<1x27x256xf32, #tpu.memory_space<vmem>>, %arg4: memref<1x4x256xf32, #tpu.memory_space<vmem>>) attributes {dimension_semantics = [#tpu.dimension_semantics<parallel>, #tpu.dimension_semantics<parallel>], iteration_bounds = array<i64: 2, 1>, scalar_prefetch = 0 : i64, scratch_operands = 0 : i64, tpu.core_type = #tpu.core_type<tc>, window_params = [{transform_indices = @transform_0, window_bounds = array<i64: 1, 64, 16>}, {transform_indices = @transform_1, window_bounds = array<i64: 1, 27, 256>}, {transform_indices = @transform_2, window_bounds = array<i64: 1, 4, 256>}]} {
    %c0 = arith.constant 0 : index
    %c0_0 = arith.constant 0 : index
    %c0_1 = arith.constant 0 : index
    %0 = vector.load %arg2[%c0, %c0_0, %c0_1] : memref<1x64x16xbf16, #tpu.memory_space<vmem>>, vector<1x64x16xbf16>
    %1 = vector.shape_cast %0 : vector<1x64x16xbf16> to vector<64x16xbf16>
    %c0_2 = arith.constant 0 : index
    %c0_3 = arith.constant 0 : index
    %c0_4 = arith.constant 0 : index
    %2 = vector.load %arg3[%c0_2, %c0_3, %c0_4] : memref<1x27x256xf32, #tpu.memory_space<vmem>>, vector<1x27x256xf32>
    %3 = vector.shape_cast %2 : vector<1x27x256xf32> to vector<27x256xf32>
    %4 = tpu.iota {dimensions = array<i32: 0>} : vector<16x1xi32>
    %5 = arith.sitofp %4 : vector<16x1xi32> to vector<16x1xf32>
    %6 = tpu.iota {dimensions = array<i32: 0>} : vector<16x1xi32>
    %7 = arith.sitofp %6 : vector<16x1xi32> to vector<16x1xf32>
    %8 = vector.extract_strided_slice %3 {offsets = [0, 0], sizes = [1, 256], strides = [1, 1]} : vector<27x256xf32> to vector<1x256xf32>
    %9 = vector.extract_strided_slice %3 {offsets = [9, 0], sizes = [1, 256], strides = [1, 1]} : vector<27x256xf32> to vector<1x256xf32>
    %10 = vector.extract_strided_slice %3 {offsets = [18, 0], sizes = [1, 256], strides = [1, 1]} : vector<27x256xf32> to vector<1x256xf32>
    %11 = arith.negf %10 : vector<1x256xf32>
    %12 = math.exp %11 : vector<1x256xf32>
    %cst = arith.constant 1.000000e+00 : f32
    %13 = vector.broadcast %cst : f32 to vector<1x256xf32>
    %14 = arith.addf %13, %12 : vector<1x256xf32>
    %15 = arith.divf %13, %14 : vector<1x256xf32>
    %cst_5 = arith.constant 1.000000e+00 : f32
    %16 = vector.broadcast %cst_5 : f32 to vector<1x256xf32>
    %17 = arith.addf %8, %16 : vector<1x256xf32>
    %cst_6 = arith.constant 1.600000e+01 : f32
    %18 = vector.broadcast %cst_6 : f32 to vector<1x256xf32>
    %19 = arith.mulf %17, %18 : vector<1x256xf32>
    %cst_7 = arith.constant 1.000000e+00 : f32
    %20 = vector.broadcast %cst_7 : f32 to vector<1x256xf32>
    %21 = arith.subf %19, %20 : vector<1x256xf32>
    %cst_8 = arith.constant 5.000000e-01 : f32
    %22 = vector.broadcast %cst_8 : f32 to vector<1x256xf32>
    %23 = arith.mulf %21, %22 : vector<1x256xf32>
    %cst_9 = arith.constant 1.000000e+00 : f32
    %24 = vector.broadcast %cst_9 : f32 to vector<1x256xf32>
    %25 = arith.addf %9, %24 : vector<1x256xf32>
    %cst_10 = arith.constant 1.600000e+01 : f32
    %26 = vector.broadcast %cst_10 : f32 to vector<1x256xf32>
    %27 = arith.mulf %25, %26 : vector<1x256xf32>
    %cst_11 = arith.constant 1.000000e+00 : f32
    %28 = vector.broadcast %cst_11 : f32 to vector<1x256xf32>
    %29 = arith.subf %27, %28 : vector<1x256xf32>
    %cst_12 = arith.constant 5.000000e-01 : f32
    %30 = vector.broadcast %cst_12 : f32 to vector<1x256xf32>
    %31 = arith.mulf %29, %30 : vector<1x256xf32>
    %32 = math.floor %23 : vector<1x256xf32>
    %33 = math.floor %31 : vector<1x256xf32>
    %34 = arith.subf %23, %32 : vector<1x256xf32>
    %cst_13 = arith.constant 1.000000e+00 : f32
    %35 = vector.broadcast %cst_13 : f32 to vector<1x256xf32>
    %36 = arith.subf %35, %34 : vector<1x256xf32>
    %37 = arith.subf %31, %33 : vector<1x256xf32>
    %cst_14 = arith.constant 1.000000e+00 : f32
    %38 = vector.broadcast %cst_14 : f32 to vector<1x256xf32>
    %39 = arith.subf %38, %37 : vector<1x256xf32>
    %40 = vector.broadcast %5 : vector<16x1xf32> to vector<16x256xf32>
    %41 = vector.broadcast %32 : vector<1x256xf32> to vector<16x256xf32>
    %42 = arith.cmpf oeq, %40, %41 : vector<16x256xf32>
    %cst_15 = arith.constant 0.000000e+00 : f32
    %43 = vector.shape_cast %36 : vector<1x256xf32> to vector<1x256xf32>
    %44 = vector.broadcast %43 : vector<1x256xf32> to vector<16x256xf32>
    %45 = vector.broadcast %cst_15 : f32 to vector<16x256xf32>
    %46 = arith.select %42, %44, %45 : vector<16x256xi1>, vector<16x256xf32>
    %cst_16 = arith.constant 1.000000e+00 : f32
    %47 = vector.broadcast %cst_16 : f32 to vector<1x256xf32>
    %48 = arith.addf %32, %47 : vector<1x256xf32>
    %49 = vector.broadcast %5 : vector<16x1xf32> to vector<16x256xf32>
    %50 = vector.broadcast %48 : vector<1x256xf32> to vector<16x256xf32>
    %51 = arith.cmpf oeq, %49, %50 : vector<16x256xf32>
    %cst_17 = arith.constant 0.000000e+00 : f32
    %52 = vector.shape_cast %34 : vector<1x256xf32> to vector<1x256xf32>
    %53 = vector.broadcast %52 : vector<1x256xf32> to vector<16x256xf32>
    %54 = vector.broadcast %cst_17 : f32 to vector<16x256xf32>
    %55 = arith.select %51, %53, %54 : vector<16x256xi1>, vector<16x256xf32>
    %56 = arith.addf %46, %55 : vector<16x256xf32>
    %57 = vector.broadcast %7 : vector<16x1xf32> to vector<16x256xf32>
    %58 = vector.broadcast %33 : vector<1x256xf32> to vector<16x256xf32>
    %59 = arith.cmpf oeq, %57, %58 : vector<16x256xf32>
    %cst_18 = arith.constant 0.000000e+00 : f32
    %60 = vector.shape_cast %39 : vector<1x256xf32> to vector<1x256xf32>
    %61 = vector.broadcast %60 : vector<1x256xf32> to vector<16x256xf32>
    %62 = vector.broadcast %cst_18 : f32 to vector<16x256xf32>
    %63 = arith.select %59, %61, %62 : vector<16x256xi1>, vector<16x256xf32>
    %cst_19 = arith.constant 1.000000e+00 : f32
    %64 = vector.broadcast %cst_19 : f32 to vector<1x256xf32>
    %65 = arith.addf %33, %64 : vector<1x256xf32>
    %66 = vector.broadcast %7 : vector<16x1xf32> to vector<16x256xf32>
    %67 = vector.broadcast %65 : vector<1x256xf32> to vector<16x256xf32>
    %68 = arith.cmpf oeq, %66, %67 : vector<16x256xf32>
    %cst_20 = arith.constant 0.000000e+00 : f32
    %69 = vector.shape_cast %37 : vector<1x256xf32> to vector<1x256xf32>
    %70 = vector.broadcast %69 : vector<1x256xf32> to vector<16x256xf32>
    %71 = vector.broadcast %cst_20 : f32 to vector<16x256xf32>
    %72 = arith.select %68, %70, %71 : vector<16x256xi1>, vector<16x256xf32>
    %73 = arith.addf %63, %72 : vector<16x256xf32>
    %74 = vector.broadcast %15 : vector<1x256xf32> to vector<16x256xf32>
    %75 = arith.mulf %73, %74 : vector<16x256xf32>
    %76 = arith.truncf %56 : vector<16x256xf32> to vector<16x256xbf16>
    %cst_21 = arith.constant dense<0.000000e+00> : vector<64x256xf32>
    %77 = tpu.matmul %1, %76, %cst_21 {dimension_numbers = #tpu.dot_dimension_numbers<[1], [0], [0], [1], [0, 0, 1, 1], [], []>} : vector<64x16xbf16>, vector<16x256xbf16>, vector<64x256xf32> -> vector<64x256xf32>
    %78 = vector.shape_cast %77 : vector<64x256xf32> to vector<4x16x256xf32>
    %79 = vector.shape_cast %75 : vector<16x256xf32> to vector<1x16x256xf32>
    %80 = vector.broadcast %79 : vector<1x16x256xf32> to vector<4x16x256xf32>
    %81 = arith.mulf %78, %80 : vector<4x16x256xf32>
    %cst_22 = arith.constant dense<0.000000e+00> : vector<4x256xf32>
    %82 = vector.multi_reduction <add>, %81, %cst_22 [1] : vector<4x16x256xf32> to vector<4x256xf32>
    %83 = vector.extract_strided_slice %3 {offsets = [1, 0], sizes = [1, 256], strides = [1, 1]} : vector<27x256xf32> to vector<1x256xf32>
    %84 = vector.extract_strided_slice %3 {offsets = [10, 0], sizes = [1, 256], strides = [1, 1]} : vector<27x256xf32> to vector<1x256xf32>
    %85 = vector.extract_strided_slice %3 {offsets = [19, 0], sizes = [1, 256], strides = [1, 1]} : vector<27x256xf32> to vector<1x256xf32>
    %86 = arith.negf %85 : vector<1x256xf32>
    %87 = math.exp %86 : vector<1x256xf32>
    %cst_23 = arith.constant 1.000000e+00 : f32
    %88 = vector.broadcast %cst_23 : f32 to vector<1x256xf32>
    %89 = arith.addf %88, %87 : vector<1x256xf32>
    %90 = arith.divf %88, %89 : vector<1x256xf32>
    %cst_24 = arith.constant 1.000000e+00 : f32
    %91 = vector.broadcast %cst_24 : f32 to vector<1x256xf32>
    %92 = arith.addf %83, %91 : vector<1x256xf32>
    %cst_25 = arith.constant 1.600000e+01 : f32
    %93 = vector.broadcast %cst_25 : f32 to vector<1x256xf32>
    %94 = arith.mulf %92, %93 : vector<1x256xf32>
    %cst_26 = arith.constant 1.000000e+00 : f32
    %95 = vector.broadcast %cst_26 : f32 to vector<1x256xf32>
    %96 = arith.subf %94, %95 : vector<1x256xf32>
    %cst_27 = arith.constant 5.000000e-01 : f32
    %97 = vector.broadcast %cst_27 : f32 to vector<1x256xf32>
    %98 = arith.mulf %96, %97 : vector<1x256xf32>
    %cst_28 = arith.constant 1.000000e+00 : f32
    %99 = vector.broadcast %cst_28 : f32 to vector<1x256xf32>
    %100 = arith.addf %84, %99 : vector<1x256xf32>
    %cst_29 = arith.constant 1.600000e+01 : f32
    %101 = vector.broadcast %cst_29 : f32 to vector<1x256xf32>
    %102 = arith.mulf %100, %101 : vector<1x256xf32>
    %cst_30 = arith.constant 1.000000e+00 : f32
    %103 = vector.broadcast %cst_30 : f32 to vector<1x256xf32>
    %104 = arith.subf %102, %103 : vector<1x256xf32>
    %cst_31 = arith.constant 5.000000e-01 : f32
    %105 = vector.broadcast %cst_31 : f32 to vector<1x256xf32>
    %106 = arith.mulf %104, %105 : vector<1x256xf32>
    %107 = math.floor %98 : vector<1x256xf32>
    %108 = math.floor %106 : vector<1x256xf32>
    %109 = arith.subf %98, %107 : vector<1x256xf32>
    %cst_32 = arith.constant 1.000000e+00 : f32
    %110 = vector.broadcast %cst_32 : f32 to vector<1x256xf32>
    %111 = arith.subf %110, %109 : vector<1x256xf32>
    %112 = arith.subf %106, %108 : vector<1x256xf32>
    %cst_33 = arith.constant 1.000000e+00 : f32
    %113 = vector.broadcast %cst_33 : f32 to vector<1x256xf32>
    %114 = arith.subf %113, %112 : vector<1x256xf32>
    %115 = vector.broadcast %5 : vector<16x1xf32> to vector<16x256xf32>
    %116 = vector.broadcast %107 : vector<1x256xf32> to vector<16x256xf32>
    %117 = arith.cmpf oeq, %115, %116 : vector<16x256xf32>
    %cst_34 = arith.constant 0.000000e+00 : f32
    %118 = vector.shape_cast %111 : vector<1x256xf32> to vector<1x256xf32>
    %119 = vector.broadcast %118 : vector<1x256xf32> to vector<16x256xf32>
    %120 = vector.broadcast %cst_34 : f32 to vector<16x256xf32>
    %121 = arith.select %117, %119, %120 : vector<16x256xi1>, vector<16x256xf32>
    %cst_35 = arith.constant 1.000000e+00 : f32
    %122 = vector.broadcast %cst_35 : f32 to vector<1x256xf32>
    %123 = arith.addf %107, %122 : vector<1x256xf32>
    %124 = vector.broadcast %5 : vector<16x1xf32> to vector<16x256xf32>
    %125 = vector.broadcast %123 : vector<1x256xf32> to vector<16x256xf32>
    %126 = arith.cmpf oeq, %124, %125 : vector<16x256xf32>
    %cst_36 = arith.constant 0.000000e+00 : f32
    %127 = vector.shape_cast %109 : vector<1x256xf32> to vector<1x256xf32>
    %128 = vector.broadcast %127 : vector<1x256xf32> to vector<16x256xf32>
    %129 = vector.broadcast %cst_36 : f32 to vector<16x256xf32>
    %130 = arith.select %126, %128, %129 : vector<16x256xi1>, vector<16x256xf32>
    %131 = arith.addf %121, %130 : vector<16x256xf32>
    %132 = vector.broadcast %7 : vector<16x1xf32> to vector<16x256xf32>
    %133 = vector.broadcast %108 : vector<1x256xf32> to vector<16x256xf32>
    %134 = arith.cmpf oeq, %132, %133 : vector<16x256xf32>
    %cst_37 = arith.constant 0.000000e+00 : f32
    %135 = vector.shape_cast %114 : vector<1x256xf32> to vector<1x256xf32>
    %136 = vector.broadcast %135 : vector<1x256xf32> to vector<16x256xf32>
    %137 = vector.broadcast %cst_37 : f32 to vector<16x256xf32>
    %138 = arith.select %134, %136, %137 : vector<16x256xi1>, vector<16x256xf32>
    %cst_38 = arith.constant 1.000000e+00 : f32
    %139 = vector.broadcast %cst_38 : f32 to vector<1x256xf32>
    %140 = arith.addf %108, %139 : vector<1x256xf32>
    %141 = vector.broadcast %7 : vector<16x1xf32> to vector<16x256xf32>
    %142 = vector.broadcast %140 : vector<1x256xf32> to vector<16x256xf32>
    %143 = arith.cmpf oeq, %141, %142 : vector<16x256xf32>
    %cst_39 = arith.constant 0.000000e+00 : f32
    %144 = vector.shape_cast %112 : vector<1x256xf32> to vector<1x256xf32>
    %145 = vector.broadcast %144 : vector<1x256xf32> to vector<16x256xf32>
    %146 = vector.broadcast %cst_39 : f32 to vector<16x256xf32>
    %147 = arith.select %143, %145, %146 : vector<16x256xi1>, vector<16x256xf32>
    %148 = arith.addf %138, %147 : vector<16x256xf32>
    %149 = vector.broadcast %90 : vector<1x256xf32> to vector<16x256xf32>
    %150 = arith.mulf %148, %149 : vector<16x256xf32>
    %151 = arith.truncf %131 : vector<16x256xf32> to vector<16x256xbf16>
    %cst_40 = arith.constant dense<0.000000e+00> : vector<64x256xf32>
    %152 = tpu.matmul %1, %151, %cst_40 {dimension_numbers = #tpu.dot_dimension_numbers<[1], [0], [0], [1], [0, 0, 1, 1], [], []>} : vector<64x16xbf16>, vector<16x256xbf16>, vector<64x256xf32> -> vector<64x256xf32>
    %153 = vector.shape_cast %152 : vector<64x256xf32> to vector<4x16x256xf32>
    %154 = vector.shape_cast %150 : vector<16x256xf32> to vector<1x16x256xf32>
    %155 = vector.broadcast %154 : vector<1x16x256xf32> to vector<4x16x256xf32>
    %156 = arith.mulf %153, %155 : vector<4x16x256xf32>
    %cst_41 = arith.constant dense<0.000000e+00> : vector<4x256xf32>
    %157 = vector.multi_reduction <add>, %156, %cst_41 [1] : vector<4x16x256xf32> to vector<4x256xf32>
    %158 = arith.addf %82, %157 : vector<4x256xf32>
    %159 = vector.extract_strided_slice %3 {offsets = [2, 0], sizes = [1, 256], strides = [1, 1]} : vector<27x256xf32> to vector<1x256xf32>
    %160 = vector.extract_strided_slice %3 {offsets = [11, 0], sizes = [1, 256], strides = [1, 1]} : vector<27x256xf32> to vector<1x256xf32>
    %161 = vector.extract_strided_slice %3 {offsets = [20, 0], sizes = [1, 256], strides = [1, 1]} : vector<27x256xf32> to vector<1x256xf32>
    %162 = arith.negf %161 : vector<1x256xf32>
    %163 = math.exp %162 : vector<1x256xf32>
    %cst_42 = arith.constant 1.000000e+00 : f32
    %164 = vector.broadcast %cst_42 : f32 to vector<1x256xf32>
    %165 = arith.addf %164, %163 : vector<1x256xf32>
    %166 = arith.divf %164, %165 : vector<1x256xf32>
    %cst_43 = arith.constant 1.000000e+00 : f32
    %167 = vector.broadcast %cst_43 : f32 to vector<1x256xf32>
    %168 = arith.addf %159, %167 : vector<1x256xf32>
    %cst_44 = arith.constant 1.600000e+01 : f32
    %169 = vector.broadcast %cst_44 : f32 to vector<1x256xf32>
    %170 = arith.mulf %168, %169 : vector<1x256xf32>
    %cst_45 = arith.constant 1.000000e+00 : f32
    %171 = vector.broadcast %cst_45 : f32 to vector<1x256xf32>
    %172 = arith.subf %170, %171 : vector<1x256xf32>
    %cst_46 = arith.constant 5.000000e-01 : f32
    %173 = vector.broadcast %cst_46 : f32 to vector<1x256xf32>
    %174 = arith.mulf %172, %173 : vector<1x256xf32>
    %cst_47 = arith.constant 1.000000e+00 : f32
    %175 = vector.broadcast %cst_47 : f32 to vector<1x256xf32>
    %176 = arith.addf %160, %175 : vector<1x256xf32>
    %cst_48 = arith.constant 1.600000e+01 : f32
    %177 = vector.broadcast %cst_48 : f32 to vector<1x256xf32>
    %178 = arith.mulf %176, %177 : vector<1x256xf32>
    %cst_49 = arith.constant 1.000000e+00 : f32
    %179 = vector.broadcast %cst_49 : f32 to vector<1x256xf32>
    %180 = arith.subf %178, %179 : vector<1x256xf32>
    %cst_50 = arith.constant 5.000000e-01 : f32
    %181 = vector.broadcast %cst_50 : f32 to vector<1x256xf32>
    %182 = arith.mulf %180, %181 : vector<1x256xf32>
    %183 = math.floor %174 : vector<1x256xf32>
    %184 = math.floor %182 : vector<1x256xf32>
    %185 = arith.subf %174, %183 : vector<1x256xf32>
    %cst_51 = arith.constant 1.000000e+00 : f32
    %186 = vector.broadcast %cst_51 : f32 to vector<1x256xf32>
    %187 = arith.subf %186, %185 : vector<1x256xf32>
    %188 = arith.subf %182, %184 : vector<1x256xf32>
    %cst_52 = arith.constant 1.000000e+00 : f32
    %189 = vector.broadcast %cst_52 : f32 to vector<1x256xf32>
    %190 = arith.subf %189, %188 : vector<1x256xf32>
    %191 = vector.broadcast %5 : vector<16x1xf32> to vector<16x256xf32>
    %192 = vector.broadcast %183 : vector<1x256xf32> to vector<16x256xf32>
    %193 = arith.cmpf oeq, %191, %192 : vector<16x256xf32>
    %cst_53 = arith.constant 0.000000e+00 : f32
    %194 = vector.shape_cast %187 : vector<1x256xf32> to vector<1x256xf32>
    %195 = vector.broadcast %194 : vector<1x256xf32> to vector<16x256xf32>
    %196 = vector.broadcast %cst_53 : f32 to vector<16x256xf32>
    %197 = arith.select %193, %195, %196 : vector<16x256xi1>, vector<16x256xf32>
    %cst_54 = arith.constant 1.000000e+00 : f32
    %198 = vector.broadcast %cst_54 : f32 to vector<1x256xf32>
    %199 = arith.addf %183, %198 : vector<1x256xf32>
    %200 = vector.broadcast %5 : vector<16x1xf32> to vector<16x256xf32>
    %201 = vector.broadcast %199 : vector<1x256xf32> to vector<16x256xf32>
    %202 = arith.cmpf oeq, %200, %201 : vector<16x256xf32>
    %cst_55 = arith.constant 0.000000e+00 : f32
    %203 = vector.shape_cast %185 : vector<1x256xf32> to vector<1x256xf32>
    %204 = vector.broadcast %203 : vector<1x256xf32> to vector<16x256xf32>
    %205 = vector.broadcast %cst_55 : f32 to vector<16x256xf32>
    %206 = arith.select %202, %204, %205 : vector<16x256xi1>, vector<16x256xf32>
    %207 = arith.addf %197, %206 : vector<16x256xf32>
    %208 = vector.broadcast %7 : vector<16x1xf32> to vector<16x256xf32>
    %209 = vector.broadcast %184 : vector<1x256xf32> to vector<16x256xf32>
    %210 = arith.cmpf oeq, %208, %209 : vector<16x256xf32>
    %cst_56 = arith.constant 0.000000e+00 : f32
    %211 = vector.shape_cast %190 : vector<1x256xf32> to vector<1x256xf32>
    %212 = vector.broadcast %211 : vector<1x256xf32> to vector<16x256xf32>
    %213 = vector.broadcast %cst_56 : f32 to vector<16x256xf32>
    %214 = arith.select %210, %212, %213 : vector<16x256xi1>, vector<16x256xf32>
    %cst_57 = arith.constant 1.000000e+00 : f32
    %215 = vector.broadcast %cst_57 : f32 to vector<1x256xf32>
    %216 = arith.addf %184, %215 : vector<1x256xf32>
    %217 = vector.broadcast %7 : vector<16x1xf32> to vector<16x256xf32>
    %218 = vector.broadcast %216 : vector<1x256xf32> to vector<16x256xf32>
    %219 = arith.cmpf oeq, %217, %218 : vector<16x256xf32>
    %cst_58 = arith.constant 0.000000e+00 : f32
    %220 = vector.shape_cast %188 : vector<1x256xf32> to vector<1x256xf32>
    %221 = vector.broadcast %220 : vector<1x256xf32> to vector<16x256xf32>
    %222 = vector.broadcast %cst_58 : f32 to vector<16x256xf32>
    %223 = arith.select %219, %221, %222 : vector<16x256xi1>, vector<16x256xf32>
    %224 = arith.addf %214, %223 : vector<16x256xf32>
    %225 = vector.broadcast %166 : vector<1x256xf32> to vector<16x256xf32>
    %226 = arith.mulf %224, %225 : vector<16x256xf32>
    %227 = arith.truncf %207 : vector<16x256xf32> to vector<16x256xbf16>
    %cst_59 = arith.constant dense<0.000000e+00> : vector<64x256xf32>
    %228 = tpu.matmul %1, %227, %cst_59 {dimension_numbers = #tpu.dot_dimension_numbers<[1], [0], [0], [1], [0, 0, 1, 1], [], []>} : vector<64x16xbf16>, vector<16x256xbf16>, vector<64x256xf32> -> vector<64x256xf32>
    %229 = vector.shape_cast %228 : vector<64x256xf32> to vector<4x16x256xf32>
    %230 = vector.shape_cast %226 : vector<16x256xf32> to vector<1x16x256xf32>
    %231 = vector.broadcast %230 : vector<1x16x256xf32> to vector<4x16x256xf32>
    %232 = arith.mulf %229, %231 : vector<4x16x256xf32>
    %cst_60 = arith.constant dense<0.000000e+00> : vector<4x256xf32>
    %233 = vector.multi_reduction <add>, %232, %cst_60 [1] : vector<4x16x256xf32> to vector<4x256xf32>
    %234 = arith.addf %158, %233 : vector<4x256xf32>
    %235 = vector.extract_strided_slice %3 {offsets = [3, 0], sizes = [1, 256], strides = [1, 1]} : vector<27x256xf32> to vector<1x256xf32>
    %236 = vector.extract_strided_slice %3 {offsets = [12, 0], sizes = [1, 256], strides = [1, 1]} : vector<27x256xf32> to vector<1x256xf32>
    %237 = vector.extract_strided_slice %3 {offsets = [21, 0], sizes = [1, 256], strides = [1, 1]} : vector<27x256xf32> to vector<1x256xf32>
    %238 = arith.negf %237 : vector<1x256xf32>
    %239 = math.exp %238 : vector<1x256xf32>
    %cst_61 = arith.constant 1.000000e+00 : f32
    %240 = vector.broadcast %cst_61 : f32 to vector<1x256xf32>
    %241 = arith.addf %240, %239 : vector<1x256xf32>
    %242 = arith.divf %240, %241 : vector<1x256xf32>
    %cst_62 = arith.constant 1.000000e+00 : f32
    %243 = vector.broadcast %cst_62 : f32 to vector<1x256xf32>
    %244 = arith.addf %235, %243 : vector<1x256xf32>
    %cst_63 = arith.constant 1.600000e+01 : f32
    %245 = vector.broadcast %cst_63 : f32 to vector<1x256xf32>
    %246 = arith.mulf %244, %245 : vector<1x256xf32>
    %cst_64 = arith.constant 1.000000e+00 : f32
    %247 = vector.broadcast %cst_64 : f32 to vector<1x256xf32>
    %248 = arith.subf %246, %247 : vector<1x256xf32>
    %cst_65 = arith.constant 5.000000e-01 : f32
    %249 = vector.broadcast %cst_65 : f32 to vector<1x256xf32>
    %250 = arith.mulf %248, %249 : vector<1x256xf32>
    %cst_66 = arith.constant 1.000000e+00 : f32
    %251 = vector.broadcast %cst_66 : f32 to vector<1x256xf32>
    %252 = arith.addf %236, %251 : vector<1x256xf32>
    %cst_67 = arith.constant 1.600000e+01 : f32
    %253 = vector.broadcast %cst_67 : f32 to vector<1x256xf32>
    %254 = arith.mulf %252, %253 : vector<1x256xf32>
    %cst_68 = arith.constant 1.000000e+00 : f32
    %255 = vector.broadcast %cst_68 : f32 to vector<1x256xf32>
    %256 = arith.subf %254, %255 : vector<1x256xf32>
    %cst_69 = arith.constant 5.000000e-01 : f32
    %257 = vector.broadcast %cst_69 : f32 to vector<1x256xf32>
    %258 = arith.mulf %256, %257 : vector<1x256xf32>
    %259 = math.floor %250 : vector<1x256xf32>
    %260 = math.floor %258 : vector<1x256xf32>
    %261 = arith.subf %250, %259 : vector<1x256xf32>
    %cst_70 = arith.constant 1.000000e+00 : f32
    %262 = vector.broadcast %cst_70 : f32 to vector<1x256xf32>
    %263 = arith.subf %262, %261 : vector<1x256xf32>
    %264 = arith.subf %258, %260 : vector<1x256xf32>
    %cst_71 = arith.constant 1.000000e+00 : f32
    %265 = vector.broadcast %cst_71 : f32 to vector<1x256xf32>
    %266 = arith.subf %265, %264 : vector<1x256xf32>
    %267 = vector.broadcast %5 : vector<16x1xf32> to vector<16x256xf32>
    %268 = vector.broadcast %259 : vector<1x256xf32> to vector<16x256xf32>
    %269 = arith.cmpf oeq, %267, %268 : vector<16x256xf32>
    %cst_72 = arith.constant 0.000000e+00 : f32
    %270 = vector.shape_cast %263 : vector<1x256xf32> to vector<1x256xf32>
    %271 = vector.broadcast %270 : vector<1x256xf32> to vector<16x256xf32>
    %272 = vector.broadcast %cst_72 : f32 to vector<16x256xf32>
    %273 = arith.select %269, %271, %272 : vector<16x256xi1>, vector<16x256xf32>
    %cst_73 = arith.constant 1.000000e+00 : f32
    %274 = vector.broadcast %cst_73 : f32 to vector<1x256xf32>
    %275 = arith.addf %259, %274 : vector<1x256xf32>
    %276 = vector.broadcast %5 : vector<16x1xf32> to vector<16x256xf32>
    %277 = vector.broadcast %275 : vector<1x256xf32> to vector<16x256xf32>
    %278 = arith.cmpf oeq, %276, %277 : vector<16x256xf32>
    %cst_74 = arith.constant 0.000000e+00 : f32
    %279 = vector.shape_cast %261 : vector<1x256xf32> to vector<1x256xf32>
    %280 = vector.broadcast %279 : vector<1x256xf32> to vector<16x256xf32>
    %281 = vector.broadcast %cst_74 : f32 to vector<16x256xf32>
    %282 = arith.select %278, %280, %281 : vector<16x256xi1>, vector<16x256xf32>
    %283 = arith.addf %273, %282 : vector<16x256xf32>
    %284 = vector.broadcast %7 : vector<16x1xf32> to vector<16x256xf32>
    %285 = vector.broadcast %260 : vector<1x256xf32> to vector<16x256xf32>
    %286 = arith.cmpf oeq, %284, %285 : vector<16x256xf32>
    %cst_75 = arith.constant 0.000000e+00 : f32
    %287 = vector.shape_cast %266 : vector<1x256xf32> to vector<1x256xf32>
    %288 = vector.broadcast %287 : vector<1x256xf32> to vector<16x256xf32>
    %289 = vector.broadcast %cst_75 : f32 to vector<16x256xf32>
    %290 = arith.select %286, %288, %289 : vector<16x256xi1>, vector<16x256xf32>
    %cst_76 = arith.constant 1.000000e+00 : f32
    %291 = vector.broadcast %cst_76 : f32 to vector<1x256xf32>
    %292 = arith.addf %260, %291 : vector<1x256xf32>
    %293 = vector.broadcast %7 : vector<16x1xf32> to vector<16x256xf32>
    %294 = vector.broadcast %292 : vector<1x256xf32> to vector<16x256xf32>
    %295 = arith.cmpf oeq, %293, %294 : vector<16x256xf32>
    %cst_77 = arith.constant 0.000000e+00 : f32
    %296 = vector.shape_cast %264 : vector<1x256xf32> to vector<1x256xf32>
    %297 = vector.broadcast %296 : vector<1x256xf32> to vector<16x256xf32>
    %298 = vector.broadcast %cst_77 : f32 to vector<16x256xf32>
    %299 = arith.select %295, %297, %298 : vector<16x256xi1>, vector<16x256xf32>
    %300 = arith.addf %290, %299 : vector<16x256xf32>
    %301 = vector.broadcast %242 : vector<1x256xf32> to vector<16x256xf32>
    %302 = arith.mulf %300, %301 : vector<16x256xf32>
    %303 = arith.truncf %283 : vector<16x256xf32> to vector<16x256xbf16>
    %cst_78 = arith.constant dense<0.000000e+00> : vector<64x256xf32>
    %304 = tpu.matmul %1, %303, %cst_78 {dimension_numbers = #tpu.dot_dimension_numbers<[1], [0], [0], [1], [0, 0, 1, 1], [], []>} : vector<64x16xbf16>, vector<16x256xbf16>, vector<64x256xf32> -> vector<64x256xf32>
    %305 = vector.shape_cast %304 : vector<64x256xf32> to vector<4x16x256xf32>
    %306 = vector.shape_cast %302 : vector<16x256xf32> to vector<1x16x256xf32>
    %307 = vector.broadcast %306 : vector<1x16x256xf32> to vector<4x16x256xf32>
    %308 = arith.mulf %305, %307 : vector<4x16x256xf32>
    %cst_79 = arith.constant dense<0.000000e+00> : vector<4x256xf32>
    %309 = vector.multi_reduction <add>, %308, %cst_79 [1] : vector<4x16x256xf32> to vector<4x256xf32>
    %310 = arith.addf %234, %309 : vector<4x256xf32>
    %311 = vector.extract_strided_slice %3 {offsets = [4, 0], sizes = [1, 256], strides = [1, 1]} : vector<27x256xf32> to vector<1x256xf32>
    %312 = vector.extract_strided_slice %3 {offsets = [13, 0], sizes = [1, 256], strides = [1, 1]} : vector<27x256xf32> to vector<1x256xf32>
    %313 = vector.extract_strided_slice %3 {offsets = [22, 0], sizes = [1, 256], strides = [1, 1]} : vector<27x256xf32> to vector<1x256xf32>
    %314 = arith.negf %313 : vector<1x256xf32>
    %315 = math.exp %314 : vector<1x256xf32>
    %cst_80 = arith.constant 1.000000e+00 : f32
    %316 = vector.broadcast %cst_80 : f32 to vector<1x256xf32>
    %317 = arith.addf %316, %315 : vector<1x256xf32>
    %318 = arith.divf %316, %317 : vector<1x256xf32>
    %cst_81 = arith.constant 1.000000e+00 : f32
    %319 = vector.broadcast %cst_81 : f32 to vector<1x256xf32>
    %320 = arith.addf %311, %319 : vector<1x256xf32>
    %cst_82 = arith.constant 1.600000e+01 : f32
    %321 = vector.broadcast %cst_82 : f32 to vector<1x256xf32>
    %322 = arith.mulf %320, %321 : vector<1x256xf32>
    %cst_83 = arith.constant 1.000000e+00 : f32
    %323 = vector.broadcast %cst_83 : f32 to vector<1x256xf32>
    %324 = arith.subf %322, %323 : vector<1x256xf32>
    %cst_84 = arith.constant 5.000000e-01 : f32
    %325 = vector.broadcast %cst_84 : f32 to vector<1x256xf32>
    %326 = arith.mulf %324, %325 : vector<1x256xf32>
    %cst_85 = arith.constant 1.000000e+00 : f32
    %327 = vector.broadcast %cst_85 : f32 to vector<1x256xf32>
    %328 = arith.addf %312, %327 : vector<1x256xf32>
    %cst_86 = arith.constant 1.600000e+01 : f32
    %329 = vector.broadcast %cst_86 : f32 to vector<1x256xf32>
    %330 = arith.mulf %328, %329 : vector<1x256xf32>
    %cst_87 = arith.constant 1.000000e+00 : f32
    %331 = vector.broadcast %cst_87 : f32 to vector<1x256xf32>
    %332 = arith.subf %330, %331 : vector<1x256xf32>
    %cst_88 = arith.constant 5.000000e-01 : f32
    %333 = vector.broadcast %cst_88 : f32 to vector<1x256xf32>
    %334 = arith.mulf %332, %333 : vector<1x256xf32>
    %335 = math.floor %326 : vector<1x256xf32>
    %336 = math.floor %334 : vector<1x256xf32>
    %337 = arith.subf %326, %335 : vector<1x256xf32>
    %cst_89 = arith.constant 1.000000e+00 : f32
    %338 = vector.broadcast %cst_89 : f32 to vector<1x256xf32>
    %339 = arith.subf %338, %337 : vector<1x256xf32>
    %340 = arith.subf %334, %336 : vector<1x256xf32>
    %cst_90 = arith.constant 1.000000e+00 : f32
    %341 = vector.broadcast %cst_90 : f32 to vector<1x256xf32>
    %342 = arith.subf %341, %340 : vector<1x256xf32>
    %343 = vector.broadcast %5 : vector<16x1xf32> to vector<16x256xf32>
    %344 = vector.broadcast %335 : vector<1x256xf32> to vector<16x256xf32>
    %345 = arith.cmpf oeq, %343, %344 : vector<16x256xf32>
    %cst_91 = arith.constant 0.000000e+00 : f32
    %346 = vector.shape_cast %339 : vector<1x256xf32> to vector<1x256xf32>
    %347 = vector.broadcast %346 : vector<1x256xf32> to vector<16x256xf32>
    %348 = vector.broadcast %cst_91 : f32 to vector<16x256xf32>
    %349 = arith.select %345, %347, %348 : vector<16x256xi1>, vector<16x256xf32>
    %cst_92 = arith.constant 1.000000e+00 : f32
    %350 = vector.broadcast %cst_92 : f32 to vector<1x256xf32>
    %351 = arith.addf %335, %350 : vector<1x256xf32>
    %352 = vector.broadcast %5 : vector<16x1xf32> to vector<16x256xf32>
    %353 = vector.broadcast %351 : vector<1x256xf32> to vector<16x256xf32>
    %354 = arith.cmpf oeq, %352, %353 : vector<16x256xf32>
    %cst_93 = arith.constant 0.000000e+00 : f32
    %355 = vector.shape_cast %337 : vector<1x256xf32> to vector<1x256xf32>
    %356 = vector.broadcast %355 : vector<1x256xf32> to vector<16x256xf32>
    %357 = vector.broadcast %cst_93 : f32 to vector<16x256xf32>
    %358 = arith.select %354, %356, %357 : vector<16x256xi1>, vector<16x256xf32>
    %359 = arith.addf %349, %358 : vector<16x256xf32>
    %360 = vector.broadcast %7 : vector<16x1xf32> to vector<16x256xf32>
    %361 = vector.broadcast %336 : vector<1x256xf32> to vector<16x256xf32>
    %362 = arith.cmpf oeq, %360, %361 : vector<16x256xf32>
    %cst_94 = arith.constant 0.000000e+00 : f32
    %363 = vector.shape_cast %342 : vector<1x256xf32> to vector<1x256xf32>
    %364 = vector.broadcast %363 : vector<1x256xf32> to vector<16x256xf32>
    %365 = vector.broadcast %cst_94 : f32 to vector<16x256xf32>
    %366 = arith.select %362, %364, %365 : vector<16x256xi1>, vector<16x256xf32>
    %cst_95 = arith.constant 1.000000e+00 : f32
    %367 = vector.broadcast %cst_95 : f32 to vector<1x256xf32>
    %368 = arith.addf %336, %367 : vector<1x256xf32>
    %369 = vector.broadcast %7 : vector<16x1xf32> to vector<16x256xf32>
    %370 = vector.broadcast %368 : vector<1x256xf32> to vector<16x256xf32>
    %371 = arith.cmpf oeq, %369, %370 : vector<16x256xf32>
    %cst_96 = arith.constant 0.000000e+00 : f32
    %372 = vector.shape_cast %340 : vector<1x256xf32> to vector<1x256xf32>
    %373 = vector.broadcast %372 : vector<1x256xf32> to vector<16x256xf32>
    %374 = vector.broadcast %cst_96 : f32 to vector<16x256xf32>
    %375 = arith.select %371, %373, %374 : vector<16x256xi1>, vector<16x256xf32>
    %376 = arith.addf %366, %375 : vector<16x256xf32>
    %377 = vector.broadcast %318 : vector<1x256xf32> to vector<16x256xf32>
    %378 = arith.mulf %376, %377 : vector<16x256xf32>
    %379 = arith.truncf %359 : vector<16x256xf32> to vector<16x256xbf16>
    %cst_97 = arith.constant dense<0.000000e+00> : vector<64x256xf32>
    %380 = tpu.matmul %1, %379, %cst_97 {dimension_numbers = #tpu.dot_dimension_numbers<[1], [0], [0], [1], [0, 0, 1, 1], [], []>} : vector<64x16xbf16>, vector<16x256xbf16>, vector<64x256xf32> -> vector<64x256xf32>
    %381 = vector.shape_cast %380 : vector<64x256xf32> to vector<4x16x256xf32>
    %382 = vector.shape_cast %378 : vector<16x256xf32> to vector<1x16x256xf32>
    %383 = vector.broadcast %382 : vector<1x16x256xf32> to vector<4x16x256xf32>
    %384 = arith.mulf %381, %383 : vector<4x16x256xf32>
    %cst_98 = arith.constant dense<0.000000e+00> : vector<4x256xf32>
    %385 = vector.multi_reduction <add>, %384, %cst_98 [1] : vector<4x16x256xf32> to vector<4x256xf32>
    %386 = arith.addf %310, %385 : vector<4x256xf32>
    %387 = vector.extract_strided_slice %3 {offsets = [5, 0], sizes = [1, 256], strides = [1, 1]} : vector<27x256xf32> to vector<1x256xf32>
    %388 = vector.extract_strided_slice %3 {offsets = [14, 0], sizes = [1, 256], strides = [1, 1]} : vector<27x256xf32> to vector<1x256xf32>
    %389 = vector.extract_strided_slice %3 {offsets = [23, 0], sizes = [1, 256], strides = [1, 1]} : vector<27x256xf32> to vector<1x256xf32>
    %390 = arith.negf %389 : vector<1x256xf32>
    %391 = math.exp %390 : vector<1x256xf32>
    %cst_99 = arith.constant 1.000000e+00 : f32
    %392 = vector.broadcast %cst_99 : f32 to vector<1x256xf32>
    %393 = arith.addf %392, %391 : vector<1x256xf32>
    %394 = arith.divf %392, %393 : vector<1x256xf32>
    %cst_100 = arith.constant 1.000000e+00 : f32
    %395 = vector.broadcast %cst_100 : f32 to vector<1x256xf32>
    %396 = arith.addf %387, %395 : vector<1x256xf32>
    %cst_101 = arith.constant 1.600000e+01 : f32
    %397 = vector.broadcast %cst_101 : f32 to vector<1x256xf32>
    %398 = arith.mulf %396, %397 : vector<1x256xf32>
    %cst_102 = arith.constant 1.000000e+00 : f32
    %399 = vector.broadcast %cst_102 : f32 to vector<1x256xf32>
    %400 = arith.subf %398, %399 : vector<1x256xf32>
    %cst_103 = arith.constant 5.000000e-01 : f32
    %401 = vector.broadcast %cst_103 : f32 to vector<1x256xf32>
    %402 = arith.mulf %400, %401 : vector<1x256xf32>
    %cst_104 = arith.constant 1.000000e+00 : f32
    %403 = vector.broadcast %cst_104 : f32 to vector<1x256xf32>
    %404 = arith.addf %388, %403 : vector<1x256xf32>
    %cst_105 = arith.constant 1.600000e+01 : f32
    %405 = vector.broadcast %cst_105 : f32 to vector<1x256xf32>
    %406 = arith.mulf %404, %405 : vector<1x256xf32>
    %cst_106 = arith.constant 1.000000e+00 : f32
    %407 = vector.broadcast %cst_106 : f32 to vector<1x256xf32>
    %408 = arith.subf %406, %407 : vector<1x256xf32>
    %cst_107 = arith.constant 5.000000e-01 : f32
    %409 = vector.broadcast %cst_107 : f32 to vector<1x256xf32>
    %410 = arith.mulf %408, %409 : vector<1x256xf32>
    %411 = math.floor %402 : vector<1x256xf32>
    %412 = math.floor %410 : vector<1x256xf32>
    %413 = arith.subf %402, %411 : vector<1x256xf32>
    %cst_108 = arith.constant 1.000000e+00 : f32
    %414 = vector.broadcast %cst_108 : f32 to vector<1x256xf32>
    %415 = arith.subf %414, %413 : vector<1x256xf32>
    %416 = arith.subf %410, %412 : vector<1x256xf32>
    %cst_109 = arith.constant 1.000000e+00 : f32
    %417 = vector.broadcast %cst_109 : f32 to vector<1x256xf32>
    %418 = arith.subf %417, %416 : vector<1x256xf32>
    %419 = vector.broadcast %5 : vector<16x1xf32> to vector<16x256xf32>
    %420 = vector.broadcast %411 : vector<1x256xf32> to vector<16x256xf32>
    %421 = arith.cmpf oeq, %419, %420 : vector<16x256xf32>
    %cst_110 = arith.constant 0.000000e+00 : f32
    %422 = vector.shape_cast %415 : vector<1x256xf32> to vector<1x256xf32>
    %423 = vector.broadcast %422 : vector<1x256xf32> to vector<16x256xf32>
    %424 = vector.broadcast %cst_110 : f32 to vector<16x256xf32>
    %425 = arith.select %421, %423, %424 : vector<16x256xi1>, vector<16x256xf32>
    %cst_111 = arith.constant 1.000000e+00 : f32
    %426 = vector.broadcast %cst_111 : f32 to vector<1x256xf32>
    %427 = arith.addf %411, %426 : vector<1x256xf32>
    %428 = vector.broadcast %5 : vector<16x1xf32> to vector<16x256xf32>
    %429 = vector.broadcast %427 : vector<1x256xf32> to vector<16x256xf32>
    %430 = arith.cmpf oeq, %428, %429 : vector<16x256xf32>
    %cst_112 = arith.constant 0.000000e+00 : f32
    %431 = vector.shape_cast %413 : vector<1x256xf32> to vector<1x256xf32>
    %432 = vector.broadcast %431 : vector<1x256xf32> to vector<16x256xf32>
    %433 = vector.broadcast %cst_112 : f32 to vector<16x256xf32>
    %434 = arith.select %430, %432, %433 : vector<16x256xi1>, vector<16x256xf32>
    %435 = arith.addf %425, %434 : vector<16x256xf32>
    %436 = vector.broadcast %7 : vector<16x1xf32> to vector<16x256xf32>
    %437 = vector.broadcast %412 : vector<1x256xf32> to vector<16x256xf32>
    %438 = arith.cmpf oeq, %436, %437 : vector<16x256xf32>
    %cst_113 = arith.constant 0.000000e+00 : f32
    %439 = vector.shape_cast %418 : vector<1x256xf32> to vector<1x256xf32>
    %440 = vector.broadcast %439 : vector<1x256xf32> to vector<16x256xf32>
    %441 = vector.broadcast %cst_113 : f32 to vector<16x256xf32>
    %442 = arith.select %438, %440, %441 : vector<16x256xi1>, vector<16x256xf32>
    %cst_114 = arith.constant 1.000000e+00 : f32
    %443 = vector.broadcast %cst_114 : f32 to vector<1x256xf32>
    %444 = arith.addf %412, %443 : vector<1x256xf32>
    %445 = vector.broadcast %7 : vector<16x1xf32> to vector<16x256xf32>
    %446 = vector.broadcast %444 : vector<1x256xf32> to vector<16x256xf32>
    %447 = arith.cmpf oeq, %445, %446 : vector<16x256xf32>
    %cst_115 = arith.constant 0.000000e+00 : f32
    %448 = vector.shape_cast %416 : vector<1x256xf32> to vector<1x256xf32>
    %449 = vector.broadcast %448 : vector<1x256xf32> to vector<16x256xf32>
    %450 = vector.broadcast %cst_115 : f32 to vector<16x256xf32>
    %451 = arith.select %447, %449, %450 : vector<16x256xi1>, vector<16x256xf32>
    %452 = arith.addf %442, %451 : vector<16x256xf32>
    %453 = vector.broadcast %394 : vector<1x256xf32> to vector<16x256xf32>
    %454 = arith.mulf %452, %453 : vector<16x256xf32>
    %455 = arith.truncf %435 : vector<16x256xf32> to vector<16x256xbf16>
    %cst_116 = arith.constant dense<0.000000e+00> : vector<64x256xf32>
    %456 = tpu.matmul %1, %455, %cst_116 {dimension_numbers = #tpu.dot_dimension_numbers<[1], [0], [0], [1], [0, 0, 1, 1], [], []>} : vector<64x16xbf16>, vector<16x256xbf16>, vector<64x256xf32> -> vector<64x256xf32>
    %457 = vector.shape_cast %456 : vector<64x256xf32> to vector<4x16x256xf32>
    %458 = vector.shape_cast %454 : vector<16x256xf32> to vector<1x16x256xf32>
    %459 = vector.broadcast %458 : vector<1x16x256xf32> to vector<4x16x256xf32>
    %460 = arith.mulf %457, %459 : vector<4x16x256xf32>
    %cst_117 = arith.constant dense<0.000000e+00> : vector<4x256xf32>
    %461 = vector.multi_reduction <add>, %460, %cst_117 [1] : vector<4x16x256xf32> to vector<4x256xf32>
    %462 = arith.addf %386, %461 : vector<4x256xf32>
    %463 = vector.extract_strided_slice %3 {offsets = [6, 0], sizes = [1, 256], strides = [1, 1]} : vector<27x256xf32> to vector<1x256xf32>
    %464 = vector.extract_strided_slice %3 {offsets = [15, 0], sizes = [1, 256], strides = [1, 1]} : vector<27x256xf32> to vector<1x256xf32>
    %465 = vector.extract_strided_slice %3 {offsets = [24, 0], sizes = [1, 256], strides = [1, 1]} : vector<27x256xf32> to vector<1x256xf32>
    %466 = arith.negf %465 : vector<1x256xf32>
    %467 = math.exp %466 : vector<1x256xf32>
    %cst_118 = arith.constant 1.000000e+00 : f32
    %468 = vector.broadcast %cst_118 : f32 to vector<1x256xf32>
    %469 = arith.addf %468, %467 : vector<1x256xf32>
    %470 = arith.divf %468, %469 : vector<1x256xf32>
    %cst_119 = arith.constant 1.000000e+00 : f32
    %471 = vector.broadcast %cst_119 : f32 to vector<1x256xf32>
    %472 = arith.addf %463, %471 : vector<1x256xf32>
    %cst_120 = arith.constant 1.600000e+01 : f32
    %473 = vector.broadcast %cst_120 : f32 to vector<1x256xf32>
    %474 = arith.mulf %472, %473 : vector<1x256xf32>
    %cst_121 = arith.constant 1.000000e+00 : f32
    %475 = vector.broadcast %cst_121 : f32 to vector<1x256xf32>
    %476 = arith.subf %474, %475 : vector<1x256xf32>
    %cst_122 = arith.constant 5.000000e-01 : f32
    %477 = vector.broadcast %cst_122 : f32 to vector<1x256xf32>
    %478 = arith.mulf %476, %477 : vector<1x256xf32>
    %cst_123 = arith.constant 1.000000e+00 : f32
    %479 = vector.broadcast %cst_123 : f32 to vector<1x256xf32>
    %480 = arith.addf %464, %479 : vector<1x256xf32>
    %cst_124 = arith.constant 1.600000e+01 : f32
    %481 = vector.broadcast %cst_124 : f32 to vector<1x256xf32>
    %482 = arith.mulf %480, %481 : vector<1x256xf32>
    %cst_125 = arith.constant 1.000000e+00 : f32
    %483 = vector.broadcast %cst_125 : f32 to vector<1x256xf32>
    %484 = arith.subf %482, %483 : vector<1x256xf32>
    %cst_126 = arith.constant 5.000000e-01 : f32
    %485 = vector.broadcast %cst_126 : f32 to vector<1x256xf32>
    %486 = arith.mulf %484, %485 : vector<1x256xf32>
    %487 = math.floor %478 : vector<1x256xf32>
    %488 = math.floor %486 : vector<1x256xf32>
    %489 = arith.subf %478, %487 : vector<1x256xf32>
    %cst_127 = arith.constant 1.000000e+00 : f32
    %490 = vector.broadcast %cst_127 : f32 to vector<1x256xf32>
    %491 = arith.subf %490, %489 : vector<1x256xf32>
    %492 = arith.subf %486, %488 : vector<1x256xf32>
    %cst_128 = arith.constant 1.000000e+00 : f32
    %493 = vector.broadcast %cst_128 : f32 to vector<1x256xf32>
    %494 = arith.subf %493, %492 : vector<1x256xf32>
    %495 = vector.broadcast %5 : vector<16x1xf32> to vector<16x256xf32>
    %496 = vector.broadcast %487 : vector<1x256xf32> to vector<16x256xf32>
    %497 = arith.cmpf oeq, %495, %496 : vector<16x256xf32>
    %cst_129 = arith.constant 0.000000e+00 : f32
    %498 = vector.shape_cast %491 : vector<1x256xf32> to vector<1x256xf32>
    %499 = vector.broadcast %498 : vector<1x256xf32> to vector<16x256xf32>
    %500 = vector.broadcast %cst_129 : f32 to vector<16x256xf32>
    %501 = arith.select %497, %499, %500 : vector<16x256xi1>, vector<16x256xf32>
    %cst_130 = arith.constant 1.000000e+00 : f32
    %502 = vector.broadcast %cst_130 : f32 to vector<1x256xf32>
    %503 = arith.addf %487, %502 : vector<1x256xf32>
    %504 = vector.broadcast %5 : vector<16x1xf32> to vector<16x256xf32>
    %505 = vector.broadcast %503 : vector<1x256xf32> to vector<16x256xf32>
    %506 = arith.cmpf oeq, %504, %505 : vector<16x256xf32>
    %cst_131 = arith.constant 0.000000e+00 : f32
    %507 = vector.shape_cast %489 : vector<1x256xf32> to vector<1x256xf32>
    %508 = vector.broadcast %507 : vector<1x256xf32> to vector<16x256xf32>
    %509 = vector.broadcast %cst_131 : f32 to vector<16x256xf32>
    %510 = arith.select %506, %508, %509 : vector<16x256xi1>, vector<16x256xf32>
    %511 = arith.addf %501, %510 : vector<16x256xf32>
    %512 = vector.broadcast %7 : vector<16x1xf32> to vector<16x256xf32>
    %513 = vector.broadcast %488 : vector<1x256xf32> to vector<16x256xf32>
    %514 = arith.cmpf oeq, %512, %513 : vector<16x256xf32>
    %cst_132 = arith.constant 0.000000e+00 : f32
    %515 = vector.shape_cast %494 : vector<1x256xf32> to vector<1x256xf32>
    %516 = vector.broadcast %515 : vector<1x256xf32> to vector<16x256xf32>
    %517 = vector.broadcast %cst_132 : f32 to vector<16x256xf32>
    %518 = arith.select %514, %516, %517 : vector<16x256xi1>, vector<16x256xf32>
    %cst_133 = arith.constant 1.000000e+00 : f32
    %519 = vector.broadcast %cst_133 : f32 to vector<1x256xf32>
    %520 = arith.addf %488, %519 : vector<1x256xf32>
    %521 = vector.broadcast %7 : vector<16x1xf32> to vector<16x256xf32>
    %522 = vector.broadcast %520 : vector<1x256xf32> to vector<16x256xf32>
    %523 = arith.cmpf oeq, %521, %522 : vector<16x256xf32>
    %cst_134 = arith.constant 0.000000e+00 : f32
    %524 = vector.shape_cast %492 : vector<1x256xf32> to vector<1x256xf32>
    %525 = vector.broadcast %524 : vector<1x256xf32> to vector<16x256xf32>
    %526 = vector.broadcast %cst_134 : f32 to vector<16x256xf32>
    %527 = arith.select %523, %525, %526 : vector<16x256xi1>, vector<16x256xf32>
    %528 = arith.addf %518, %527 : vector<16x256xf32>
    %529 = vector.broadcast %470 : vector<1x256xf32> to vector<16x256xf32>
    %530 = arith.mulf %528, %529 : vector<16x256xf32>
    %531 = arith.truncf %511 : vector<16x256xf32> to vector<16x256xbf16>
    %cst_135 = arith.constant dense<0.000000e+00> : vector<64x256xf32>
    %532 = tpu.matmul %1, %531, %cst_135 {dimension_numbers = #tpu.dot_dimension_numbers<[1], [0], [0], [1], [0, 0, 1, 1], [], []>} : vector<64x16xbf16>, vector<16x256xbf16>, vector<64x256xf32> -> vector<64x256xf32>
    %533 = vector.shape_cast %532 : vector<64x256xf32> to vector<4x16x256xf32>
    %534 = vector.shape_cast %530 : vector<16x256xf32> to vector<1x16x256xf32>
    %535 = vector.broadcast %534 : vector<1x16x256xf32> to vector<4x16x256xf32>
    %536 = arith.mulf %533, %535 : vector<4x16x256xf32>
    %cst_136 = arith.constant dense<0.000000e+00> : vector<4x256xf32>
    %537 = vector.multi_reduction <add>, %536, %cst_136 [1] : vector<4x16x256xf32> to vector<4x256xf32>
    %538 = arith.addf %462, %537 : vector<4x256xf32>
    %539 = vector.extract_strided_slice %3 {offsets = [7, 0], sizes = [1, 256], strides = [1, 1]} : vector<27x256xf32> to vector<1x256xf32>
    %540 = vector.extract_strided_slice %3 {offsets = [16, 0], sizes = [1, 256], strides = [1, 1]} : vector<27x256xf32> to vector<1x256xf32>
    %541 = vector.extract_strided_slice %3 {offsets = [25, 0], sizes = [1, 256], strides = [1, 1]} : vector<27x256xf32> to vector<1x256xf32>
    %542 = arith.negf %541 : vector<1x256xf32>
    %543 = math.exp %542 : vector<1x256xf32>
    %cst_137 = arith.constant 1.000000e+00 : f32
    %544 = vector.broadcast %cst_137 : f32 to vector<1x256xf32>
    %545 = arith.addf %544, %543 : vector<1x256xf32>
    %546 = arith.divf %544, %545 : vector<1x256xf32>
    %cst_138 = arith.constant 1.000000e+00 : f32
    %547 = vector.broadcast %cst_138 : f32 to vector<1x256xf32>
    %548 = arith.addf %539, %547 : vector<1x256xf32>
    %cst_139 = arith.constant 1.600000e+01 : f32
    %549 = vector.broadcast %cst_139 : f32 to vector<1x256xf32>
    %550 = arith.mulf %548, %549 : vector<1x256xf32>
    %cst_140 = arith.constant 1.000000e+00 : f32
    %551 = vector.broadcast %cst_140 : f32 to vector<1x256xf32>
    %552 = arith.subf %550, %551 : vector<1x256xf32>
    %cst_141 = arith.constant 5.000000e-01 : f32
    %553 = vector.broadcast %cst_141 : f32 to vector<1x256xf32>
    %554 = arith.mulf %552, %553 : vector<1x256xf32>
    %cst_142 = arith.constant 1.000000e+00 : f32
    %555 = vector.broadcast %cst_142 : f32 to vector<1x256xf32>
    %556 = arith.addf %540, %555 : vector<1x256xf32>
    %cst_143 = arith.constant 1.600000e+01 : f32
    %557 = vector.broadcast %cst_143 : f32 to vector<1x256xf32>
    %558 = arith.mulf %556, %557 : vector<1x256xf32>
    %cst_144 = arith.constant 1.000000e+00 : f32
    %559 = vector.broadcast %cst_144 : f32 to vector<1x256xf32>
    %560 = arith.subf %558, %559 : vector<1x256xf32>
    %cst_145 = arith.constant 5.000000e-01 : f32
    %561 = vector.broadcast %cst_145 : f32 to vector<1x256xf32>
    %562 = arith.mulf %560, %561 : vector<1x256xf32>
    %563 = math.floor %554 : vector<1x256xf32>
    %564 = math.floor %562 : vector<1x256xf32>
    %565 = arith.subf %554, %563 : vector<1x256xf32>
    %cst_146 = arith.constant 1.000000e+00 : f32
    %566 = vector.broadcast %cst_146 : f32 to vector<1x256xf32>
    %567 = arith.subf %566, %565 : vector<1x256xf32>
    %568 = arith.subf %562, %564 : vector<1x256xf32>
    %cst_147 = arith.constant 1.000000e+00 : f32
    %569 = vector.broadcast %cst_147 : f32 to vector<1x256xf32>
    %570 = arith.subf %569, %568 : vector<1x256xf32>
    %571 = vector.broadcast %5 : vector<16x1xf32> to vector<16x256xf32>
    %572 = vector.broadcast %563 : vector<1x256xf32> to vector<16x256xf32>
    %573 = arith.cmpf oeq, %571, %572 : vector<16x256xf32>
    %cst_148 = arith.constant 0.000000e+00 : f32
    %574 = vector.shape_cast %567 : vector<1x256xf32> to vector<1x256xf32>
    %575 = vector.broadcast %574 : vector<1x256xf32> to vector<16x256xf32>
    %576 = vector.broadcast %cst_148 : f32 to vector<16x256xf32>
    %577 = arith.select %573, %575, %576 : vector<16x256xi1>, vector<16x256xf32>
    %cst_149 = arith.constant 1.000000e+00 : f32
    %578 = vector.broadcast %cst_149 : f32 to vector<1x256xf32>
    %579 = arith.addf %563, %578 : vector<1x256xf32>
    %580 = vector.broadcast %5 : vector<16x1xf32> to vector<16x256xf32>
    %581 = vector.broadcast %579 : vector<1x256xf32> to vector<16x256xf32>
    %582 = arith.cmpf oeq, %580, %581 : vector<16x256xf32>
    %cst_150 = arith.constant 0.000000e+00 : f32
    %583 = vector.shape_cast %565 : vector<1x256xf32> to vector<1x256xf32>
    %584 = vector.broadcast %583 : vector<1x256xf32> to vector<16x256xf32>
    %585 = vector.broadcast %cst_150 : f32 to vector<16x256xf32>
    %586 = arith.select %582, %584, %585 : vector<16x256xi1>, vector<16x256xf32>
    %587 = arith.addf %577, %586 : vector<16x256xf32>
    %588 = vector.broadcast %7 : vector<16x1xf32> to vector<16x256xf32>
    %589 = vector.broadcast %564 : vector<1x256xf32> to vector<16x256xf32>
    %590 = arith.cmpf oeq, %588, %589 : vector<16x256xf32>
    %cst_151 = arith.constant 0.000000e+00 : f32
    %591 = vector.shape_cast %570 : vector<1x256xf32> to vector<1x256xf32>
    %592 = vector.broadcast %591 : vector<1x256xf32> to vector<16x256xf32>
    %593 = vector.broadcast %cst_151 : f32 to vector<16x256xf32>
    %594 = arith.select %590, %592, %593 : vector<16x256xi1>, vector<16x256xf32>
    %cst_152 = arith.constant 1.000000e+00 : f32
    %595 = vector.broadcast %cst_152 : f32 to vector<1x256xf32>
    %596 = arith.addf %564, %595 : vector<1x256xf32>
    %597 = vector.broadcast %7 : vector<16x1xf32> to vector<16x256xf32>
    %598 = vector.broadcast %596 : vector<1x256xf32> to vector<16x256xf32>
    %599 = arith.cmpf oeq, %597, %598 : vector<16x256xf32>
    %cst_153 = arith.constant 0.000000e+00 : f32
    %600 = vector.shape_cast %568 : vector<1x256xf32> to vector<1x256xf32>
    %601 = vector.broadcast %600 : vector<1x256xf32> to vector<16x256xf32>
    %602 = vector.broadcast %cst_153 : f32 to vector<16x256xf32>
    %603 = arith.select %599, %601, %602 : vector<16x256xi1>, vector<16x256xf32>
    %604 = arith.addf %594, %603 : vector<16x256xf32>
    %605 = vector.broadcast %546 : vector<1x256xf32> to vector<16x256xf32>
    %606 = arith.mulf %604, %605 : vector<16x256xf32>
    %607 = arith.truncf %587 : vector<16x256xf32> to vector<16x256xbf16>
    %cst_154 = arith.constant dense<0.000000e+00> : vector<64x256xf32>
    %608 = tpu.matmul %1, %607, %cst_154 {dimension_numbers = #tpu.dot_dimension_numbers<[1], [0], [0], [1], [0, 0, 1, 1], [], []>} : vector<64x16xbf16>, vector<16x256xbf16>, vector<64x256xf32> -> vector<64x256xf32>
    %609 = vector.shape_cast %608 : vector<64x256xf32> to vector<4x16x256xf32>
    %610 = vector.shape_cast %606 : vector<16x256xf32> to vector<1x16x256xf32>
    %611 = vector.broadcast %610 : vector<1x16x256xf32> to vector<4x16x256xf32>
    %612 = arith.mulf %609, %611 : vector<4x16x256xf32>
    %cst_155 = arith.constant dense<0.000000e+00> : vector<4x256xf32>
    %613 = vector.multi_reduction <add>, %612, %cst_155 [1] : vector<4x16x256xf32> to vector<4x256xf32>
    %614 = arith.addf %538, %613 : vector<4x256xf32>
    %615 = vector.extract_strided_slice %3 {offsets = [8, 0], sizes = [1, 256], strides = [1, 1]} : vector<27x256xf32> to vector<1x256xf32>
    %616 = vector.extract_strided_slice %3 {offsets = [17, 0], sizes = [1, 256], strides = [1, 1]} : vector<27x256xf32> to vector<1x256xf32>
    %617 = vector.extract_strided_slice %3 {offsets = [26, 0], sizes = [1, 256], strides = [1, 1]} : vector<27x256xf32> to vector<1x256xf32>
    %618 = arith.negf %617 : vector<1x256xf32>
    %619 = math.exp %618 : vector<1x256xf32>
    %cst_156 = arith.constant 1.000000e+00 : f32
    %620 = vector.broadcast %cst_156 : f32 to vector<1x256xf32>
    %621 = arith.addf %620, %619 : vector<1x256xf32>
    %622 = arith.divf %620, %621 : vector<1x256xf32>
    %cst_157 = arith.constant 1.000000e+00 : f32
    %623 = vector.broadcast %cst_157 : f32 to vector<1x256xf32>
    %624 = arith.addf %615, %623 : vector<1x256xf32>
    %cst_158 = arith.constant 1.600000e+01 : f32
    %625 = vector.broadcast %cst_158 : f32 to vector<1x256xf32>
    %626 = arith.mulf %624, %625 : vector<1x256xf32>
    %cst_159 = arith.constant 1.000000e+00 : f32
    %627 = vector.broadcast %cst_159 : f32 to vector<1x256xf32>
    %628 = arith.subf %626, %627 : vector<1x256xf32>
    %cst_160 = arith.constant 5.000000e-01 : f32
    %629 = vector.broadcast %cst_160 : f32 to vector<1x256xf32>
    %630 = arith.mulf %628, %629 : vector<1x256xf32>
    %cst_161 = arith.constant 1.000000e+00 : f32
    %631 = vector.broadcast %cst_161 : f32 to vector<1x256xf32>
    %632 = arith.addf %616, %631 : vector<1x256xf32>
    %cst_162 = arith.constant 1.600000e+01 : f32
    %633 = vector.broadcast %cst_162 : f32 to vector<1x256xf32>
    %634 = arith.mulf %632, %633 : vector<1x256xf32>
    %cst_163 = arith.constant 1.000000e+00 : f32
    %635 = vector.broadcast %cst_163 : f32 to vector<1x256xf32>
    %636 = arith.subf %634, %635 : vector<1x256xf32>
    %cst_164 = arith.constant 5.000000e-01 : f32
    %637 = vector.broadcast %cst_164 : f32 to vector<1x256xf32>
    %638 = arith.mulf %636, %637 : vector<1x256xf32>
    %639 = math.floor %630 : vector<1x256xf32>
    %640 = math.floor %638 : vector<1x256xf32>
    %641 = arith.subf %630, %639 : vector<1x256xf32>
    %cst_165 = arith.constant 1.000000e+00 : f32
    %642 = vector.broadcast %cst_165 : f32 to vector<1x256xf32>
    %643 = arith.subf %642, %641 : vector<1x256xf32>
    %644 = arith.subf %638, %640 : vector<1x256xf32>
    %cst_166 = arith.constant 1.000000e+00 : f32
    %645 = vector.broadcast %cst_166 : f32 to vector<1x256xf32>
    %646 = arith.subf %645, %644 : vector<1x256xf32>
    %647 = vector.broadcast %5 : vector<16x1xf32> to vector<16x256xf32>
    %648 = vector.broadcast %639 : vector<1x256xf32> to vector<16x256xf32>
    %649 = arith.cmpf oeq, %647, %648 : vector<16x256xf32>
    %cst_167 = arith.constant 0.000000e+00 : f32
    %650 = vector.shape_cast %643 : vector<1x256xf32> to vector<1x256xf32>
    %651 = vector.broadcast %650 : vector<1x256xf32> to vector<16x256xf32>
    %652 = vector.broadcast %cst_167 : f32 to vector<16x256xf32>
    %653 = arith.select %649, %651, %652 : vector<16x256xi1>, vector<16x256xf32>
    %cst_168 = arith.constant 1.000000e+00 : f32
    %654 = vector.broadcast %cst_168 : f32 to vector<1x256xf32>
    %655 = arith.addf %639, %654 : vector<1x256xf32>
    %656 = vector.broadcast %5 : vector<16x1xf32> to vector<16x256xf32>
    %657 = vector.broadcast %655 : vector<1x256xf32> to vector<16x256xf32>
    %658 = arith.cmpf oeq, %656, %657 : vector<16x256xf32>
    %cst_169 = arith.constant 0.000000e+00 : f32
    %659 = vector.shape_cast %641 : vector<1x256xf32> to vector<1x256xf32>
    %660 = vector.broadcast %659 : vector<1x256xf32> to vector<16x256xf32>
    %661 = vector.broadcast %cst_169 : f32 to vector<16x256xf32>
    %662 = arith.select %658, %660, %661 : vector<16x256xi1>, vector<16x256xf32>
    %663 = arith.addf %653, %662 : vector<16x256xf32>
    %664 = vector.broadcast %7 : vector<16x1xf32> to vector<16x256xf32>
    %665 = vector.broadcast %640 : vector<1x256xf32> to vector<16x256xf32>
    %666 = arith.cmpf oeq, %664, %665 : vector<16x256xf32>
    %cst_170 = arith.constant 0.000000e+00 : f32
    %667 = vector.shape_cast %646 : vector<1x256xf32> to vector<1x256xf32>
    %668 = vector.broadcast %667 : vector<1x256xf32> to vector<16x256xf32>
    %669 = vector.broadcast %cst_170 : f32 to vector<16x256xf32>
    %670 = arith.select %666, %668, %669 : vector<16x256xi1>, vector<16x256xf32>
    %cst_171 = arith.constant 1.000000e+00 : f32
    %671 = vector.broadcast %cst_171 : f32 to vector<1x256xf32>
    %672 = arith.addf %640, %671 : vector<1x256xf32>
    %673 = vector.broadcast %7 : vector<16x1xf32> to vector<16x256xf32>
    %674 = vector.broadcast %672 : vector<1x256xf32> to vector<16x256xf32>
    %675 = arith.cmpf oeq, %673, %674 : vector<16x256xf32>
    %cst_172 = arith.constant 0.000000e+00 : f32
    %676 = vector.shape_cast %644 : vector<1x256xf32> to vector<1x256xf32>
    %677 = vector.broadcast %676 : vector<1x256xf32> to vector<16x256xf32>
    %678 = vector.broadcast %cst_172 : f32 to vector<16x256xf32>
    %679 = arith.select %675, %677, %678 : vector<16x256xi1>, vector<16x256xf32>
    %680 = arith.addf %670, %679 : vector<16x256xf32>
    %681 = vector.broadcast %622 : vector<1x256xf32> to vector<16x256xf32>
    %682 = arith.mulf %680, %681 : vector<16x256xf32>
    %683 = arith.truncf %663 : vector<16x256xf32> to vector<16x256xbf16>
    %cst_173 = arith.constant dense<0.000000e+00> : vector<64x256xf32>
    %684 = tpu.matmul %1, %683, %cst_173 {dimension_numbers = #tpu.dot_dimension_numbers<[1], [0], [0], [1], [0, 0, 1, 1], [], []>} : vector<64x16xbf16>, vector<16x256xbf16>, vector<64x256xf32> -> vector<64x256xf32>
    %685 = vector.shape_cast %684 : vector<64x256xf32> to vector<4x16x256xf32>
    %686 = vector.shape_cast %682 : vector<16x256xf32> to vector<1x16x256xf32>
    %687 = vector.broadcast %686 : vector<1x16x256xf32> to vector<4x16x256xf32>
    %688 = arith.mulf %685, %687 : vector<4x16x256xf32>
    %cst_174 = arith.constant dense<0.000000e+00> : vector<4x256xf32>
    %689 = vector.multi_reduction <add>, %688, %cst_174 [1] : vector<4x16x256xf32> to vector<4x256xf32>
    %690 = arith.addf %614, %689 : vector<4x256xf32>
    %c0_175 = arith.constant 0 : index
    %c0_176 = arith.constant 0 : index
    %c0_177 = arith.constant 0 : index
    %691 = vector.load %arg4[%c0_175, %c0_176, %c0_177] : memref<1x4x256xf32, #tpu.memory_space<vmem>>, vector<1x4x256xf32>
    %692 = vector.shape_cast %691 : vector<1x4x256xf32> to vector<4x256xf32>
    %693 = vector.shape_cast %690 : vector<4x256xf32> to vector<1x4x256xf32>
    tpu.vector_store %arg4[%c0_175, %c0_176, %c0_177], %693 {strides = array<i32>} : memref<1x4x256xf32, #tpu.memory_space<vmem>>, vector<1x4x256xf32>,
    return
  }
  func.func @transform_0(%arg0: i32, %arg1: i32) -> (i32, i32, i32) {
    %c0_i32 = arith.constant 0 : i32
    %c0_i32_0 = arith.constant 0 : i32
    %c0_i32_1 = arith.constant 0 : i32
    return %arg0, %c0_i32, %c0_i32_0 : i32, i32, i32
  }
  func.func @transform_1(%arg0: i32, %arg1: i32) -> (i32, i32, i32) {
    %c0_i32 = arith.constant 0 : i32
    %c0_i32_0 = arith.constant 0 : i32
    return %arg0, %c0_i32, %arg1 : i32, i32, i32
  }
  func.func @transform_2(%arg0: i32, %arg1: i32) -> (i32, i32, i32) {
    %c0_i32 = arith.constant 0 : i32
    %c0_i32_0 = arith.constant 0 : i32
    return %arg0, %c0_i32, %arg1 : i32, i32, i32
  }
}

module attributes {stable_mosaic.version = 11 : i64} {
  func.func @_conv_kernel(%arg0: i32, %arg1: memref<1x4x290xbf16, #tpu.memory_space<vmem>>, %arg2: memref<9x8x4xbf16, #tpu.memory_space<vmem>>, %arg3: memref<8x1xf32, #tpu.memory_space<vmem>>, %arg4: memref<2x256xbf16, #tpu.memory_space<vmem>>, %arg5: memref<1x8x256xf32, #tpu.memory_space<vmem>>) attributes {dimension_semantics = [#tpu.dimension_semantics<parallel>], iteration_bounds = array<i64: 2>, scalar_prefetch = 0 : i64, scratch_operands = 0 : i64, tpu.core_type = #tpu.core_type<tc>, window_params = [{transform_indices = @transform_0, window_bounds = array<i64: 1, 4, 290>}, {pipeline_mode = #tpu.pipeline_mode<synchronous>, transform_indices = @transform_1, window_bounds = array<i64: 9, 8, 4>}, {pipeline_mode = #tpu.pipeline_mode<synchronous>, transform_indices = @transform_2, window_bounds = array<i64: 8, 1>}, {pipeline_mode = #tpu.pipeline_mode<synchronous>, transform_indices = @transform_3, window_bounds = array<i64: 2, 256>}, {transform_indices = @transform_4, window_bounds = array<i64: 1, 8, 256>}]} {
    %c0 = arith.constant 0 : index
    %c0_0 = arith.constant 0 : index
    %c0_1 = arith.constant 0 : index
    %0 = vector.load %arg1[%c0, %c0_0, %c0_1] : memref<1x4x290xbf16, #tpu.memory_space<vmem>>, vector<1x4x290xbf16>
    %1 = vector.shape_cast %0 : vector<1x4x290xbf16> to vector<4x290xbf16>
    %2 = vector.extract_strided_slice %1 {offsets = [0, 0], sizes = [4, 256], strides = [1, 1]} : vector<4x290xbf16> to vector<4x256xbf16>
    %c0_2 = arith.constant 0 : index
    %c0_3 = arith.constant 0 : index
    %3 = vector.load %arg4[%c0_2, %c0_3] : memref<2x256xbf16, #tpu.memory_space<vmem>>, vector<1x256xbf16>
    %4 = vector.broadcast %3 : vector<1x256xbf16> to vector<4x256xbf16>
    %5 = arith.mulf %2, %4 : vector<4x256xbf16>
    %c0_4 = arith.constant 0 : index
    %c0_5 = arith.constant 0 : index
    %c0_6 = arith.constant 0 : index
    %6 = vector.load %arg2[%c0_4, %c0_5, %c0_6] : memref<9x8x4xbf16, #tpu.memory_space<vmem>>, vector<1x8x4xbf16>
    %7 = vector.shape_cast %6 : vector<1x8x4xbf16> to vector<8x4xbf16>
    %cst = arith.constant dense<0.000000e+00> : vector<8x256xf32>
    %8 = tpu.matmul %7, %5, %cst {dimension_numbers = #tpu.dot_dimension_numbers<[1], [0], [0], [1], [0, 0, 1, 1], [], []>} : vector<8x4xbf16>, vector<4x256xbf16>, vector<8x256xf32> -> vector<8x256xf32>
    %9 = vector.extract_strided_slice %1 {offsets = [0, 1], sizes = [4, 256], strides = [1, 1]} : vector<4x290xbf16> to vector<4x256xbf16>
    %c1 = arith.constant 1 : index
    %c0_7 = arith.constant 0 : index
    %c0_8 = arith.constant 0 : index
    %10 = vector.load %arg2[%c1, %c0_7, %c0_8] : memref<9x8x4xbf16, #tpu.memory_space<vmem>>, vector<1x8x4xbf16>
    %11 = vector.shape_cast %10 : vector<1x8x4xbf16> to vector<8x4xbf16>
    %cst_9 = arith.constant dense<0.000000e+00> : vector<8x256xf32>
    %12 = tpu.matmul %11, %9, %cst_9 {dimension_numbers = #tpu.dot_dimension_numbers<[1], [0], [0], [1], [0, 0, 1, 1], [], []>} : vector<8x4xbf16>, vector<4x256xbf16>, vector<8x256xf32> -> vector<8x256xf32>
    %13 = arith.addf %8, %12 : vector<8x256xf32>
    %14 = vector.extract_strided_slice %1 {offsets = [0, 2], sizes = [4, 256], strides = [1, 1]} : vector<4x290xbf16> to vector<4x256xbf16>
    %c1_10 = arith.constant 1 : index
    %c0_11 = arith.constant 0 : index
    %15 = vector.load %arg4[%c1_10, %c0_11] : memref<2x256xbf16, #tpu.memory_space<vmem>>, vector<1x256xbf16>
    %16 = vector.broadcast %15 : vector<1x256xbf16> to vector<4x256xbf16>
    %17 = arith.mulf %14, %16 : vector<4x256xbf16>
    %c2 = arith.constant 2 : index
    %c0_12 = arith.constant 0 : index
    %c0_13 = arith.constant 0 : index
    %18 = vector.load %arg2[%c2, %c0_12, %c0_13] : memref<9x8x4xbf16, #tpu.memory_space<vmem>>, vector<1x8x4xbf16>
    %19 = vector.shape_cast %18 : vector<1x8x4xbf16> to vector<8x4xbf16>
    %cst_14 = arith.constant dense<0.000000e+00> : vector<8x256xf32>
    %20 = tpu.matmul %19, %17, %cst_14 {dimension_numbers = #tpu.dot_dimension_numbers<[1], [0], [0], [1], [0, 0, 1, 1], [], []>} : vector<8x4xbf16>, vector<4x256xbf16>, vector<8x256xf32> -> vector<8x256xf32>
    %21 = arith.addf %13, %20 : vector<8x256xf32>
    %22 = vector.extract_strided_slice %1 {offsets = [0, 16], sizes = [4, 256], strides = [1, 1]} : vector<4x290xbf16> to vector<4x256xbf16>
    %c0_15 = arith.constant 0 : index
    %c0_16 = arith.constant 0 : index
    %23 = vector.load %arg4[%c0_15, %c0_16] : memref<2x256xbf16, #tpu.memory_space<vmem>>, vector<1x256xbf16>
    %24 = vector.broadcast %23 : vector<1x256xbf16> to vector<4x256xbf16>
    %25 = arith.mulf %22, %24 : vector<4x256xbf16>
    %c3 = arith.constant 3 : index
    %c0_17 = arith.constant 0 : index
    %c0_18 = arith.constant 0 : index
    %26 = vector.load %arg2[%c3, %c0_17, %c0_18] : memref<9x8x4xbf16, #tpu.memory_space<vmem>>, vector<1x8x4xbf16>
    %27 = vector.shape_cast %26 : vector<1x8x4xbf16> to vector<8x4xbf16>
    %cst_19 = arith.constant dense<0.000000e+00> : vector<8x256xf32>
    %28 = tpu.matmul %27, %25, %cst_19 {dimension_numbers = #tpu.dot_dimension_numbers<[1], [0], [0], [1], [0, 0, 1, 1], [], []>} : vector<8x4xbf16>, vector<4x256xbf16>, vector<8x256xf32> -> vector<8x256xf32>
    %29 = arith.addf %21, %28 : vector<8x256xf32>
    %30 = vector.extract_strided_slice %1 {offsets = [0, 17], sizes = [4, 256], strides = [1, 1]} : vector<4x290xbf16> to vector<4x256xbf16>
    %c4 = arith.constant 4 : index
    %c0_20 = arith.constant 0 : index
    %c0_21 = arith.constant 0 : index
    %31 = vector.load %arg2[%c4, %c0_20, %c0_21] : memref<9x8x4xbf16, #tpu.memory_space<vmem>>, vector<1x8x4xbf16>
    %32 = vector.shape_cast %31 : vector<1x8x4xbf16> to vector<8x4xbf16>
    %cst_22 = arith.constant dense<0.000000e+00> : vector<8x256xf32>
    %33 = tpu.matmul %32, %30, %cst_22 {dimension_numbers = #tpu.dot_dimension_numbers<[1], [0], [0], [1], [0, 0, 1, 1], [], []>} : vector<8x4xbf16>, vector<4x256xbf16>, vector<8x256xf32> -> vector<8x256xf32>
    %34 = arith.addf %29, %33 : vector<8x256xf32>
    %35 = vector.extract_strided_slice %1 {offsets = [0, 18], sizes = [4, 256], strides = [1, 1]} : vector<4x290xbf16> to vector<4x256xbf16>
    %c1_23 = arith.constant 1 : index
    %c0_24 = arith.constant 0 : index
    %36 = vector.load %arg4[%c1_23, %c0_24] : memref<2x256xbf16, #tpu.memory_space<vmem>>, vector<1x256xbf16>
    %37 = vector.broadcast %36 : vector<1x256xbf16> to vector<4x256xbf16>
    %38 = arith.mulf %35, %37 : vector<4x256xbf16>
    %c5 = arith.constant 5 : index
    %c0_25 = arith.constant 0 : index
    %c0_26 = arith.constant 0 : index
    %39 = vector.load %arg2[%c5, %c0_25, %c0_26] : memref<9x8x4xbf16, #tpu.memory_space<vmem>>, vector<1x8x4xbf16>
    %40 = vector.shape_cast %39 : vector<1x8x4xbf16> to vector<8x4xbf16>
    %cst_27 = arith.constant dense<0.000000e+00> : vector<8x256xf32>
    %41 = tpu.matmul %40, %38, %cst_27 {dimension_numbers = #tpu.dot_dimension_numbers<[1], [0], [0], [1], [0, 0, 1, 1], [], []>} : vector<8x4xbf16>, vector<4x256xbf16>, vector<8x256xf32> -> vector<8x256xf32>
    %42 = arith.addf %34, %41 : vector<8x256xf32>
    %43 = vector.extract_strided_slice %1 {offsets = [0, 32], sizes = [4, 256], strides = [1, 1]} : vector<4x290xbf16> to vector<4x256xbf16>
    %c0_28 = arith.constant 0 : index
    %c0_29 = arith.constant 0 : index
    %44 = vector.load %arg4[%c0_28, %c0_29] : memref<2x256xbf16, #tpu.memory_space<vmem>>, vector<1x256xbf16>
    %45 = vector.broadcast %44 : vector<1x256xbf16> to vector<4x256xbf16>
    %46 = arith.mulf %43, %45 : vector<4x256xbf16>
    %c6 = arith.constant 6 : index
    %c0_30 = arith.constant 0 : index
    %c0_31 = arith.constant 0 : index
    %47 = vector.load %arg2[%c6, %c0_30, %c0_31] : memref<9x8x4xbf16, #tpu.memory_space<vmem>>, vector<1x8x4xbf16>
    %48 = vector.shape_cast %47 : vector<1x8x4xbf16> to vector<8x4xbf16>
    %cst_32 = arith.constant dense<0.000000e+00> : vector<8x256xf32>
    %49 = tpu.matmul %48, %46, %cst_32 {dimension_numbers = #tpu.dot_dimension_numbers<[1], [0], [0], [1], [0, 0, 1, 1], [], []>} : vector<8x4xbf16>, vector<4x256xbf16>, vector<8x256xf32> -> vector<8x256xf32>
    %50 = arith.addf %42, %49 : vector<8x256xf32>
    %51 = vector.extract_strided_slice %1 {offsets = [0, 33], sizes = [4, 256], strides = [1, 1]} : vector<4x290xbf16> to vector<4x256xbf16>
    %c7 = arith.constant 7 : index
    %c0_33 = arith.constant 0 : index
    %c0_34 = arith.constant 0 : index
    %52 = vector.load %arg2[%c7, %c0_33, %c0_34] : memref<9x8x4xbf16, #tpu.memory_space<vmem>>, vector<1x8x4xbf16>
    %53 = vector.shape_cast %52 : vector<1x8x4xbf16> to vector<8x4xbf16>
    %cst_35 = arith.constant dense<0.000000e+00> : vector<8x256xf32>
    %54 = tpu.matmul %53, %51, %cst_35 {dimension_numbers = #tpu.dot_dimension_numbers<[1], [0], [0], [1], [0, 0, 1, 1], [], []>} : vector<8x4xbf16>, vector<4x256xbf16>, vector<8x256xf32> -> vector<8x256xf32>
    %55 = arith.addf %50, %54 : vector<8x256xf32>
    %56 = vector.extract_strided_slice %1 {offsets = [0, 34], sizes = [4, 256], strides = [1, 1]} : vector<4x290xbf16> to vector<4x256xbf16>
    %c1_36 = arith.constant 1 : index
    %c0_37 = arith.constant 0 : index
    %57 = vector.load %arg4[%c1_36, %c0_37] : memref<2x256xbf16, #tpu.memory_space<vmem>>, vector<1x256xbf16>
    %58 = vector.broadcast %57 : vector<1x256xbf16> to vector<4x256xbf16>
    %59 = arith.mulf %56, %58 : vector<4x256xbf16>
    %c8 = arith.constant 8 : index
    %c0_38 = arith.constant 0 : index
    %c0_39 = arith.constant 0 : index
    %60 = vector.load %arg2[%c8, %c0_38, %c0_39] : memref<9x8x4xbf16, #tpu.memory_space<vmem>>, vector<1x8x4xbf16>
    %61 = vector.shape_cast %60 : vector<1x8x4xbf16> to vector<8x4xbf16>
    %cst_40 = arith.constant dense<0.000000e+00> : vector<8x256xf32>
    %62 = tpu.matmul %61, %59, %cst_40 {dimension_numbers = #tpu.dot_dimension_numbers<[1], [0], [0], [1], [0, 0, 1, 1], [], []>} : vector<8x4xbf16>, vector<4x256xbf16>, vector<8x256xf32> -> vector<8x256xf32>
    %63 = arith.addf %55, %62 : vector<8x256xf32>
    %c0_41 = arith.constant 0 : index
    %c0_42 = arith.constant 0 : index
    %64 = vector.load %arg3[%c0_41, %c0_42] : memref<8x1xf32, #tpu.memory_space<vmem>>, vector<8x1xf32>
    %65 = vector.broadcast %64 : vector<8x1xf32> to vector<8x256xf32>
    %66 = arith.addf %63, %65 : vector<8x256xf32>
    %c0_43 = arith.constant 0 : index
    %c0_44 = arith.constant 0 : index
    %c0_45 = arith.constant 0 : index
    %67 = vector.load %arg5[%c0_43, %c0_44, %c0_45] : memref<1x8x256xf32, #tpu.memory_space<vmem>>, vector<1x8x256xf32>
    %68 = vector.shape_cast %67 : vector<1x8x256xf32> to vector<8x256xf32>
    %69 = vector.shape_cast %66 : vector<8x256xf32> to vector<1x8x256xf32>
    tpu.vector_store %arg5[%c0_43, %c0_44, %c0_45], %69 {strides = array<i32>} : memref<1x8x256xf32, #tpu.memory_space<vmem>>, vector<1x8x256xf32>,
    return
  }
  func.func @transform_0(%arg0: i32) -> (i32, i32, i32) {
    %c0_i32 = arith.constant 0 : i32
    %c0_i32_0 = arith.constant 0 : i32
    %c0_i32_1 = arith.constant 0 : i32
    return %arg0, %c0_i32, %c0_i32_0 : i32, i32, i32
  }
  func.func @transform_1(%arg0: i32) -> (i32, i32, i32) {
    %c0_i32 = arith.constant 0 : i32
    %c0_i32_0 = arith.constant 0 : i32
    %c0_i32_1 = arith.constant 0 : i32
    %c0_i32_2 = arith.constant 0 : i32
    return %c0_i32, %c0_i32_0, %c0_i32_1 : i32, i32, i32
  }
  func.func @transform_2(%arg0: i32) -> (i32, i32) {
    %c0_i32 = arith.constant 0 : i32
    %c0_i32_0 = arith.constant 0 : i32
    %c0_i32_1 = arith.constant 0 : i32
    return %c0_i32, %c0_i32_0 : i32, i32
  }
  func.func @transform_3(%arg0: i32) -> (i32, i32) {
    %c0_i32 = arith.constant 0 : i32
    %c0_i32_0 = arith.constant 0 : i32
    %c0_i32_1 = arith.constant 0 : i32
    return %c0_i32, %c0_i32_0 : i32, i32
  }
  func.func @transform_4(%arg0: i32) -> (i32, i32, i32) {
    %c0_i32 = arith.constant 0 : i32
    %c0_i32_0 = arith.constant 0 : i32
    %c0_i32_1 = arith.constant 0 : i32
    return %arg0, %c0_i32, %c0_i32_0 : i32, i32, i32
  }
}

</mosaic_0001>

<bundles_post_ra>
// kernel: deform_conv2d_forward.5
= control target key start
LH: loop header
LB: loop body
LE: loop exit
PB: predicated region body
PF: predicated region fallthrough
CT: control target
= control target key end

     0   :  { %s1182_s15 = smov 0   ;;  %s1322_s0 = inlined_call_operand.vmem [shape: bf16[2,4,290], index: 0, kind: input, shape index: {}]   ;;  %s1323_s1 = inlined_call_operand.vmem [shape: bf16[9,8,4], index: 1, kind: input, shape index: {}]   ;;  %s1324_s2 = inlined_call_operand.vmem [shape: f32[8,1], index: 2, kind: input, shape index: {}]   ;;  %s1325_s3 = inlined_call_operand.vmem [shape: bf16[2,256], index: 3, kind: input, shape index: {}]   ;;  %s1326_s4 = inlined_call_operand.vmem [shape: f32[2,8,256], index: 4, kind: output, shape index: {}]  }
   0x1 LB: > { %s1066_s16 = sadd.s32 4294967295, %s1139_s15   ;;  %p1070_p0 = scmp.ge.s32.totalorder %s1139_s15, 1  ;;  %s1139_s15 = sphi %s1182_s15, %s14_s15  }
   0x2   : > { %p162_p1 = scmp.lt.s32.totalorder %s1139_s15, 3 }
   0x4   : > { %p163_p2 = pnand %p1070_p0, %p162_p1 }
   0x5   : > { %p188_p3 = scmp.lt.s32.totalorder (!%p163_p2), %s1066_s16, 1  ;;  %s1143_s23 = smov (!%p163_p2), 2  }
   0x6   : > { %166 = sbr.rel (%p163_p2) target bundleno = 508 (0x1fc), region = 36  ;;  %s1144_s24 = smov (!%p163_p2), 18  }
   0x7   : > { %s1145_s25 = smov (!%p163_p2), 16   ;;  %s1146_s26 = smov (!%p163_p2), 32  }
   0x8   : > { %s1147_s27 = smov (!%p163_p2), 34   ;;  %s1148_s28 = smov (!%p163_p2), 127  }
   0x9   : > { %s1149_s29 = smov (!%p163_p2), 111   ;;  %s1151_s6 = smov (!%p163_p2), 126  }
   0xa   : > { %s1152_s7 = smov (!%p163_p2), 112   ;;  %s1153_s10 = smov (!%p163_p2), 96  }
   0xb   : > { %v213_v0 = vlaneseq  ;;  %v1141_v1 = vmov 1966171168   ;;  %v1080_v3 = vld.sshfl [vmem:[%s1325_s3] sm:$0x11 pattern:$0x75316420] }
   0xc   : > { %v211_v2 = vunpack.c.l.s4 %v1141_v1  ;;  %v399_v6 = vcombine.high %v1080_v3, %v1080_v3  ;;  %v1142_v7 = vmov 1983009808   ;;  %s1328_s16 = smov (!%p188_p3, %s1066_s16), 1  ;;  %vm283_vm0 = vcmask 1041408   ;;  %v250_v42 = vld [vmem:[%s1323_s1] sm:$0xf] }
   0xd   : > { %v214_v4 = vshrl.u32 %v213_v0, 7  ;;  %v242_v8 = vunpack.c.l.s4 %v1142_v7  ;;  %s1105_s19 = smul.u32 6, %s1328_s16  ;;  %v1150_v37 = vmov 0   ;;  %vm443_vm1 = vcmask 15360   ;;  %s1154_s11 = smov 110  }
   0xe   : > { %v212_v5 = vunpack.c.0.s8 %v211_v2  ;;  %322 = vmatprep.mubr.bf16.mxu0 %v1150_v37  ;;  %381 = vmatprep.mubr.bf16.mxu1 %v1150_v37  ;;  %vm279_vm2 = vcmask 31744   ;;  %vm530_vm3 = vcmask 130048   ;;  %vm767_vm4 = vcmask 261120   ;;  %s1155_s12 = smov 95   ;;  %s1156_s13 = smov 94  }
   0xf   : > { %v229_v12 = vsub.s32 0, %v214_v4  ;;  %v243_v13 = vunpack.c.0.s8 %v242_v8  ;;  %s192_s22 = scalar_lea.vmem %s1322_s0, %s1105_s19  ;;  %1130 = vset.pattern.permute.xlu1 %v1150_v37  ;;  %1131 = vset.pattern.permute.xlu0 %v1150_v37  ;;  %vm276_vm5 = vcmask 1039360   ;;  %vm680_vm6 = vcmask 146432  }
  0x10   : > { %v215_v9 = vsub.s32 %v212_v5, %v214_v4  ;;  %v1203_v29 = vld [vmem:[%s192_s22] sm:$0x3f]  ;;  %vm917_vm7 = vcmask 277504   ;;  %vm559_vm8 = vcmask 916480   ;;  %vm472_vm9 = vcmask 1031168  }
  0x11   : > { %v1195_v22 = vsub.s32 %v243_v13, %v214_v4  ;;  %v254_v31 = vcombine.high %v1203_v29, %v1203_v29  ;;  %v1075_v4 = vld [vmem:[%s1323_s1 + $0x4] sm:$0xf]  ;;  %vm622_vm10 = vcmask 908288   ;;  %vm796_vm11 = vcmask 785408  }
  0x12   : > { %v406_v10 = vrot.slane %v1080_v3, %v215_v9  ;;  %v413_v11 = vrot.slane %v399_v6, %v215_v9  ;;  %vm709_vm12 = vcmask 900096   ;;  %vm859_vm13 = vcmask 777216  }
  0x13   : > { %v1207_v30 = vrot.slane %v1203_v29, %v1195_v22  ;;  %v1217_v33 = vrot.slane %v254_v31, %v1195_v22  ;;  %vm946_vm14 = vcmask 769024  }
  0x14   : > { %v415_v14 = vshrl.u32 %v406_v10, 16  ;;  %v423_v15 = vshrl.u32 %v413_v11, 16  ;;  %v225_v16 = vpack.i.b16 %v406_v10, %v406_v10  ;;  %v232_v17 = vpack.i.b16 %v413_v11, %v413_v11 }
  0x15   : > { %v1214_v32 = vcombine.high %v1207_v30, %v1207_v30 }
  0x16   : > { %v416_v18 = vpack.i.b16 %v415_v14, %v415_v14  ;;  %v424_v19 = vpack.i.b16 %v423_v15, %v423_v15  ;;  %v230_v20 = vrot.slane %v225_v16, %v229_v12  ;;  %v237_v21 = vrot.slane %v232_v17, %v229_v12 }
  0x18   : > { %v421_v23 = vrot.slane %v416_v18, %v229_v12  ;;  %v429_v24 = vrot.slane %v424_v19, %v229_v12  ;;  %v240_v26 = vcombine.low %v230_v20, %v237_v21 }
  0x1a   : > { %v432_v25 = vcombine.low %v421_v23, %v429_v24  ;;  %v247_v28 = vrot.slane %v240_v26, %v1195_v22  ;;  %v1001_v24 = vld [vmem:[%s1324_s2] sm:$0xff] }
  0x1c   : > { %v439_v27 = vrot.slane %v432_v25, %v1195_v22  ;;  %v249_v34 = vmul.bf16 %v247_v28, %v1203_v29 }
  0x1e   : > { %440 = vrot.lane.b32.xlu0 %v439_v27, %s1143_s23  ;;  %677 = vrot.lane.b32.xlu1 %v439_v27, %s1144_s24  ;;  %v338_v35 = vrot.slane %v249_v34, %v1195_v22 }
  0x20   : > { %v339_v36 = vcombine.high %v338_v35, %v338_v35  ;;  %v344_v38 = vsel %vm283_vm0, %v338_v35, 0  ;;  %v1084_v35 = vld [vmem:[%s1323_s1 + $0xc] sm:$0xf] }
  0x22   : > { %527 = vrot.lane.b32.xlu0 %v247_v28, %s1145_s25  ;;  %764 = vrot.lane.b32.xlu1 %v247_v28, %s1146_s26 }
  0x23   : > { %1078 = vmatprep.subr.msk.bf16.mxu1 %vm283_vm0, %v339_v36 }
  0x24   : > { %364 = vmatpush1.bf16.msra.mxu1 %v344_v38 }
  0x26   : > { %914 = vrot.lane.b32.xlu0 %v439_v27, %s1147_s27  ;;  %270 = vrot.lane.b32.xlu1 %v1207_v30, %s1148_s28 }
  0x27   : > { %1079 = vmatmul.mubr.msk.bf16.vlgmr.msra.gmra.mxu1 %vm279_vm2, %v250_v42 }
  0x28   : > { %603 = vmatprep.mubr.bf16.mxu1 %v1150_v37 }
  0x2a   : > { %272 = vrot.lane.b32.xlu0 %v1214_v32, %s1148_s28  ;;  %274 = vrot.lane.b32.xlu1 %v1217_v33, %s1148_s28 }
  0x2e   : > { %616 = vrot.lane.b32.xlu0 %v1207_v30, %s1149_s29  ;;  %618 = vrot.lane.b32.xlu1 %v1214_v32, %s1149_s29 }
  0x32   : > { %620 = vrot.lane.b32.xlu0 %v1217_v33, %s1149_s29 }
  0x90   : > { %v441_v39 = vpop.permute.xlu0 %440  ;;  %v678_v40 = vpop.permute.xlu1 %677 }
  0x91   : > { %v442_v41 = vrot.slane %v441_v39, 6  ;;  %v679_v56 = vrot.slane %v678_v40, 6 }
  0x93   : > { %v444_v43 = vsel %vm443_vm1, %v442_v41, %v441_v39  ;;  %v681_v3 = vsel %vm680_vm6, %v679_v56, %v678_v40 }
  0x94   : > { %v446_v44 = vmul.bf16 %v444_v43, %v1203_v29  ;;  %v528_v45 = vpop.permute.xlu0 %527  ;;  %v765_v46 = vpop.permute.xlu1 %764  ;;  %v683_v6 = vmul.bf16 %v681_v3, %v1203_v29  ;;  %v1096_v3 = vld [vmem:[%s1323_s1 + $0x1c] sm:$0xf] }
  0x95   : > { %v529_v47 = vrot.slane %v528_v45, 6  ;;  %v766_v50 = vrot.slane %v765_v46, 6 }
  0x96   : > { %v457_v48 = vrot.slane %v446_v44, %v1195_v22  ;;  %v450_v58 = vcombine.high %v446_v44, %v446_v44  ;;  %v694_v10 = vrot.slane %v683_v6, %v1195_v22  ;;  %v687_v13 = vcombine.high %v683_v6, %v683_v6  ;;  %v1081_v44 = vld [vmem:[%s1323_s1 + $0x8] sm:$0xf] }
  0x97   : > { %v531_v49 = vsel %vm530_vm3, %v529_v47, %v528_v45  ;;  %v768_v57 = vsel %vm767_vm4, %v766_v50, %v765_v46 }
  0x98   : > { %v533_v51 = vmul.bf16 %v531_v49, %v1203_v29  ;;  %466 = vrot.lane.b32.xlu0 %v457_v48, %s1151_s6  ;;  %v915_v52 = vpop.permute.xlu0 %914  ;;  %v271_v53 = vpop.permute.xlu1 %270  ;;  %v770_v0 = vmul.bf16 %v768_v57, %v1203_v29  ;;  %v464_v5 = vrot.slane %v450_v58, %v1195_v22  ;;  %v465_v7 = vcombine.high %v457_v48, %v457_v48 }
  0x99   : > { %v916_v11 = vrot.slane %v915_v52, 6  ;;  %v702_v16 = vcombine.high %v694_v10, %v694_v10  ;;  %v701_v18 = vrot.slane %v687_v13, %v1195_v22 }
  0x9a   : > { %v537_v54 = vcombine.high %v533_v51, %v533_v51  ;;  %v544_v55 = vrot.slane %v533_v51, %v1195_v22  ;;  %v781_v8 = vrot.slane %v770_v0, %v1195_v22  ;;  %v774_v9 = vcombine.high %v770_v0, %v770_v0 }
  0x9b   : > { %v918_v15 = vsel %vm917_vm7, %v916_v11, %v915_v52 }
  0x9c   : > { %553 = vrot.lane.b32.xlu1 %v544_v55, %s1152_s7  ;;  %v552_v59 = vcombine.high %v544_v55, %v544_v55  ;;  %v273_v60 = vpop.permute.xlu0 %272  ;;  %v275_v61 = vpop.permute.xlu1 %274  ;;  %v551_v1 = vrot.slane %v537_v54, %v1195_v22  ;;  %v788_v12 = vrot.slane %v774_v9, %v1195_v22  ;;  %v789_v14 = vcombine.high %v781_v8, %v781_v8  ;;  %v1099_v9 = vld [vmem:[%s1323_s1 + $0x20] sm:$0xf] }
  0x9d   : > { %v278_v62 = vsel %vm276_vm5, %v273_v60, %v275_v61  ;;  %v277_v63 = vsel %vm276_vm5, %v271_v53, %v273_v60  ;;  %v920_v17 = vmul.bf16 %v918_v15, %v1203_v29  ;;  %v1087_v53 = vld [vmem:[%s1323_s1 + $0x10] sm:$0xf] }
  0x9e   : > { %555 = vrot.lane.b32.xlu0 %v552_v59, %s1152_s7  ;;  %1076 = vmatprep.subr.msk.bf16.mxu0 %vm283_vm0, %v278_v62  ;;  %v285_v2 = vsel %vm283_vm0, %v277_v63, 0  ;;  %v1090_v59 = vld [vmem:[%s1323_s1 + $0x14] sm:$0xf]  ;;  %v1093_v63 = vld [vmem:[%s1323_s1 + $0x18] sm:$0xf] }
  0x9f   : > { %305 = vmatpush1.bf16.msra.mxu0 %v285_v2  ;;  %v931_v19 = vrot.slane %v920_v17, %v1195_v22  ;;  %v924_v20 = vcombine.high %v920_v17, %v920_v17 }
  0xa0   : > { %557 = vrot.lane.b32.xlu1 %v551_v1, %s1152_s7  ;;  %v617_v25 = vpop.permute.xlu0 %616  ;;  %v619_v27 = vpop.permute.xlu1 %618 }
  0xa1   : > { %v938_v21 = vrot.slane %v924_v20, %v1195_v22  ;;  %v939_v23 = vcombine.high %v931_v19, %v931_v19  ;;  %v623_v42 = vsel %vm622_vm10, %v617_v25, %v619_v27 }
  0xa2   : > { %470 = vrot.lane.b32.xlu0 %v464_v5, %s1151_s6  ;;  %1077 = vmatmul.mubr.msk.bf16.vlgmr.msra.gmra.mxu0 %vm279_vm2, %v1075_v4  ;;  %v629_v46 = vsel %vm283_vm0, %v623_v42, 0 }
  0xa3   : > { %516 = vmatprep.mubr.bf16.mxu0 %v1150_v37 }
  0xa4   : > { %468 = vrot.lane.b32.xlu1 %v465_v7, %s1151_s6  ;;  %v621_v26 = vpop.permute.xlu0 %620  ;;  %s1104_s6 = sshll.u32 %s1328_s16, 4 }
  0xa5   : > { %v624_v43 = vsel %vm622_vm10, %v619_v27, %v621_v26  ;;  %s197_s9 = scalar_lea.vmem %s1326_s4, %s1104_s6 }
  0xa6   : > { %790 = vrot.lane.b32.xlu0 %v781_v8, %s1153_s10 }
  0xa8   : > { %703 = vrot.lane.b32.xlu1 %v694_v10, %s1154_s11 }
  0xaa   : > { %794 = vrot.lane.b32.xlu0 %v788_v12, %s1153_s10 }
  0xac   : > { %792 = vrot.lane.b32.xlu1 %v789_v14, %s1153_s10 }
  0xae   : > { %705 = vrot.lane.b32.xlu0 %v702_v16, %s1154_s11 }
  0xb0   : > { %707 = vrot.lane.b32.xlu1 %v701_v18, %s1154_s11 }
  0xb2   : > { %855 = vrot.lane.b32.xlu0 %v1214_v32, %s1155_s12 }
  0xb4   : > { %853 = vrot.lane.b32.xlu1 %v1207_v30, %s1155_s12 }
  0xb6   : > { %940 = vrot.lane.b32.xlu0 %v931_v19, %s1156_s13 }
  0xb8   : > { %857 = vrot.lane.b32.xlu1 %v1217_v33, %s1155_s12 }
  0xba   : > { %944 = vrot.lane.b32.xlu0 %v938_v21, %s1156_s13 }
  0xbc   : > { %942 = vrot.lane.b32.xlu1 %v939_v23, %s1156_s13 }
  0xc0   : > { %1004 = vperm.xlu1 %1130, %v1001_v24  }
  0xe7   : > { %v383_v10 = vpop.f32.mrf.mxu1 }
  0xe9   : > { %v385_v11 = vpop.f32.mrf.mxu1 }
 0x10a   : > { %v467_v28 = vpop.permute.xlu0 %466 }
 0x10e   : > { %v554_v29 = vpop.permute.xlu1 %553 }
 0x110   : > { %v556_v30 = vpop.permute.xlu0 %555 }
 0x111   : > { %v560_v31 = vsel %vm559_vm8, %v554_v29, %v556_v30 }
 0x112   : > { %v558_v32 = vpop.permute.xlu1 %557  ;;  %v566_v22 = vsel %vm283_vm0, %v560_v31, 0 }
 0x113   : > { %v561_v33 = vsel %vm559_vm8, %v556_v30, %v558_v32 }
 0x114   : > { %v471_v34 = vpop.permute.xlu0 %470  ;;  %1085 = vmatprep.subr.msk.bf16.mxu1 %vm283_vm0, %v561_v33 }
 0x115   : > { %586 = vmatpush1.bf16.msra.mxu1 %v566_v22 }
 0x116   : > { %v469_v36 = vpop.permute.xlu1 %468 }
 0x117   : > { %v473_v38 = vsel %vm472_vm9, %v467_v28, %v469_v36  ;;  %v474_v39 = vsel %vm472_vm9, %v469_v36, %v471_v34 }
 0x118   : > { %v479_v40 = vsel %vm283_vm0, %v473_v38, 0  ;;  %v791_v41 = vpop.permute.xlu0 %790  ;;  %1082 = vmatprep.subr.msk.bf16.mxu0 %vm283_vm0, %v474_v39  ;;  %1086 = vmatmul.mubr.msk.bf16.vlgmr.msra.gmra.mxu1 %vm279_vm2, %v1084_v35 }
 0x119   : > { %499 = vmatpush1.bf16.msra.mxu0 %v479_v40  ;;  %753 = vmatprep.mubr.bf16.mxu1 %v1150_v37 }
 0x11a   : > { %1088 = vmatprep.subr.msk.bf16.mxu0 %vm283_vm0, %v624_v43  ;;  %v704_v45 = vpop.permute.xlu1 %703 }
 0x11c   : > { %v795_v47 = vpop.permute.xlu0 %794  ;;  %1083 = vmatmul.mubr.msk.bf16.vlgmr.msra.gmra.mxu0 %vm279_vm2, %v1081_v44 }
 0x11d   : > { %649 = vmatpush1.bf16.msra.mxu0 %v629_v46  ;;  %666 = vmatprep.mubr.bf16.mxu0 %v1150_v37 }
 0x11e   : > { %v793_v48 = vpop.permute.xlu1 %792 }
 0x11f   : > { %v798_v49 = vsel %vm796_vm11, %v793_v48, %v795_v47  ;;  %v797_v51 = vsel %vm796_vm11, %v791_v41, %v793_v48 }
 0x120   : > { %v706_v50 = vpop.permute.xlu0 %705  ;;  %1094 = vmatprep.subr.msk.bf16.mxu0 %vm283_vm0, %v798_v49  ;;  %v803_v56 = vsel %vm283_vm0, %v797_v51, 0 }
 0x121   : > { %v710_v52 = vsel %vm709_vm12, %v704_v45, %v706_v50 }
 0x122   : > { %v708_v54 = vpop.permute.xlu1 %707  ;;  %v716_v57 = vsel %vm283_vm0, %v710_v52, 0 }
 0x123   : > { %v711_v55 = vsel %vm709_vm12, %v706_v50, %v708_v54 }
 0x124   : > { %v856_v58 = vpop.permute.xlu0 %855  ;;  %1089 = vmatmul.mubr.msk.bf16.vlgmr.msra.gmra.mxu0 %vm279_vm2, %v1087_v53  ;;  %1091 = vmatprep.subr.msk.bf16.mxu1 %vm283_vm0, %v711_v55 }
 0x125   : > { %823 = vmatpush1.bf16.msra.mxu0 %v803_v56  ;;  %736 = vmatpush1.bf16.msra.mxu1 %v716_v57 }
 0x126   : > { %v854_v60 = vpop.permute.xlu1 %853  ;;  %840 = vmatprep.mubr.bf16.mxu0 %v1150_v37 }
 0x127   : > { %v860_v62 = vsel %vm859_vm13, %v854_v60, %v856_v58 }
 0x128   : > { %v941_v61 = vpop.permute.xlu0 %940  ;;  %1092 = vmatmul.mubr.msk.bf16.vlgmr.msra.gmra.mxu1 %vm279_vm2, %v1090_v59  ;;  %v866_v2 = vsel %vm283_vm0, %v860_v62, 0 }
 0x129   : > { %903 = vmatprep.mubr.bf16.mxu1 %v1150_v37 }
 0x12a   : > { %v858_v0 = vpop.permute.xlu1 %857 }
 0x12b   : > { %v861_v1 = vsel %vm859_vm13, %v856_v58, %v858_v0 }
 0x12c   : > { %1095 = vmatmul.mubr.msk.bf16.vlgmr.msra.gmra.mxu0 %vm279_vm2, %v1093_v63  ;;  %1097 = vmatprep.subr.msk.bf16.mxu1 %vm283_vm0, %v861_v1  ;;  %v945_v4 = vpop.permute.xlu0 %944 }
 0x12d   : > { %886 = vmatpush1.bf16.msra.mxu1 %v866_v2  ;;  %990 = vmatprep.mubr.bf16.mxu0 %v1150_v37  ;;  %v387_v37 = vpop.f32.mrf.mxu1 }
 0x12e   : > { %v943_v5 = vpop.permute.xlu1 %942 }
 0x12f   : > { %v947_v6 = vsel %vm946_vm14, %v941_v61, %v943_v5  ;;  %v948_v7 = vsel %vm946_vm14, %v943_v5, %v945_v4  ;;  %v388_v12 = vpop.f32.mrf.mxu1 }
 0x130   : > { %v953_v8 = vsel %vm283_vm0, %v947_v6, 0  ;;  %1098 = vmatmul.mubr.msk.bf16.vlgmr.msra.gmra.mxu1 %vm279_vm2, %v1096_v3  ;;  %1100 = vmatprep.subr.msk.bf16.mxu0 %vm283_vm0, %v948_v7 }
 0x131   : > { %973 = vmatpush1.bf16.msra.mxu0 %v953_v8 }
 0x134   : > { %1101 = vmatmul.mubr.msk.bf16.vlgmr.msra.gmra.mxu0 %vm279_vm2, %v1099_v9 }
 0x13b   : > { %v1005_v53 = vpop.permute.xlu1 %1004 }
 0x162   : > { %v324_v13 = vpop.f32.mrf.mxu0 }
 0x163   : > { %v384_v14 = vadd.f32 %v383_v10, %v324_v13 }
 0x164   : > { %v326_v15 = vpop.f32.mrf.mxu0 }
 0x165   : > { %v386_v16 = vadd.f32 %v385_v11, %v326_v15 }
 0x166   : > { %v328_v17 = vpop.f32.mrf.mxu0 }
 0x168   : > { %v329_v18 = vpop.f32.mrf.mxu0 }
 0x1d8   : > { %v605_v19 = vpop.f32.mrf.mxu1 }
 0x1da   : > { %v607_v20 = vpop.f32.mrf.mxu1 }
 0x1dc   : > { %v518_v21 = vpop.f32.mrf.mxu0  ;;  %v609_v23 = vpop.f32.mrf.mxu1 }
 0x1dd   : > { %v525_v30 = vadd.f32 %v518_v21, %v384_v14 }
 0x1de   : > { %v520_v24 = vpop.f32.mrf.mxu0  ;;  %v610_v25 = vpop.f32.mrf.mxu1 }
 0x1df   : > { %v526_v33 = vadd.f32 %v520_v24, %v386_v16  ;;  %v612_v35 = vadd.f32 %v605_v19, %v525_v30 }
 0x1e0   : > { %v522_v26 = vpop.f32.mrf.mxu0 }
 0x1e1   : > { %v613_v39 = vadd.f32 %v607_v20, %v526_v33 }
 0x1e2   : > { %v523_v27 = vpop.f32.mrf.mxu0 }
 0x1e4   : > { %v668_v28 = vpop.f32.mrf.mxu0 }
 0x1e5   : > { %v675_v40 = vadd.f32 %v668_v28, %v612_v35 }
 0x1e6   : > { %v670_v29 = vpop.f32.mrf.mxu0 }
 0x1e7   : > { %v676_v43 = vadd.f32 %v670_v29, %v613_v39 }
 0x1e8   : > { %v672_v31 = vpop.f32.mrf.mxu0  ;;  %v755_v32 = vpop.f32.mrf.mxu1 }
 0x1e9   : > { %v762_v44 = vadd.f32 %v755_v32, %v675_v40 }
 0x1ea   : > { %v673_v22 = vpop.f32.mrf.mxu0  ;;  %v757_v34 = vpop.f32.mrf.mxu1 }
 0x1eb   : > { %v763_v47 = vadd.f32 %v757_v34, %v676_v43 }
 0x1ec   : > { %v759_v36 = vpop.f32.mrf.mxu1  ;;  %v842_v38 = vpop.f32.mrf.mxu0 }
 0x1ed   : > { %v849_v48 = vadd.f32 %v842_v38, %v762_v44 }
 0x1ee   : > { %v760_v41 = vpop.f32.mrf.mxu1  ;;  %v844_v42 = vpop.f32.mrf.mxu0 }
 0x1ef   : > { %v850_v51 = vadd.f32 %v844_v42, %v763_v47 }
 0x1f0   : > { %v846_v45 = vpop.f32.mrf.mxu0  ;;  %v905_v46 = vpop.f32.mrf.mxu1 }
 0x1f1   : > { %v912_v52 = vadd.f32 %v905_v46, %v849_v48 }
 0x1f2   : > { %v847_v49 = vpop.f32.mrf.mxu0  ;;  %v907_v50 = vpop.f32.mrf.mxu1 }
 0x1f3   : > { %v913_v56 = vadd.f32 %v907_v50, %v850_v51 }
 0x1f4   : > { %v992_v54 = vpop.f32.mrf.mxu0  ;;  %v909_v55 = vpop.f32.mrf.mxu1 }
 0x1f5   : > { %v999_v57 = vadd.f32 %v992_v54, %v912_v52 }
 0x1f6   : > { %v994_v58 = vpop.f32.mrf.mxu0  ;;  %v910_v59 = vpop.f32.mrf.mxu1 }
 0x1f7   : > { %v1000_v60 = vadd.f32 %v994_v58, %v913_v56  ;;  %v1007_v61 = vadd.f32 %v1005_v53, %v999_v57 }
 0x1f8   : > { %v996_v62 = vpop.f32.mrf.mxu0 }
 0x1f9   : > { %v1008_v63 = vadd.f32 %v1005_v53, %v1000_v60  ;;  %1009 = vst [vmem:[%s197_s9] sm:$0xff] %v1007_v61 }
 0x1fa   : > { %v997_v0 = vpop.f32.mrf.mxu0 }
 0x1fb   : > { %1010 = vst [vmem:[%s197_s9 + $0x8] sm:$0xff] %v1008_v63 }
 0x1fc PF: > { %s14_s15 = sadd.s32 1, %s1139_s15  }
 0x1fd   : > { %p11_p4 = scmp.ge.s32.totalorder %s14_s15, 4  }
 0x1ff   :  { %13 = sbr.rel (!%p11_p4) target bundleno = 1 (0x1), region = 74 }

// kernel: deform_conv2d_forward.3
= control target key start
LH: loop header
LB: loop body
LE: loop exit
PB: predicated region body
PF: predicated region fallthrough
CT: control target
= control target key end

     0   :  { %s1679_s15 = smov 0   ;;  %s2022_s0 = inlined_call_operand.vmem [shape: f32[2,4,290], index: 0, kind: input, shape index: {}]   ;;  %s2023_s1 = inlined_call_operand.vmem [shape: f32[9,27,4], index: 1, kind: input, shape index: {}]   ;;  %s2024_s2 = inlined_call_operand.vmem [shape: f32[27,1], index: 2, kind: input, shape index: {}]   ;;  %s2025_s3 = inlined_call_operand.vmem [shape: f32[2,256], index: 3, kind: input, shape index: {}]   ;;  %s2026_s4 = inlined_call_operand.vmem [shape: f32[2,27,256], index: 4, kind: output, shape index: {}]  }
   0x1 LB: > { %s1504_s16 = sadd.s32 4294967295, %s1637_s15   ;;  %p1508_p0 = scmp.ge.s32.totalorder %s1637_s15, 1  ;;  %s1637_s15 = sphi %s1679_s15, %s14_s15  }
   0x2   : > { %p162_p1 = scmp.lt.s32.totalorder %s1637_s15, 3 }
   0x4   : > { %p163_p2 = pnand %p1508_p0, %p162_p1 }
   0x6   : > { %166 = sbr.rel (%p163_p2) target bundleno = 524 (0x20c), region = 36 }
   0xb   : > { %v202_v0 = vlaneseq  ;;  %p188_p3 = scmp.lt.s32.totalorder %s1504_s16, 1  ;;  %v1528_v2 = vld [vmem:[%s2025_s3 + $0x1] ss:$2 sm:$0x3]  ;;  %s1639_s25 = smov 2   ;;  %v1645_v15 = vmov 0.0  }
   0xc   : > { %v200_v3 = vld [vmem:[%s2025_s3] ss:$2 sm:$0x3]  ;;  %s1640_s26 = smov 18   ;;  %s1641_s27 = smov 16   ;;  %328 = vmatprep.mubr.f32.mxu1 %v1645_v15  ;;  %316 = vmatprep.mubr.f32.mxu0 %v1645_v15  ;;  %vm463_vm0 = vcmask 15360  }
   0xd   : > { %v203_v1 = vshrl.u32 %v202_v0, 7  ;;  %s2038_s16 = smov (!%p188_p3, %s1504_s16), 1  ;;  %s1642_s28 = smov 32   ;;  %vm602_vm1 = vcmask 130048   ;;  %vm231_vm2 = vcmask 1039360   ;;  %vm247_vm3 = vcmask 1043456  }
   0xe   : > { %s1604_s21 = smul.u32 12, %s2038_s16  ;;  %s1643_s29 = smov 34   ;;  %vm868_vm4 = vcmask 146432   ;;  %v1514_v38 = vld [vmem:[%s2023_s1 + $0x30] sm:$0xff]  ;;  %vm234_vm5 = vcmask 31744   ;;  %vm1007_vm6 = vcmask 261120  }
   0xf   : > { %v204_v4 = vsub.s32 0, %v203_v1  ;;  %v208_v5 = vsub.s32 1, %v203_v1  ;;  %s1644_s30 = smov 127   ;;  %s1646_s5 = smov 126   ;;  %v1515_v42 = vld [vmem:[%s2023_s1 + $0x38] sm:$0x7] }
  0x10   : > { %s192_s24 = scalar_lea.vmem %s2022_s0, %s1604_s21  ;;  %s1647_s6 = smov 112   ;;  %v1512_v44 = vld [vmem:[%s2023_s1 + $0x20] sm:$0xff]  ;;  %v1513_v48 = vld [vmem:[%s2023_s1 + $0x28] sm:$0xff]  ;;  %v215_v55 = vld [vmem:[%s2023_s1 + $0x10] sm:$0xff]  ;;  %vm1273_vm7 = vcmask 277504   ;;  %v1653_v63 = vmov 0  }
  0x11   : > { %v454_v6 = vrot.slane %v1528_v2, %v204_v4  ;;  %v458_v7 = vrot.slane %v1528_v2, %v208_v5  ;;  %v205_v8 = vrot.slane %v200_v3, %v204_v4  ;;  %v209_v9 = vrot.slane %v200_v3, %v208_v5  ;;  %v1699_v12 = vld [vmem:[%s192_s24] sm:$0xff]  ;;  %v1706_v14 = vld [vmem:[%s192_s24 + $0x8] sm:$0xf]  ;;  %s1648_s11 = smov 111   ;;  %s1649_s18 = smov 110   ;;  %1628 = vset.pattern.permute.xlu1 %v1653_v63  ;;  %v1411_v0 = vld [vmem:[%s2024_s2 + $0x10] sm:$0xff] }
  0x12   : > { %v1703_v13 = vcombine.high %v1699_v12, %v1699_v12  ;;  %v213_v46 = vld [vmem:[%s2023_s1] sm:$0xff]  ;;  %v214_v51 = vld [vmem:[%s2023_s1 + $0x8] sm:$0xff]  ;;  %v216_v57 = vld [vmem:[%s2023_s1 + $0x18] sm:$0x7]  ;;  %1629 = vset.pattern.permute.xlu0 %v1653_v63  ;;  %vm483_vm8 = vcmask 1031168   ;;  %vm622_vm9 = vcmask 916480  }
  0x13   : > { %v459_v10 = vcombine.low %v454_v6, %v458_v7  ;;  %v210_v11 = vcombine.low %v205_v8, %v209_v9  ;;  %v1409_v61 = vld [vmem:[%s2024_s2] sm:$0xff]  ;;  %v1410_v62 = vld [vmem:[%s2024_s2 + $0x8] sm:$0xff]  ;;  %v1412_v1 = vld [vmem:[%s2024_s2 + $0x18] sm:$0x7]  ;;  %vm749_vm10 = vcmask 908288   ;;  %vm888_vm11 = vcmask 900096  }
  0x14   : > { %v1529_v7 = vld [vmem:[%s2023_s1 + $0x40] sm:$0xff]  ;;  %vm1027_vm12 = vcmask 785408   ;;  %vm1154_vm13 = vcmask 777216   ;;  %vm1293_vm14 = vcmask 769024   ;;  %v1590_v63 = vld [vmem:[%s2023_s1 + $0x108] sm:$0xff]  ;;  %s1601_s22 = sshll.u32 %s2038_s16, 6 }
  0x15   : > { %460 = vrot.lane.b32.xlu0 %v459_v10, %s1639_s25  ;;  %865 = vrot.lane.b32.xlu1 %v459_v10, %s1640_s26  ;;  %v212_v30 = vmul.f32 %v210_v11, %v1699_v12  ;;  %s1650_s25 = smov 96   ;;  %s2003_s24 = scalar_lea.vmem %s2026_s4, %s1601_s22 }
  0x17   : > { %v342_v39 = vcombine.high %v212_v30, %v212_v30 }
  0x19   : > { %599 = vrot.lane.b32.xlu0 %v210_v11, %s1641_s27  ;;  %1004 = vrot.lane.b32.xlu1 %v210_v11, %s1642_s28  ;;  %s1651_s28 = smov 95  }
  0x1d   : > { %1270 = vrot.lane.b32.xlu0 %v459_v10, %s1643_s29  ;;  %227 = vrot.lane.b32.xlu1 %v1703_v13, %s1644_s30  ;;  %s1652_s29 = smov 94  }
  0x21   : > { %229 = vrot.lane.b32.xlu0 %v1706_v14, %s1644_s30  ;;  %225 = vrot.lane.b32.xlu1 %v1699_v12, %s1644_s30 }
  0x87   : > { %v461_v16 = vpop.permute.xlu0 %460  ;;  %v1712_v17 = vpop.permute.xlu1 %865 }
  0x88   : > { %v462_v18 = vrot.slane %v461_v16, 4  ;;  %v867_v32 = vrot.slane %v1712_v17, 4 }
  0x8a   : > { %v464_v19 = vsel %vm463_vm0, %v462_v18, %v461_v16  ;;  %v468_v20 = vmul.f32 %v462_v18, %v1706_v14  ;;  %v869_v40 = vsel %vm868_vm4, %v867_v32, %v1712_v17  ;;  %v873_v49 = vmul.f32 %v867_v32, %v1706_v14  ;;  %v1531_v18 = vld [vmem:[%s2023_s1 + $0x50] sm:$0xff] }
  0x8b   : > { %v467_v21 = vmul.f32 %v464_v19, %v1699_v12  ;;  %v600_v22 = vpop.permute.xlu0 %599  ;;  %v1716_v23 = vpop.permute.xlu1 %1004  ;;  %v872_v43 = vmul.f32 %v869_v40, %v1699_v12 }
  0x8c   : > { %v601_v24 = vrot.slane %v600_v22, 4  ;;  %481 = vrot.lane.b32.xlu1 %v468_v20, %s1646_s5  ;;  %v1006_v41 = vrot.slane %v1716_v23, 4  ;;  %v1540_v20 = vld [vmem:[%s2023_s1 + $0x68] sm:$0xff] }
  0x8d   : > { %v476_v25 = vcombine.high %v467_v21, %v467_v21  ;;  %v881_v47 = vcombine.high %v872_v43, %v872_v43 }
  0x8e   : > { %v603_v26 = vsel %vm602_vm1, %v601_v24, %v600_v22  ;;  %v607_v33 = vmul.f32 %v601_v24, %v1706_v14  ;;  %v1008_v45 = vsel %vm1007_vm6, %v1006_v41, %v1716_v23  ;;  %v1012_v52 = vmul.f32 %v1006_v41, %v1706_v14  ;;  %v1532_v23 = vld [vmem:[%s2023_s1 + $0x58] sm:$0x7]  ;;  %v1560_v41 = vld [vmem:[%s2023_s1 + $0xa8] sm:$0xff] }
  0x8f   : > { %v606_v27 = vmul.f32 %v603_v26, %v1699_v12  ;;  %479 = vrot.lane.b32.xlu0 %v476_v25, %s1646_s5  ;;  %v1719_v28 = vpop.permute.xlu0 %1270  ;;  %v228_v29 = vpop.permute.xlu1 %227  ;;  %v1011_v50 = vmul.f32 %v1008_v45, %v1699_v12  ;;  %v1541_v25 = vld [vmem:[%s2023_s1 + $0x70] sm:$0xff] }
  0x90   : > { %v1272_v54 = vrot.slane %v1719_v28, 4 }
  0x91   : > { %616 = vrot.lane.b32.xlu1 %v606_v27, %s1647_s6  ;;  %v615_v31 = vcombine.high %v606_v27, %v606_v27  ;;  %v1020_v53 = vcombine.high %v1011_v50, %v1011_v50 }
  0x92   : > { %v1274_v56 = vsel %vm1273_vm7, %v1272_v54, %v1719_v28  ;;  %v1278_v59 = vmul.f32 %v1272_v54, %v1706_v14  ;;  %v1570_v54 = vld [vmem:[%s2023_s1 + $0xc8] sm:$0xff] }
  0x93   : > { %477 = vrot.lane.b32.xlu0 %v467_v21, %s1646_s5  ;;  %v230_v34 = vpop.permute.xlu0 %229  ;;  %v226_v35 = vpop.permute.xlu1 %225  ;;  %v1277_v58 = vmul.f32 %v1274_v56, %v1699_v12  ;;  %v1579_v56 = vld [vmem:[%s2023_s1 + $0xe0] sm:$0xff] }
  0x94   : > { %v233_v36 = vsel %vm231_vm2, %v228_v29, %v230_v34  ;;  %v232_v37 = vsel %vm231_vm2, %v226_v35, %v228_v29  ;;  %v1549_v29 = vld [vmem:[%s2023_s1 + $0x80] sm:$0xff]  ;;  %v1550_v34 = vld [vmem:[%s2023_s1 + $0x88] sm:$0xff] }
  0x95   : > { %618 = vrot.lane.b32.xlu1 %v615_v31, %s1647_s6  ;;  %1602 = vmatprep.subr.msk.mxu1 %vm247_vm3, %v233_v36  ;;  %v1286_v60 = vcombine.high %v1277_v58, %v1277_v58  ;;  %v1542_v31 = vld [vmem:[%s2023_s1 + $0x78] sm:$0x7] }
  0x96   : > { %1603 = vmatpush1.msk.msra.mxu1 %vm247_vm3, %v232_v37  ;;  %1516 = vmatprep.subr.msk.mxu0 %vm247_vm3, %v233_v36  ;;  %v1559_v36 = vld [vmem:[%s2023_s1 + $0xa0] sm:$0xff] }
  0x97   : > { %620 = vrot.lane.b32.xlu0 %v607_v33, %s1647_s6  ;;  %1520 = vmatmul.mubr.msk.f32.vlgmr.msra.gmra.mxu1 %vm234_vm5, %v1514_v38 }
  0x98   : > { %334 = vmatprep.mubr.f32.mxu1 %v1645_v15  ;;  %1522 = vmatprep.subr.msk.mxu1 %vm247_vm3, %v342_v39  ;;  %v1551_v39 = vld [vmem:[%s2023_s1 + $0x90] sm:$0xff] }
  0x99   : > { %747 = vrot.lane.b32.xlu1 %v1706_v14, %s1648_s11  ;;  %1523 = vmatpush1.msk.msra.mxu1 %vm247_vm3, %v212_v30 }
  0x9a   : > { %1517 = vmatpush1.msk.msra.mxu0 %vm247_vm3, %v232_v37 }
  0x9b   : > { %745 = vrot.lane.b32.xlu0 %v1703_v13, %s1648_s11  ;;  %1521 = vmatmul.mubr.msk.f32.gmra.mxu1 %vm234_vm5, %v1515_v42 }
  0x9c   : > { %423 = vmatprep.mubr.f32.mxu1 %v1645_v15  ;;  %1518 = vmatmul.mubr.msk.f32.vlgmr.msra.gmra.mxu0 %vm234_vm5, %v1512_v44  ;;  %v1552_v44 = vld [vmem:[%s2023_s1 + $0x98] sm:$0x7] }
  0x9d   : > { %882 = vrot.lane.b32.xlu1 %v872_v43, %s1649_s18  ;;  %322 = vmatprep.mubr.f32.mxu0 %v1645_v15 }
  0x9f   : > { %743 = vrot.lane.b32.xlu0 %v1699_v12, %s1648_s11  ;;  %1524 = vmatmul.mubr.msk.f32.vlgmr.msra.gmra.mxu1 %vm234_vm5, %v213_v46 }
  0xa0   : > { %429 = vmatprep.mubr.f32.mxu1 %v1645_v15  ;;  %1519 = vmatmul.mubr.msk.f32.gmra.mxu0 %vm234_vm5, %v1513_v48 }
  0xa1   : > { %884 = vrot.lane.b32.xlu1 %v881_v47, %s1649_s18  ;;  %566 = vmatprep.mubr.f32.mxu0 %v1645_v15  ;;  %v1561_v47 = vld [vmem:[%s2023_s1 + $0xb0] sm:$0xff] }
  0xa3   : > { %886 = vrot.lane.b32.xlu0 %v873_v49, %s1649_s18  ;;  %1525 = vmatmul.mubr.msk.f32.gmra.mxu1 %vm234_vm5, %v214_v51 }
  0xa4   : > { %435 = vmatprep.mubr.f32.mxu1 %v1645_v15 }
  0xa5   : > { %1025 = vrot.lane.b32.xlu1 %v1012_v52, %s1650_s25  ;;  %v1562_v52 = vld [vmem:[%s2023_s1 + $0xb8] sm:$0x7] }
  0xa7   : > { %1023 = vrot.lane.b32.xlu0 %v1020_v53, %s1650_s25  ;;  %1526 = vmatmul.mubr.msk.f32.gmra.mxu1 %vm234_vm5, %v215_v55 }
  0xa8   : > { %441 = vmatprep.mubr.f32.mxu1 %v1645_v15 }
  0xa9   : > { %1150 = vrot.lane.b32.xlu1 %v1703_v13, %s1651_s28 }
  0xab   : > { %1021 = vrot.lane.b32.xlu0 %v1011_v50, %s1650_s25  ;;  %1527 = vmatmul.mubr.msk.f32.gmra.mxu1 %vm234_vm5, %v216_v57  ;;  %v1569_v50 = vld [vmem:[%s2023_s1 + $0xc0] sm:$0xff]  ;;  %v1571_v57 = vld [vmem:[%s2023_s1 + $0xd0] sm:$0xff] }
  0xac   : > { %705 = vmatprep.mubr.f32.mxu1 %v1645_v15 }
  0xad   : > { %1148 = vrot.lane.b32.xlu1 %v1699_v12, %s1651_s28  ;;  %v1530_v12 = vld [vmem:[%s2023_s1 + $0x48] sm:$0xff] }
  0xaf   : > { %1152 = vrot.lane.b32.xlu0 %v1706_v14, %s1651_s28  ;;  %v1539_v14 = vld [vmem:[%s2023_s1 + $0x60] sm:$0xff] }
  0xb1   : > { %1291 = vrot.lane.b32.xlu1 %v1278_v59, %s1652_s29  ;;  %v1572_v59 = vld [vmem:[%s2023_s1 + $0xd8] sm:$0x7] }
  0xb3   : > { %1289 = vrot.lane.b32.xlu0 %v1286_v60, %s1652_s29  ;;  %v1581_v60 = vld [vmem:[%s2023_s1 + $0xf0] sm:$0xff] }
  0xb5   : > { %1415 = vperm.xlu1 %1628, %v1409_v61   ;;  %v1589_v61 = vld [vmem:[%s2023_s1 + $0x100] sm:$0xff] }
  0xb7   : > { %1287 = vrot.lane.b32.xlu0 %v1277_v58, %s1652_s29  ;;  %v1580_v58 = vld [vmem:[%s2023_s1 + $0xe8] sm:$0xff] }
  0xb9   : > { %1425 = vperm.xlu1 %1628, %v1411_v0   ;;  %v1591_v0 = vld [vmem:[%s2023_s1 + $0x110] sm:$0xff] }
  0xbb   : > { %1420 = vperm.xlu0 %1629, %v1410_v62   ;;  %v1582_v62 = vld [vmem:[%s2023_s1 + $0xf8] sm:$0x7] }
  0xbd   : > { %1430 = vperm.xlu1 %1628, %v1412_v1   ;;  %v1592_v1 = vld [vmem:[%s2023_s1 + $0x118] sm:$0x7] }
  0xfe   : > { %v482_v2 = vpop.permute.xlu1 %481 }
 0x101   : > { %v480_v3 = vpop.permute.xlu0 %479 }
 0x102   : > { %v485_v4 = vsel %vm483_vm8, %v480_v3, %v482_v2 }
 0x103   : > { %1533 = vmatprep.subr.msk.mxu0 %vm247_vm3, %v485_v4  ;;  %v617_v5 = vpop.permute.xlu1 %616 }
 0x105   : > { %v478_v6 = vpop.permute.xlu0 %477 }
 0x106   : > { %v484_v8 = vsel %vm483_vm8, %v478_v6, %v480_v3 }
 0x107   : > { %1534 = vmatpush1.msk.msra.mxu0 %vm247_vm3, %v484_v8  ;;  %v619_v9 = vpop.permute.xlu1 %618 }
 0x108   : > { %1535 = vmatmul.mubr.msk.f32.vlgmr.msra.gmra.mxu0 %vm234_vm5, %v1529_v7  ;;  %v623_v10 = vsel %vm622_vm9, %v617_v5, %v619_v9 }
 0x109   : > { %v621_v11 = vpop.permute.xlu0 %620  ;;  %572 = vmatprep.mubr.f32.mxu0 %v1645_v15 }
 0x10a   : > { %v624_v13 = vsel %vm622_vm9, %v619_v9, %v621_v11 }
 0x10b   : > { %1543 = vmatprep.subr.msk.mxu1 %vm247_vm3, %v624_v13  ;;  %v748_v16 = vpop.permute.xlu1 %747 }
 0x10c   : > { %1536 = vmatmul.mubr.msk.f32.gmra.mxu0 %vm234_vm5, %v1530_v12  ;;  %1544 = vmatpush1.msk.msra.mxu1 %vm247_vm3, %v623_v10 }
 0x10d   : > { %v746_v17 = vpop.permute.xlu0 %745  ;;  %1545 = vmatmul.mubr.msk.f32.vlgmr.msra.gmra.mxu1 %vm234_vm5, %v1539_v14  ;;  %578 = vmatprep.mubr.f32.mxu0 %v1645_v15 }
 0x10e   : > { %v751_v19 = vsel %vm749_vm10, %v746_v17, %v748_v16  ;;  %711 = vmatprep.mubr.f32.mxu1 %v1645_v15 }
 0x10f   : > { %1553 = vmatprep.subr.msk.mxu0 %vm247_vm3, %v751_v19  ;;  %v883_v21 = vpop.permute.xlu1 %882 }
 0x110   : > { %1537 = vmatmul.mubr.msk.f32.gmra.mxu0 %vm234_vm5, %v1531_v18 }
 0x111   : > { %v744_v22 = vpop.permute.xlu0 %743  ;;  %1546 = vmatmul.mubr.msk.f32.gmra.mxu1 %vm234_vm5, %v1540_v20  ;;  %584 = vmatprep.mubr.f32.mxu0 %v1645_v15 }
 0x112   : > { %v750_v24 = vsel %vm749_vm10, %v744_v22, %v746_v17  ;;  %717 = vmatprep.mubr.f32.mxu1 %v1645_v15 }
 0x113   : > { %1554 = vmatpush1.msk.msra.mxu0 %vm247_vm3, %v750_v24  ;;  %v885_v26 = vpop.permute.xlu1 %884 }
 0x114   : > { %1538 = vmatmul.mubr.msk.f32.gmra.mxu0 %vm234_vm5, %v1532_v23  ;;  %v889_v28 = vsel %vm888_vm11, %v883_v21, %v885_v26 }
 0x115   : > { %v887_v27 = vpop.permute.xlu0 %886  ;;  %1547 = vmatmul.mubr.msk.f32.gmra.mxu1 %vm234_vm5, %v1541_v25  ;;  %832 = vmatprep.mubr.f32.mxu0 %v1645_v15 }
 0x116   : > { %v890_v30 = vsel %vm888_vm11, %v885_v26, %v887_v27  ;;  %723 = vmatprep.mubr.f32.mxu1 %v1645_v15 }
 0x117   : > { %1563 = vmatprep.subr.msk.mxu1 %vm247_vm3, %v890_v30  ;;  %v1026_v32 = vpop.permute.xlu1 %1025 }
 0x118   : > { %1555 = vmatmul.mubr.msk.f32.vlgmr.msra.gmra.mxu0 %vm234_vm5, %v1549_v29  ;;  %1564 = vmatpush1.msk.msra.mxu1 %vm247_vm3, %v889_v28 }
 0x119   : > { %v1024_v33 = vpop.permute.xlu0 %1023  ;;  %1548 = vmatmul.mubr.msk.f32.gmra.mxu1 %vm234_vm5, %v1542_v31  ;;  %838 = vmatprep.mubr.f32.mxu0 %v1645_v15 }
 0x11a   : > { %v1029_v35 = vsel %vm1027_vm12, %v1024_v33, %v1026_v32  ;;  %971 = vmatprep.mubr.f32.mxu1 %v1645_v15 }
 0x11b   : > { %1573 = vmatprep.subr.msk.mxu0 %vm247_vm3, %v1029_v35  ;;  %v1151_v37 = vpop.permute.xlu1 %1150 }
 0x11c   : > { %1556 = vmatmul.mubr.msk.f32.gmra.mxu0 %vm234_vm5, %v1550_v34 }
 0x11d   : > { %v1022_v38 = vpop.permute.xlu0 %1021  ;;  %1565 = vmatmul.mubr.msk.f32.vlgmr.msra.gmra.mxu1 %vm234_vm5, %v1559_v36  ;;  %844 = vmatprep.mubr.f32.mxu0 %v1645_v15 }
 0x11e   : > { %v1028_v40 = vsel %vm1027_vm12, %v1022_v38, %v1024_v33  ;;  %977 = vmatprep.mubr.f32.mxu1 %v1645_v15 }
 0x11f   : > { %1574 = vmatpush1.msk.msra.mxu0 %vm247_vm3, %v1028_v40  ;;  %v1149_v42 = vpop.permute.xlu1 %1148 }
 0x120   : > { %1557 = vmatmul.mubr.msk.f32.gmra.mxu0 %vm234_vm5, %v1551_v39  ;;  %v1155_v45 = vsel %vm1154_vm13, %v1149_v42, %v1151_v37 }
 0x121   : > { %v1153_v43 = vpop.permute.xlu0 %1152  ;;  %1566 = vmatmul.mubr.msk.f32.gmra.mxu1 %vm234_vm5, %v1560_v41  ;;  %850 = vmatprep.mubr.f32.mxu0 %v1645_v15 }
 0x122   : > { %v1156_v46 = vsel %vm1154_vm13, %v1151_v37, %v1153_v43  ;;  %983 = vmatprep.mubr.f32.mxu1 %v1645_v15 }
 0x123   : > { %v1292_v48 = vpop.permute.xlu1 %1291  ;;  %1583 = vmatprep.subr.msk.mxu1 %vm247_vm3, %v1156_v46 }
 0x124   : > { %1558 = vmatmul.mubr.msk.f32.gmra.mxu0 %vm234_vm5, %v1552_v44  ;;  %1584 = vmatpush1.msk.msra.mxu1 %vm247_vm3, %v1155_v45 }
 0x125   : > { %v1290_v49 = vpop.permute.xlu0 %1289  ;;  %1567 = vmatmul.mubr.msk.f32.gmra.mxu1 %vm234_vm5, %v1561_v47  ;;  %1110 = vmatprep.mubr.f32.mxu0 %v1645_v15 }
 0x126   : > { %v1295_v51 = vsel %vm1293_vm14, %v1290_v49, %v1292_v48  ;;  %989 = vmatprep.mubr.f32.mxu1 %v1645_v15 }
 0x127   : > { %1593 = vmatprep.subr.msk.mxu0 %vm247_vm3, %v1295_v51 }
 0x128   : > { %1575 = vmatmul.mubr.msk.f32.vlgmr.msra.gmra.mxu0 %vm234_vm5, %v1569_v50 }
 0x129   : > { %v1288_v53 = vpop.permute.xlu0 %1287  ;;  %1568 = vmatmul.mubr.msk.f32.gmra.mxu1 %vm234_vm5, %v1562_v52  ;;  %1116 = vmatprep.mubr.f32.mxu0 %v1645_v15 }
 0x12a   : > { %v1294_v55 = vsel %vm1293_vm14, %v1288_v53, %v1290_v49  ;;  %1237 = vmatprep.mubr.f32.mxu1 %v1645_v15 }
 0x12b   : > { %1594 = vmatpush1.msk.msra.mxu0 %vm247_vm3, %v1294_v55 }
 0x12c   : > { %1576 = vmatmul.mubr.msk.f32.gmra.mxu0 %vm234_vm5, %v1570_v54 }
 0x12d   : > { %1585 = vmatmul.mubr.msk.f32.vlgmr.msra.gmra.mxu1 %vm234_vm5, %v1579_v56  ;;  %1122 = vmatprep.mubr.f32.mxu0 %v1645_v15 }
 0x12e   : > { %1243 = vmatprep.mubr.f32.mxu1 %v1645_v15 }
 0x130   : > { %1577 = vmatmul.mubr.msk.f32.gmra.mxu0 %vm234_vm5, %v1571_v57 }
 0x131   : > { %1586 = vmatmul.mubr.msk.f32.gmra.mxu1 %vm234_vm5, %v1580_v58  ;;  %1128 = vmatprep.mubr.f32.mxu0 %v1645_v15 }
 0x132   : > { %1249 = vmatprep.mubr.f32.mxu1 %v1645_v15 }
 0x134   : > { %1578 = vmatmul.mubr.msk.f32.gmra.mxu0 %vm234_vm5, %v1572_v59 }
 0x135   : > { %1587 = vmatmul.mubr.msk.f32.gmra.mxu1 %vm234_vm5, %v1581_v60  ;;  %1376 = vmatprep.mubr.f32.mxu0 %v1645_v15 }
 0x136   : > { %1255 = vmatprep.mubr.f32.mxu1 %v1645_v15 }
 0x138   : > { %1595 = vmatmul.mubr.msk.f32.vlgmr.msra.gmra.mxu0 %vm234_vm5, %v1589_v61 }
 0x139   : > { %1588 = vmatmul.mubr.msk.f32.gmra.mxu1 %vm234_vm5, %v1582_v62  ;;  %1382 = vmatprep.mubr.f32.mxu0 %v1645_v15 }
 0x13c   : > { %1596 = vmatmul.mubr.msk.f32.gmra.mxu0 %vm234_vm5, %v1590_v63 }
 0x13d   : > { %1388 = vmatprep.mubr.f32.mxu0 %v1645_v15 }
 0x140   : > { %1597 = vmatmul.mubr.msk.f32.gmra.mxu0 %vm234_vm5, %v1591_v0 }
 0x141   : > { %1394 = vmatprep.mubr.f32.mxu0 %v1645_v15 }
 0x144   : > { %1598 = vmatmul.mubr.msk.f32.gmra.mxu0 %vm234_vm5, %v1592_v1 }
 0x157   : > { %v1957_v2 = vpop.f32.mrf.mxu1 }
 0x159   : > { %v1959_v3 = vpop.f32.mrf.mxu1 }
 0x15b   : > { %v1961_v4 = vpop.f32.mrf.mxu1 }
 0x15c   : > { %v318_v9 = vpop.f32.mrf.mxu0 }
 0x15d   : > { %v1963_v5 = vpop.f32.mrf.mxu1 }
 0x15e   : > { %v320_v15 = vpop.f32.mrf.mxu0 }
 0x15f   : > { %v425_v6 = vpop.f32.mrf.mxu1 }
 0x160   : > { %v324_v12 = vpop.f32.mrf.mxu0  ;;  %v426_v51 = vadd.f32 %v425_v6, %v318_v9 }
 0x161   : > { %v427_v7 = vpop.f32.mrf.mxu1 }
 0x162   : > { %v326_v14 = vpop.f32.mrf.mxu0  ;;  %v428_v54 = vadd.f32 %v427_v7, %v320_v15 }
 0x163   : > { %v431_v8 = vpop.f32.mrf.mxu1 }
 0x164   : > { %v432_v58 = vadd.f32 %v431_v8, %v324_v12 }
 0x165   : > { %v433_v10 = vpop.f32.mrf.mxu1 }
 0x166   : > { %v434_v63 = vadd.f32 %v433_v10, %v326_v14 }
 0x167   : > { %v437_v11 = vpop.f32.mrf.mxu1 }
 0x169   : > { %v439_v13 = vpop.f32.mrf.mxu1 }
 0x16b   : > { %v1965_v16 = vpop.f32.mrf.mxu1 }
 0x16d   : > { %v1967_v19 = vpop.f32.mrf.mxu1 }
 0x1c8   : > { %v568_v17 = vpop.f32.mrf.mxu0 }
 0x1c9   : > { %v591_v55 = vadd.f32 %v568_v17, %v426_v51  ;;  %v440_v17 = vadd.f32 %v439_v13, %v1959_v3  ;;  %v446_v3 = vadd.f32 %v1967_v19, %v1963_v5 }
 0x1ca   : > { %v570_v18 = vpop.f32.mrf.mxu0 }
 0x1cb   : > { %v592_v59 = vadd.f32 %v570_v18, %v428_v54 }
 0x1cc   : > { %v574_v20 = vpop.f32.mrf.mxu0 }
 0x1cd   : > { %v707_v21 = vpop.f32.mrf.mxu1  ;;  %v593_v0 = vadd.f32 %v574_v20, %v432_v58  ;;  %v444_v20 = vadd.f32 %v1965_v16, %v1961_v4 }
 0x1ce   : > { %v576_v22 = vpop.f32.mrf.mxu0  ;;  %v730_v60 = vadd.f32 %v707_v21, %v591_v55 }
 0x1cf   : > { %v709_v23 = vpop.f32.mrf.mxu1  ;;  %v594_v9 = vadd.f32 %v576_v22, %v434_v63 }
 0x1d0   : > { %v580_v24 = vpop.f32.mrf.mxu0  ;;  %v731_v1 = vadd.f32 %v709_v23, %v592_v59 }
 0x1d1   : > { %v713_v25 = vpop.f32.mrf.mxu1 }
 0x1d2   : > { %v582_v26 = vpop.f32.mrf.mxu0 }
 0x1d3   : > { %v715_v27 = vpop.f32.mrf.mxu1  ;;  %v596_v23 = vadd.f32 %v582_v26, %v440_v17 }
 0x1d4   : > { %v1969_v28 = vpop.f32.mrf.mxu0  ;;  %v733_v18 = vadd.f32 %v715_v27, %v594_v9 }
 0x1d5   : > { %v719_v29 = vpop.f32.mrf.mxu1  ;;  %v597_v13 = vadd.f32 %v1969_v28, %v444_v20 }
 0x1d6   : > { %v1971_v30 = vpop.f32.mrf.mxu0 }
 0x1d7   : > { %v1973_v31 = vpop.f32.mrf.mxu1 }
 0x1d8   : > { %v834_v32 = vpop.f32.mrf.mxu0 }
 0x1d9   : > { %v1975_v33 = vpop.f32.mrf.mxu1 }
 0x1da   : > { %v836_v34 = vpop.f32.mrf.mxu0 }
 0x1db   : > { %v1977_v35 = vpop.f32.mrf.mxu1 }
 0x1dc   : > { %v840_v36 = vpop.f32.mrf.mxu0 }
 0x1dd   : > { %v973_v37 = vpop.f32.mrf.mxu1 }
 0x1de   : > { %v842_v38 = vpop.f32.mrf.mxu0 }
 0x1df   : > { %v975_v39 = vpop.f32.mrf.mxu1 }
 0x1e0   : > { %v846_v40 = vpop.f32.mrf.mxu0 }
 0x1e1   : > { %v979_v41 = vpop.f32.mrf.mxu1 }
 0x1e2   : > { %v848_v42 = vpop.f32.mrf.mxu0 }
 0x1e3   : > { %v981_v43 = vpop.f32.mrf.mxu1 }
 0x1e4   : > { %v1979_v44 = vpop.f32.mrf.mxu0 }
 0x1e5   : > { %2027 = vst [vmem:[#allocation2_spill] sm:$0xff] %v1979_v44  ;;  %v985_v45 = vpop.f32.mrf.mxu1  ;;  %v858_v44 = vadd.f32 %v836_v34, %v731_v1 }
 0x1e6   : > { %v1981_v46 = vpop.f32.mrf.mxu0 }
 0x1e7   : > { %2028 = vst [vmem:[#allocation3_spill] sm:$0xff] %v1981_v46  ;;  %v1983_v47 = vpop.f32.mrf.mxu1  ;;  %v857_v46 = vadd.f32 %v834_v32, %v730_v60  ;;  %v997_v10 = vadd.f32 %v975_v39, %v858_v44 }
 0x1e8   : > { %2029 = vst [vmem:[#allocation4_spill] sm:$0xff] %v1983_v47  ;;  %v1112_v48 = vpop.f32.mrf.mxu0 }
 0x1e9   : > { %v1985_v49 = vpop.f32.mrf.mxu1  ;;  %v996_v7 = vadd.f32 %v973_v37, %v857_v46 }
 0x1ea   : > { %2030 = vst [vmem:[#allocation5_spill] sm:$0xff] %v1985_v49  ;;  %v1114_v50 = vpop.f32.mrf.mxu0  ;;  %v438_v49 = vadd.f32 %v437_v11, %v1957_v2 }
 0x1eb   : > { %v1987_v52 = vpop.f32.mrf.mxu1  ;;  %v1135_v14 = vadd.f32 %v1112_v48, %v996_v7  ;;  %v1136_v34 = vadd.f32 %v1114_v50, %v997_v10  ;;  %v1421_v50 = vpop.permute.xlu0 %1420 }
 0x1ec   : > { %2031 = vst [vmem:[#allocation6_spill] sm:$0xff] %v1987_v52  ;;  %v1118_v53 = vpop.f32.mrf.mxu0  ;;  %v732_v52 = vadd.f32 %v713_v25, %v593_v0  ;;  %v595_v8 = vadd.f32 %v580_v24, %v438_v49  ;;  %v860_v25 = vadd.f32 %v842_v38, %v733_v18  ;;  %v735_v24 = vadd.f32 %v1973_v31, %v596_v23 }
 0x1ed   : > { %v1239_v56 = vpop.f32.mrf.mxu1  ;;  %v598_v38 = vadd.f32 %v1971_v30, %v446_v3 }
 0x1ee   : > { %v1120_v57 = vpop.f32.mrf.mxu0  ;;  %v859_v21 = vadd.f32 %v840_v36, %v732_v52  ;;  %v734_v2 = vadd.f32 %v719_v29, %v595_v8  ;;  %v1262_v37 = vadd.f32 %v1239_v56, %v1135_v14  ;;  %v999_v39 = vadd.f32 %v981_v43, %v860_v25  ;;  %v1416_v29 = vpop.permute.xlu1 %1415  ;;  %v2032_v43 = vld [vmem:[#allocation2_spill] sm:$0xff]  ;;  %v2034_v55 = vld [vmem:[#allocation3_spill] sm:$0xff] }
 0x1ef   : > { %v1241_v61 = vpop.f32.mrf.mxu1  ;;  %v862_v44 = vadd.f32 %v848_v42, %v735_v24 }
 0x1f0   : > { %v1124_v62 = vpop.f32.mrf.mxu0  ;;  %v998_v32 = vadd.f32 %v979_v41, %v859_v21  ;;  %v861_v27 = vadd.f32 %v846_v40, %v734_v2  ;;  %v1263_v16 = vadd.f32 %v1241_v61, %v1136_v34  ;;  %v736_v41 = vadd.f32 %v1975_v33, %v597_v13  ;;  %v2033_v33 = vld [vmem:[#allocation4_spill] sm:$0xff] }
 0x1f1   : > { %v1245_v47 = vpop.f32.mrf.mxu1  ;;  %v1138_v5 = vadd.f32 %v1120_v57, %v999_v39  ;;  %v737_v40 = vadd.f32 %v1977_v35, %v598_v38  ;;  %v1001_v42 = vadd.f32 %v2033_v33, %v862_v44 }
 0x1f2   : > { %v1126_v6 = vpop.f32.mrf.mxu0  ;;  %v1137_v4 = vadd.f32 %v1118_v53, %v998_v32  ;;  %v1000_v46 = vadd.f32 %v985_v45, %v861_v27  ;;  %v863_v30 = vadd.f32 %v2032_v43, %v736_v41  ;;  %v1426_v9 = vpop.permute.xlu1 %1425 }
 0x1f3   : > { %v1247_v15 = vpop.f32.mrf.mxu1  ;;  %v864_v56 = vadd.f32 %v2034_v55, %v737_v40  ;;  %v1140_v35 = vadd.f32 %v1126_v6, %v1001_v42  ;;  %v2036_v0 = vld [vmem:[#allocation6_spill] sm:$0xff] }
 0x1f4   : > { %v1130_v12 = vpop.f32.mrf.mxu0  ;;  %v1264_v19 = vadd.f32 %v1245_v47, %v1137_v4  ;;  %v1139_v51 = vadd.f32 %v1124_v62, %v1000_v46  ;;  %v1265_v52 = vadd.f32 %v1247_v15, %v1138_v5  ;;  %v2035_v47 = vld [vmem:[#allocation5_spill] sm:$0xff] }
 0x1f5   : > { %v1251_v11 = vpop.f32.mrf.mxu1  ;;  %v1002_v57 = vadd.f32 %v2035_v47, %v863_v30  ;;  %v1003_v1 = vadd.f32 %v2036_v0, %v864_v56 }
 0x1f6   : > { %v1132_v22 = vpop.f32.mrf.mxu0  ;;  %v1266_v60 = vadd.f32 %v1251_v11, %v1139_v51  ;;  %v1431_v32 = vpop.permute.xlu1 %1430 }
 0x1f7   : > { %v1253_v48 = vpop.f32.mrf.mxu1  ;;  %v1141_v7 = vadd.f32 %v1130_v12, %v1002_v57  ;;  %v1142_v10 = vadd.f32 %v1132_v22, %v1003_v1 }
 0x1f8   : > { %v1378_v36 = vpop.f32.mrf.mxu0  ;;  %v1267_v15 = vadd.f32 %v1253_v48, %v1140_v35 }
 0x1f9   : > { %v1401_v26 = vadd.f32 %v1378_v36, %v1262_v37  ;;  %v1257_v58 = vpop.f32.mrf.mxu1 }
 0x1fa   : > { %v1380_v49 = vpop.f32.mrf.mxu0  ;;  %v1268_v6 = vadd.f32 %v1257_v58, %v1141_v7 }
 0x1fb   : > { %v1402_v28 = vadd.f32 %v1380_v49, %v1263_v16  ;;  %v1433_v31 = vadd.f32 %v1416_v29, %v1401_v26  ;;  %v1259_v18 = vpop.f32.mrf.mxu1 }
 0x1fc   : > { %v1384_v45 = vpop.f32.mrf.mxu0  ;;  %v1269_v2 = vadd.f32 %v1259_v18, %v1142_v10 }
 0x1fd   : > { %v1434_v53 = vadd.f32 %v1416_v29, %v1402_v28  ;;  %1441 = vst [vmem:[%s2003_s24] sm:$0xff] %v1433_v31  ;;  %v1403_v54 = vadd.f32 %v1384_v45, %v1264_v19 }
 0x1fe   : > { %v1386_v59 = vpop.f32.mrf.mxu0 }
 0x1ff   : > { %1442 = vst [vmem:[%s2003_s24 + $0x8] sm:$0xff] %v1434_v53  ;;  %v1435_v61 = vadd.f32 %v1421_v50, %v1403_v54  ;;  %v1404_v63 = vadd.f32 %v1386_v59, %v1265_v52 }
 0x200   : > { %v1390_v62 = vpop.f32.mrf.mxu0 }
 0x201   : > { %1443 = vst [vmem:[%s2003_s24 + $0x10] sm:$0xff] %v1435_v61  ;;  %v1436_v17 = vadd.f32 %v1421_v50, %v1404_v63  ;;  %v1405_v8 = vadd.f32 %v1390_v62, %v1266_v60 }
 0x202   : > { %v1392_v21 = vpop.f32.mrf.mxu0 }
 0x203   : > { %1444 = vst [vmem:[%s2003_s24 + $0x18] sm:$0xff] %v1436_v17  ;;  %v1406_v14 = vadd.f32 %v1392_v21, %v1267_v15  ;;  %v1437_v20 = vadd.f32 %v1426_v9, %v1405_v8 }
 0x204   : > { %v1396_v23 = vpop.f32.mrf.mxu0 }
 0x205   : > { %v1438_v11 = vadd.f32 %v1426_v9, %v1406_v14  ;;  %1445 = vst [vmem:[%s2003_s24 + $0x20] sm:$0xff] %v1437_v20  ;;  %v1407_v25 = vadd.f32 %v1396_v23, %v1268_v6 }
 0x206   : > { %v1398_v12 = vpop.f32.mrf.mxu0 }
 0x207   : > { %1446 = vst [vmem:[%s2003_s24 + $0x28] sm:$0xff] %v1438_v11  ;;  %v1408_v34 = vadd.f32 %v1398_v12, %v1269_v2  ;;  %v1439_v37 = vadd.f32 %v1431_v32, %v1407_v25 }
 0x209   : > { %v1440_v3 = vadd.f32 %v1431_v32, %v1408_v34  ;;  %1447 = vst [vmem:[%s2003_s24 + $0x30] sm:$0x7] %v1439_v37 }
 0x20b   : > { %1448 = vst [vmem:[%s2003_s24 + $0x38] sm:$0x7] %v1440_v3 }
 0x20c PF: > { %s14_s15 = sadd.s32 1, %s1637_s15  }
 0x20d   : > { %p11_p4 = scmp.ge.s32.totalorder %s14_s15, 4  }
 0x20f   :  { %13 = sbr.rel (!%p11_p4) target bundleno = 1 (0x1), region = 75 }

// kernel: deform_conv2d_forward.4
= control target key start
LH: loop header
LB: loop body
LE: loop exit
PB: predicated region body
PF: predicated region fallthrough
CT: control target
= control target key end

     0   :  { %s3042_s9 = smov 0   ;;  %s3044_s10 = smov 0   ;;  %s4598_s0 = inlined_call_operand.vmem [shape: bf16[2,64,16], index: 0, kind: input, shape index: {}]   ;;  %s4599_s1 = inlined_call_operand.vmem [shape: f32[2,27,256], index: 1, kind: input, shape index: {}]   ;;  %s4600_s2 = inlined_call_operand.vmem [shape: f32[2,4,256], index: 2, kind: output, shape index: {}]  }
   0x1   :  { %s3046_s11 = smov 0  }
   0x2 LB: > { %s24_s12 = sadd.s32 1, %s3020_s10  ;;  %p2893_p0 = scmp.ge.s32.totalorder %s3024_s11, 1  ;;  %s3024_s11 = sphi %s3046_s11, %s12_s11   ;;  %s3020_s10 = sphi %s3044_s10, %s4720_s10   ;;  %s3016_s9 = sphi %s3042_s9, %s4719_s9  }
   0x3   : > { %p26_p1 = scmp.ge.s32.totalorder %s24_s12, 2  ;;  %p143_p2 = scmp.lt.s32.totalorder %s3024_s11, 3 }
   0x5   : > { %s4722_s12 = smov (%p26_p1, %s24_s12), 0  ;;  %p144_p3 = pnand %p2893_p0, %p143_p2 }
   0x7   : > { %147 = sbr.rel (%p144_p3) target bundleno = 450 (0x1c2), region = 28 }
   0xc   : > { %p178_p4 = scmp.lt.s32.totalorder %s3016_s9, 1  ;;  %v3026_v0 = vmov 0   ;;  %v220_v1 = vlaneseq  ;;  %vm407_vm6 = vcmask 130048  }
   0xd   : > { %452 = vmatprep.mubr.bf16.mxu0 %v3026_v0  ;;  %472 = vmatprep.mubr.bf16.mxu1 %v3026_v0 }
   0xe   : > { %s4724_s9 = smov (!%p178_p4, %s3016_s9), 1  ;;  %v221_v4 = vshrl.u32 %v220_v1, 7 }
   0xf   : > { %s2953_s13 = sshll.u32 %s4724_s9, 6  ;;  %s2952_s14 = sshll.u32 %s4724_s9, 5 }
  0x10   : > { %s3069_s17 = scalar_lea.vmem %s4599_s1, %s2953_s13  ;;  %s3074_s20 = scalar_lea.vmem %s4598_s0, %s2952_s14  ;;  %v222_v10 = vadd.s32 8, %v221_v4  ;;  %v3079_v14 = vcvt.s32.f32 %v221_v4  ;;  %v3081_v16 = vsub.s32 0, %v221_v4  ;;  %v3084_v19 = vsub.s32 1, %v221_v4 }
  0x11   : > { %v213_v2 = vld [vmem:[%s3069_s17 + $0x8] sm:$0xff]  ;;  %v212_v3 = vld [vmem:[%s3069_s17] sm:$0xff]  ;;  %v215_v9 = vld [vmem:[%s3069_s17 + $0x18] sm:$0xff]  ;;  %v3086_v20 = vsub.s32 2, %v221_v4  ;;  %v3088_v21 = vsub.s32 3, %v221_v4  ;;  %v3090_v22 = vsub.s32 4, %v221_v4 }
  0x12   : > { %v238_v5 = vadd.f32 1.0, %v213_v2  ;;  %v237_v6 = vadd.f32 1.0, %v212_v3  ;;  %v246_v13 = vadd.f32 1.0, %v215_v9  ;;  %4642 = vst [vmem:[#allocation2_spill] sm:$0xff] %v3079_v14  ;;  %4643 = vst [vmem:[#allocation3_spill] sm:$0xff] %v3081_v16  ;;  %v214_v18 = vld [vmem:[%s3069_s17 + $0x10] sm:$0xff]  ;;  %v3092_v23 = vcvt.s32.f32 %v222_v10 }
  0x13   : > { %4644 = vst [vmem:[#allocation4_spill] sm:$0xff] %v3084_v19  ;;  %4645 = vst [vmem:[#allocation5_spill] sm:$0xff] %v3086_v20  ;;  %v3098_v26 = vsub.s32 5, %v221_v4  ;;  %v3100_v27 = vsub.s32 6, %v221_v4  ;;  %v3102_v28 = vsub.s32 7, %v221_v4  ;;  %v3106_v30 = vadd.f32 1.0, %v214_v18 }
  0x14   : > { %v240_v7 = vmul.f32 16.0, %v238_v5  ;;  %v239_v8 = vmul.f32 16.0, %v237_v6  ;;  %4646 = vst [vmem:[#allocation6_spill] sm:$0xff] %v3092_v23  ;;  %v3104_v29 = vmul.f32 16.0, %v246_v13  ;;  %v3175_v4 = vld [vmem:[%s3074_s20] sm:$0xff]   ;;  %v3178_v5 = vld [vmem:[%s3074_s20 + $0x10] sm:$0xff]  }
  0x15   : > { %s2954_s21 = sshll.u32 %s4724_s9, 3 }
  0x16   : > { %v2903_v11 = vadd.f32 -1.0, %v240_v7  ;;  %v2902_v12 = vadd.f32 -1.0, %v239_v8  ;;  %s201_s24 = scalar_lea.vmem %s4600_s2, %s2954_s21 }
  0x18   : > { %v244_v15 = vmul.f32 0.5, %v2903_v11  ;;  %v243_v17 = vmul.f32 0.5, %v2902_v12 }
  0x1a   : > { %v3094_v24 = vfloor.f32 %v244_v15  ;;  %v3096_v25 = vfloor.f32 %v243_v17 }
  0x1c   : > { %v3109_v31 = vsub.f32 %v244_v15, %v3094_v24  ;;  %v272_v32 = vrot.slane %v3094_v24, %v3081_v16  ;;  %v3114_v33 = vadd.f32 1.0, %v3094_v24  ;;  %v3117_v34 = vsub.f32 %v243_v17, %v3096_v25 }
  0x1d   : > { %v268_v35 = vrot.slane %v3096_v25, %v3081_v16  ;;  %v3122_v36 = vadd.f32 1.0, %v3096_v25  ;;  %v572_v37 = vrot.slane %v3094_v24, %v3084_v19  ;;  %v568_v38 = vrot.slane %v3096_v25, %v3084_v19 }
  0x1e   : > { %v3129_v39 = vsub.f32 1.0, %v3109_v31  ;;  %vm274_vm0 = vcmp.eq.f32.partialorder %v3079_v14, %v272_v32  ;;  %vm276_vm1 = vcmp.eq.f32.partialorder %v3092_v23, %v272_v32  ;;  %v298_v40 = vrot.slane %v3114_v33, %v3081_v16 }
  0x1f   : > { %v310_v41 = vrot.slane %v3109_v31, %v3081_v16  ;;  %v3138_v42 = vsub.f32 1.0, %v3117_v34  ;;  %vm273_vm2 = vcmp.eq.f32.partialorder %v3079_v14, %v268_v35  ;;  %vm275_vm3 = vcmp.eq.f32.partialorder %v3092_v23, %v268_v35 }
  0x20   : > { %v284_v43 = vrot.slane %v3129_v39, %v3081_v16  ;;  %vm300_vm4 = vcmp.eq.f32.partialorder %v3079_v14, %v298_v40  ;;  %vm302_vm5 = vcmp.eq.f32.partialorder %v3092_v23, %v298_v40  ;;  %v294_v44 = vrot.slane %v3122_v36, %v3081_v16 }
  0x21   : > { %v312_v45 = vsel %vm300_vm4, %v310_v41, 0.0  ;;  %v314_v46 = vsel %vm302_vm5, %v310_v41, 0.0  ;;  %v280_v47 = vrot.slane %v3138_v42, %v3081_v16  ;;  %v306_v48 = vrot.slane %v3117_v34, %v3081_v16 }
  0x22   : > { %v286_v49 = vsel %vm274_vm0, %v284_v43, 0.0  ;;  %v288_v50 = vsel %vm276_vm1, %v284_v43, 0.0  ;;  %vm299_vm7 = vcmp.eq.f32.partialorder %v3079_v14, %v294_v44  ;;  %vm301_vm8 = vcmp.eq.f32.partialorder %v3092_v23, %v294_v44 }
  0x23   : > { %v316_v51 = vadd.f32 %v312_v45, %v286_v49  ;;  %v318_v52 = vadd.f32 %v314_v46, %v288_v50  ;;  %v285_v53 = vsel %vm273_vm2, %v280_v47, 0.0  ;;  %v287_v54 = vsel %vm275_vm3, %v280_v47, 0.0 }
  0x24   : > { %v311_v55 = vsel %vm299_vm7, %v306_v48, 0.0  ;;  %v313_v56 = vsel %vm301_vm8, %v306_v48, 0.0  ;;  %vm574_vm9 = vcmp.eq.f32.partialorder %v3079_v14, %v572_v37  ;;  %vm576_vm10 = vcmp.eq.f32.partialorder %v3092_v23, %v572_v37 }
  0x25   : > { %v386_v57 = vpack.c.bf16 %v318_v52, %v316_v51  ;;  %v315_v58 = vadd.f32 %v311_v55, %v285_v53  ;;  %v317_v59 = vadd.f32 %v313_v56, %v287_v54  ;;  %v584_v60 = vrot.slane %v3129_v39, %v3084_v19  ;;  %v3222_v51 = vld [vmem:[%s3074_s20 + $0x8] sm:$0xff]   ;;  %v3225_v52 = vld [vmem:[%s3074_s20 + $0x18] sm:$0xff]  }
  0x26   : > { %v596_v61 = vrot.slane %v3114_v33, %v3084_v19  ;;  %v608_v62 = vrot.slane %v3109_v31, %v3084_v19  ;;  %vm573_vm11 = vcmp.eq.f32.partialorder %v3079_v14, %v568_v38  ;;  %vm575_vm12 = vcmp.eq.f32.partialorder %v3092_v23, %v568_v38 }
  0x27   : > { %434 = vmatprep.subr.bf16.mxu0 %v386_v57  ;;  %2955 = vmatprep.subr.bf16.mxu1 %v386_v57  ;;  %v385_v63 = vpack.c.bf16 %v317_v59, %v315_v58  ;;  %v586_v1 = vsel %vm574_vm9, %v584_v60, 0.0  ;;  %v588_v2 = vsel %vm576_vm10, %v584_v60, 0.0  ;;  %v580_v3 = vrot.slane %v3138_v42, %v3084_v19 }
  0x28   : > { %vm598_vm13 = vcmp.eq.f32.partialorder %v3079_v14, %v596_v61  ;;  %vm600_vm14 = vcmp.eq.f32.partialorder %v3092_v23, %v596_v61  ;;  %v592_v6 = vrot.slane %v3122_v36, %v3084_v19  ;;  %v604_v7 = vrot.slane %v3117_v34, %v3084_v19 }
  0x29   : > { %435 = vmatpush1.bf16.msra.mxu0 %v385_v63  ;;  %2956 = vmatpush1.bf16.msra.mxu1 %v385_v63  ;;  %v610_v8 = vsel %vm598_vm13, %v608_v62, 0.0  ;;  %v612_v9 = vsel %vm600_vm14, %v608_v62, 0.0  ;;  %v585_v10 = vsel %vm573_vm11, %v580_v3, 0.0  ;;  %v587_v11 = vsel %vm575_vm12, %v580_v3, 0.0 }
  0x2a   : > { %v614_v12 = vadd.f32 %v610_v8, %v586_v1  ;;  %v616_v13 = vadd.f32 %v612_v9, %v588_v2  ;;  %vm597_vm15 = vcmp.eq.f32.partialorder %v3079_v14, %v592_v6  ;;  %vm599_vm0 = vcmp.eq.f32.partialorder %v3092_v23, %v592_v6 }
  0x2b   : > { %v609_v15 = vsel %vm597_vm15, %v604_v7, 0.0  ;;  %v611_v17 = vsel %vm599_vm0, %v604_v7, 0.0  ;;  %v843_v18 = vrot.slane %v3094_v24, %v3086_v20  ;;  %v855_v32 = vrot.slane %v3129_v39, %v3086_v20 }
  0x2c   : > { %2910 = vmatmul.mubr.msk.bf16.vlgmr.msra.gmra.mxu0 %vm407_vm6, %v3175_v4  ;;  %2912 = vmatmul.mubr.msk.bf16.vlgmr.msra.gmra.mxu1 %vm407_vm6, %v3178_v5  ;;  %v682_v35 = vpack.c.bf16 %v616_v13, %v614_v12  ;;  %v613_v37 = vadd.f32 %v609_v15, %v585_v10  ;;  %v615_v38 = vadd.f32 %v611_v17, %v587_v11  ;;  %v3201_v40 = vadd.f32 -1.0, %v3104_v29 }
  0x2d   : > { %vm845_vm1 = vcmp.eq.f32.partialorder %v3079_v14, %v843_v18  ;;  %vm847_vm2 = vcmp.eq.f32.partialorder %v3092_v23, %v843_v18  ;;  %v867_v41 = vrot.slane %v3114_v33, %v3086_v20  ;;  %v879_v43 = vrot.slane %v3109_v31, %v3086_v20  ;;  %462 = vmatprep.mubr.bf16.mxu0 %v3026_v0 }
  0x2e   : > { %697 = vmatprep.subr.bf16.mxu1 %v682_v35  ;;  %v681_v44 = vpack.c.bf16 %v615_v38, %v613_v37  ;;  %v857_v45 = vsel %vm845_vm1, %v855_v32, 0.0  ;;  %v859_v46 = vsel %vm847_vm2, %v855_v32, 0.0  ;;  %v839_v29 = vrot.slane %v3096_v25, %v3086_v20  ;;  %482 = vmatprep.mubr.bf16.mxu1 %v3026_v0 }
  0x2f   : > { %vm869_vm3 = vcmp.eq.f32.partialorder %v3079_v14, %v867_v41  ;;  %vm871_vm4 = vcmp.eq.f32.partialorder %v3092_v23, %v867_v41  ;;  %v851_v47 = vrot.slane %v3138_v42, %v3086_v20  ;;  %v863_v48 = vrot.slane %v3122_v36, %v3086_v20 }
  0x30   : > { %698 = vmatpush1.bf16.msra.mxu1 %v681_v44  ;;  %v881_v49 = vsel %vm869_vm3, %v879_v43, 0.0  ;;  %v883_v50 = vsel %vm871_vm4, %v879_v43, 0.0  ;;  %vm844_vm5 = vcmp.eq.f32.partialorder %v3079_v14, %v839_v29  ;;  %vm846_vm7 = vcmp.eq.f32.partialorder %v3092_v23, %v839_v29 }
  0x31   : > { %v885_v53 = vadd.f32 %v881_v49, %v857_v45  ;;  %v887_v54 = vadd.f32 %v883_v50, %v859_v46  ;;  %v856_v55 = vsel %vm844_vm5, %v851_v47, 0.0  ;;  %v858_v56 = vsel %vm846_vm7, %v851_v47, 0.0 }
  0x32   : > { %vm868_vm8 = vcmp.eq.f32.partialorder %v3079_v14, %v863_v48  ;;  %vm870_vm9 = vcmp.eq.f32.partialorder %v3092_v23, %v863_v48  ;;  %v875_v57 = vrot.slane %v3117_v34, %v3086_v20  ;;  %v1114_v58 = vrot.slane %v3094_v24, %v3088_v21 }
  0x33   : > { %v953_v59 = vpack.c.bf16 %v887_v54, %v885_v53  ;;  %v1126_v60 = vrot.slane %v3129_v39, %v3088_v21  ;;  %v1138_v61 = vrot.slane %v3114_v33, %v3088_v21  ;;  %v1150_v62 = vrot.slane %v3109_v31, %v3088_v21 }
  0x34   : > { %v880_v63 = vsel %vm868_vm8, %v875_v57, 0.0  ;;  %v882_v1 = vsel %vm870_vm9, %v875_v57, 0.0  ;;  %2911 = vmatmul.mubr.msk.bf16.gmra.mxu0 %vm407_vm6, %v3222_v51  ;;  %2913 = vmatmul.mubr.msk.bf16.gmra.mxu1 %vm407_vm6, %v3225_v52  ;;  %vm1116_vm10 = vcmp.eq.f32.partialorder %v3079_v14, %v1114_v58  ;;  %vm1118_vm11 = vcmp.eq.f32.partialorder %v3092_v23, %v1114_v58 }
  0x35   : > { %968 = vmatprep.subr.bf16.mxu0 %v953_v59  ;;  %v884_v2 = vadd.f32 %v880_v63, %v856_v55  ;;  %v886_v3 = vadd.f32 %v882_v1, %v858_v56  ;;  %715 = vmatprep.mubr.bf16.mxu1 %v3026_v0  ;;  %v1128_v6 = vsel %vm1116_vm10, %v1126_v60, 0.0  ;;  %v1130_v7 = vsel %vm1118_vm11, %v1126_v60, 0.0 }
  0x36   : > { %986 = vmatprep.mubr.bf16.mxu0 %v3026_v0  ;;  %vm1140_vm12 = vcmp.eq.f32.partialorder %v3079_v14, %v1138_v61  ;;  %vm1142_vm13 = vcmp.eq.f32.partialorder %v3092_v23, %v1138_v61  ;;  %v1110_v8 = vrot.slane %v3096_v25, %v3088_v21  ;;  %v1122_v9 = vrot.slane %v3138_v42, %v3088_v21 }
  0x37   : > { %v952_v10 = vpack.c.bf16 %v886_v3, %v884_v2  ;;  %v1152_v11 = vsel %vm1140_vm12, %v1150_v62, 0.0  ;;  %v1154_v12 = vsel %vm1142_vm13, %v1150_v62, 0.0  ;;  %v1134_v13 = vrot.slane %v3122_v36, %v3088_v21 }
  0x38   : > { %v1156_v15 = vadd.f32 %v1152_v11, %v1128_v6  ;;  %v1158_v17 = vadd.f32 %v1154_v12, %v1130_v7  ;;  %vm1115_vm14 = vcmp.eq.f32.partialorder %v3079_v14, %v1110_v8  ;;  %vm1117_vm15 = vcmp.eq.f32.partialorder %v3092_v23, %v1110_v8 }
  0x39   : > { %969 = vmatpush1.bf16.msra.mxu0 %v952_v10  ;;  %v1127_v18 = vsel %vm1115_vm14, %v1122_v9, 0.0  ;;  %v1129_v32 = vsel %vm1117_vm15, %v1122_v9, 0.0  ;;  %vm1139_vm0 = vcmp.eq.f32.partialorder %v3079_v14, %v1134_v13  ;;  %vm1141_vm1 = vcmp.eq.f32.partialorder %v3092_v23, %v1134_v13 }
  0x3a   : > { %v1224_v35 = vpack.c.bf16 %v1158_v17, %v1156_v15  ;;  %v1146_v37 = vrot.slane %v3117_v34, %v3088_v21  ;;  %v1385_v38 = vrot.slane %v3094_v24, %v3090_v22  ;;  %v1397_v41 = vrot.slane %v3129_v39, %v3090_v22 }
  0x3b   : > { %v1409_v43 = vrot.slane %v3114_v33, %v3090_v22  ;;  %v1421_v44 = vrot.slane %v3109_v31, %v3090_v22  ;;  %v1381_v45 = vrot.slane %v3096_v25, %v3090_v22  ;;  %v1393_v46 = vrot.slane %v3138_v42, %v3090_v22 }
  0x3c   : > { %2914 = vmatmul.mubr.msk.bf16.vlgmr.msra.gmra.mxu1 %vm407_vm6, %v3175_v4  ;;  %2918 = vmatmul.mubr.msk.bf16.vlgmr.msra.gmra.mxu0 %vm407_vm6, %v3175_v4  ;;  %v1151_v29 = vsel %vm1139_vm0, %v1146_v37, 0.0  ;;  %v1153_v47 = vsel %vm1141_vm1, %v1146_v37, 0.0  ;;  %vm1387_vm2 = vcmp.eq.f32.partialorder %v3079_v14, %v1385_v38  ;;  %vm1389_vm3 = vcmp.eq.f32.partialorder %v3092_v23, %v1385_v38 }
  0x3d   : > { %1239 = vmatprep.subr.bf16.mxu1 %v1224_v35  ;;  %v1155_v48 = vadd.f32 %v1151_v29, %v1127_v18  ;;  %v1157_v49 = vadd.f32 %v1153_v47, %v1129_v32  ;;  %v1399_v50 = vsel %vm1387_vm2, %v1397_v41, 0.0  ;;  %v1401_v53 = vsel %vm1389_vm3, %v1397_v41, 0.0  ;;  %725 = vmatprep.mubr.bf16.mxu1 %v3026_v0 }
  0x3e   : > { %vm1411_vm4 = vcmp.eq.f32.partialorder %v3079_v14, %v1409_v43  ;;  %vm1413_vm5 = vcmp.eq.f32.partialorder %v3092_v23, %v1409_v43  ;;  %vm1386_vm7 = vcmp.eq.f32.partialorder %v3079_v14, %v1381_v45  ;;  %vm1388_vm8 = vcmp.eq.f32.partialorder %v3092_v23, %v1381_v45  ;;  %996 = vmatprep.mubr.bf16.mxu0 %v3026_v0 }
  0x3f   : > { %v1223_v54 = vpack.c.bf16 %v1157_v49, %v1155_v48  ;;  %v1423_v55 = vsel %vm1411_vm4, %v1421_v44, 0.0  ;;  %v1425_v56 = vsel %vm1413_vm5, %v1421_v44, 0.0  ;;  %v1398_v57 = vsel %vm1386_vm7, %v1393_v46, 0.0 }
  0x40   : > { %v1427_v58 = vadd.f32 %v1423_v55, %v1399_v50  ;;  %v1429_v59 = vadd.f32 %v1425_v56, %v1401_v53  ;;  %v1400_v60 = vsel %vm1388_vm8, %v1393_v46, 0.0  ;;  %v1405_v61 = vrot.slane %v3122_v36, %v3090_v22 }
  0x41   : > { %1240 = vmatpush1.bf16.msra.mxu1 %v1223_v54  ;;  %v1417_v62 = vrot.slane %v3117_v34, %v3090_v22  ;;  %v1656_v63 = vrot.slane %v3094_v24, %v3098_v26  ;;  %v1668_v1 = vrot.slane %v3129_v39, %v3098_v26  ;;  %v1680_v2 = vrot.slane %v3114_v33, %v3098_v26 }
  0x42   : > { %v1495_v3 = vpack.c.bf16 %v1429_v59, %v1427_v58  ;;  %vm1410_vm9 = vcmp.eq.f32.partialorder %v3079_v14, %v1405_v61  ;;  %vm1412_vm10 = vcmp.eq.f32.partialorder %v3092_v23, %v1405_v61  ;;  %v1692_v6 = vrot.slane %v3109_v31, %v3098_v26 }
  0x43   : > { %v1422_v7 = vsel %vm1410_vm9, %v1417_v62, 0.0  ;;  %v1424_v8 = vsel %vm1412_vm10, %v1417_v62, 0.0  ;;  %vm1658_vm11 = vcmp.eq.f32.partialorder %v3079_v14, %v1656_v63  ;;  %vm1660_vm12 = vcmp.eq.f32.partialorder %v3092_v23, %v1656_v63 }
  0x44   : > { %1510 = vmatprep.subr.bf16.mxu0 %v1495_v3  ;;  %v1426_v9 = vadd.f32 %v1422_v7, %v1398_v57  ;;  %v1428_v10 = vadd.f32 %v1424_v8, %v1400_v60  ;;  %2915 = vmatmul.mubr.msk.bf16.gmra.mxu1 %vm407_vm6, %v3222_v51  ;;  %v1670_v11 = vsel %vm1658_vm11, %v1668_v1, 0.0  ;;  %v1672_v12 = vsel %vm1660_vm12, %v1668_v1, 0.0 }
  0x45   : > { %2919 = vmatmul.mubr.msk.bf16.gmra.mxu0 %vm407_vm6, %v3222_v51  ;;  %735 = vmatprep.mubr.bf16.mxu1 %v3026_v0  ;;  %vm1682_vm13 = vcmp.eq.f32.partialorder %v3079_v14, %v1680_v2  ;;  %vm1684_vm14 = vcmp.eq.f32.partialorder %v3092_v23, %v1680_v2  ;;  %v1652_v13 = vrot.slane %v3096_v25, %v3098_v26  ;;  %v3311_v15 = vmul.f32 0.5, %v3201_v40 }
  0x46   : > { %v1494_v17 = vpack.c.bf16 %v1428_v10, %v1426_v9  ;;  %1006 = vmatprep.mubr.bf16.mxu0 %v3026_v0  ;;  %v1694_v18 = vsel %vm1682_vm13, %v1692_v6, 0.0  ;;  %v1696_v32 = vsel %vm1684_vm14, %v1692_v6, 0.0  ;;  %v1664_v35 = vrot.slane %v3138_v42, %v3098_v26 }
  0x47   : > { %v1698_v37 = vadd.f32 %v1694_v18, %v1670_v11  ;;  %v1700_v38 = vadd.f32 %v1696_v32, %v1672_v12  ;;  %vm1657_vm15 = vcmp.eq.f32.partialorder %v3079_v14, %v1652_v13  ;;  %vm1659_vm0 = vcmp.eq.f32.partialorder %v3092_v23, %v1652_v13 }
  0x48   : > { %1511 = vmatpush1.bf16.msra.mxu0 %v1494_v17  ;;  %v1669_v41 = vsel %vm1657_vm15, %v1664_v35, 0.0  ;;  %v1671_v43 = vsel %vm1659_vm0, %v1664_v35, 0.0  ;;  %v1676_v40 = vrot.slane %v3122_v36, %v3098_v26  ;;  %v1688_v44 = vrot.slane %v3117_v34, %v3098_v26 }
  0x49   : > { %v1766_v45 = vpack.c.bf16 %v1700_v38, %v1698_v37  ;;  %v1939_v46 = vrot.slane %v3094_v24, %v3100_v27  ;;  %v1951_v29 = vrot.slane %v3129_v39, %v3100_v27  ;;  %v1963_v47 = vrot.slane %v3114_v33, %v3100_v27 }
  0x4a   : > { %vm1681_vm1 = vcmp.eq.f32.partialorder %v3079_v14, %v1676_v40  ;;  %vm1683_vm2 = vcmp.eq.f32.partialorder %v3092_v23, %v1676_v40  ;;  %v1975_v48 = vrot.slane %v3109_v31, %v3100_v27  ;;  %v1935_v49 = vrot.slane %v3096_v25, %v3100_v27 }
  0x4b   : > { %1781 = vmatprep.subr.bf16.mxu1 %v1766_v45  ;;  %v1693_v50 = vsel %vm1681_vm1, %v1688_v44, 0.0  ;;  %v1695_v53 = vsel %vm1683_vm2, %v1688_v44, 0.0  ;;  %vm1941_vm3 = vcmp.eq.f32.partialorder %v3079_v14, %v1939_v46  ;;  %vm1943_vm4 = vcmp.eq.f32.partialorder %v3092_v23, %v1939_v46 }
  0x4c   : > { %2916 = vmatmul.mubr.msk.bf16.gmra.mxu1 %vm407_vm6, %v3178_v5  ;;  %v3338_v54 = vadd.f32 %v1693_v50, %v1669_v41  ;;  %v1953_v55 = vsel %vm1941_vm3, %v1951_v29, 0.0  ;;  %v1955_v56 = vsel %vm1943_vm4, %v1951_v29, 0.0  ;;  %v3341_v57 = vmul.f32 16.0, %v3106_v30 }
  0x4d   : > { %2920 = vmatmul.mubr.msk.bf16.gmra.mxu0 %vm407_vm6, %v3178_v5  ;;  %745 = vmatprep.mubr.bf16.mxu1 %v3026_v0  ;;  %v3346_v58 = vadd.f32 %v1695_v53, %v1671_v43  ;;  %vm1965_vm5 = vcmp.eq.f32.partialorder %v3079_v14, %v1963_v47  ;;  %vm1967_vm7 = vcmp.eq.f32.partialorder %v3092_v23, %v1963_v47  ;;  %v3351_v59 = vfloor.f32 %v3311_v15 }
  0x4e   : > { %1016 = vmatprep.mubr.bf16.mxu0 %v3026_v0  ;;  %v1977_v60 = vsel %vm1965_vm5, %v1975_v48, 0.0  ;;  %v1979_v61 = vsel %vm1967_vm7, %v1975_v48, 0.0  ;;  %vm1940_vm8 = vcmp.eq.f32.partialorder %v3079_v14, %v1935_v49  ;;  %vm1942_vm9 = vcmp.eq.f32.partialorder %v3092_v23, %v1935_v49 }
  0x4f   : > { %v1981_v30 = vadd.f32 %v1977_v60, %v1953_v55  ;;  %v1983_v62 = vadd.f32 %v1979_v61, %v1955_v56  ;;  %v1947_v63 = vrot.slane %v3138_v42, %v3100_v27  ;;  %v1959_v1 = vrot.slane %v3122_v36, %v3100_v27 }
  0x50   : > { %v1971_v2 = vrot.slane %v3117_v34, %v3100_v27  ;;  %v2224_v3 = vrot.slane %v3094_v24, %v3102_v28  ;;  %v2236_v6 = vrot.slane %v3129_v39, %v3102_v28  ;;  %v2248_v7 = vrot.slane %v3114_v33, %v3102_v28 }
  0x51   : > { %v2049_v8 = vpack.c.bf16 %v1983_v62, %v1981_v30  ;;  %v1952_v9 = vsel %vm1940_vm8, %v1947_v63, 0.0  ;;  %v1954_v10 = vsel %vm1942_vm9, %v1947_v63, 0.0  ;;  %vm1964_vm10 = vcmp.eq.f32.partialorder %v3079_v14, %v1959_v1 }
  0x52   : > { %vm1966_vm11 = vcmp.eq.f32.partialorder %v3092_v23, %v1959_v1  ;;  %v1976_v11 = vsel %vm1964_vm10, %v1971_v2, 0.0  ;;  %vm2226_vm12 = vcmp.eq.f32.partialorder %v3079_v14, %v2224_v3  ;;  %vm2228_vm13 = vcmp.eq.f32.partialorder %v3092_v23, %v2224_v3 }
  0x53   : > { %2064 = vmatprep.subr.bf16.mxu0 %v2049_v8  ;;  %v1978_v24 = vsel %vm1966_vm11, %v1971_v2, 0.0  ;;  %v1980_v12 = vadd.f32 %v1976_v11, %v1952_v9  ;;  %v2238_v13 = vsel %vm2226_vm12, %v2236_v6, 0.0  ;;  %v2240_v39 = vsel %vm2228_vm13, %v2236_v6, 0.0 }
  0x54   : > { %2917 = vmatmul.mubr.msk.bf16.gmra.mxu1 %vm407_vm6, %v3225_v52  ;;  %v1982_v33 = vadd.f32 %v1978_v24, %v1954_v10  ;;  %vm2250_vm14 = vcmp.eq.f32.partialorder %v3079_v14, %v2248_v7  ;;  %vm2252_vm15 = vcmp.eq.f32.partialorder %v3092_v23, %v2248_v7  ;;  %v2260_v17 = vrot.slane %v3109_v31, %v3102_v28 }
  0x55   : > { %2921 = vmatmul.mubr.msk.bf16.gmra.mxu0 %vm407_vm6, %v3225_v52  ;;  %1257 = vmatprep.mubr.bf16.mxu1 %v3026_v0  ;;  %v2220_v18 = vrot.slane %v3096_v25, %v3102_v28  ;;  %v2232_v32 = vrot.slane %v3138_v42, %v3102_v28  ;;  %v2244_v35 = vrot.slane %v3122_v36, %v3102_v28  ;;  %v3388_v37 = vadd.f32 1.0, %v3351_v59 }
  0x56   : > { %1528 = vmatprep.mubr.bf16.mxu0 %v3026_v0  ;;  %v1765_v31 = vpack.c.bf16 %v3346_v58, %v3338_v54  ;;  %v2262_v38 = vsel %vm2250_vm14, %v2260_v17, 0.0  ;;  %v2264_v41 = vsel %vm2252_vm15, %v2260_v17, 0.0  ;;  %v2256_v43 = vrot.slane %v3117_v34, %v3102_v28 }
  0x57   : > { %v2266_v25 = vadd.f32 %v2262_v38, %v2238_v13  ;;  %v2268_v40 = vadd.f32 %v2264_v41, %v2240_v39  ;;  %vm2225_vm0 = vcmp.eq.f32.partialorder %v3079_v14, %v2220_v18  ;;  %vm2227_vm1 = vcmp.eq.f32.partialorder %v3092_v23, %v2220_v18 }
  0x58   : > { %v2237_v36 = vsel %vm2225_vm0, %v2232_v32, 0.0  ;;  %v2239_v42 = vsel %vm2227_vm1, %v2232_v32, 0.0  ;;  %vm2249_vm2 = vcmp.eq.f32.partialorder %v3079_v14, %v2244_v35  ;;  %vm2251_vm3 = vcmp.eq.f32.partialorder %v3092_v23, %v2244_v35  ;;  %v3488_v32 = vld [vmem:[%s3069_s17 + $0x20] sm:$0xff] }
  0x59   : > { %v2048_v44 = vpack.c.bf16 %v1982_v33, %v1980_v12  ;;  %v2261_v45 = vsel %vm2249_vm2, %v2256_v43, 0.0  ;;  %v2263_v46 = vsel %vm2251_vm3, %v2256_v43, 0.0  ;;  %v3401_v29 = vsub.f32 %v3311_v15, %v3351_v59 }
  0x5a   : > { %v3403_v34 = vadd.f32 %v2261_v45, %v2237_v36  ;;  %v2267_v47 = vadd.f32 %v2263_v46, %v2239_v42  ;;  %v2497_v48 = vrot.slane %v3351_v59, %v3081_v16  ;;  %v2521_v49 = vrot.slane %v3388_v37, %v3081_v16 }
  0x5b   : > { %v2336_v50 = vpack.c.bf16 %v2268_v40, %v2266_v25  ;;  %v3410_v53 = vsub.f32 1.0, %v3401_v29  ;;  %v2533_v54 = vrot.slane %v3401_v29, %v3081_v16  ;;  %v2904_v55 = vadd.f32 -1.0, %v3341_v57 }
  0x5c   : > { %2922 = vmatmul.mubr.msk.bf16.vlgmr.msra.gmra.mxu1 %vm407_vm6, %v3175_v4  ;;  %v2335_v15 = vpack.c.bf16 %v2267_v47, %v3403_v34  ;;  %vm2499_vm4 = vcmp.eq.f32.partialorder %v3079_v14, %v2497_v48  ;;  %vm2501_vm5 = vcmp.eq.f32.partialorder %v3092_v23, %v2497_v48  ;;  %vm2523_vm7 = vcmp.eq.f32.partialorder %v3079_v14, %v2521_v49 }
  0x5d   : > { %2926 = vmatmul.mubr.msk.bf16.vlgmr.msra.gmra.mxu0 %vm407_vm6, %v3175_v4  ;;  %1782 = vmatpush1.bf16.msra.mxu1 %v1765_v31  ;;  %v2509_v56 = vrot.slane %v3410_v53, %v3081_v16  ;;  %vm2525_vm8 = vcmp.eq.f32.partialorder %v3092_v23, %v2521_v49  ;;  %v2535_v57 = vsel %vm2523_vm7, %v2533_v54, 0.0  ;;  %v251_v30 = vmul.f32 0.5, %v2904_v55  ;;  %v3497_v31 = vld [vmem:[%s3069_s17 + $0x28] sm:$0xff] }
  0x5e   : > { %2065 = vmatpush1.bf16.msra.mxu0 %v2048_v44  ;;  %1267 = vmatprep.mubr.bf16.mxu1 %v3026_v0  ;;  %v2537_v58 = vsel %vm2525_vm8, %v2533_v54, 0.0  ;;  %v2900_v35 = vmul.f32 -1.442695, %v3488_v32  ;;  %v2901_v38 = vmul.f32 -1.442695, %v3497_v31  ;;  %v352_v42 = vrot.slane %v3388_v37, %v3084_v19 }
  0x5f   : > { %1538 = vmatprep.mubr.bf16.mxu0 %v3026_v0  ;;  %2351 = vmatprep.subr.bf16.mxu1 %v2336_v50  ;;  %v2511_v60 = vsel %vm2499_vm4, %v2509_v56, 0.0  ;;  %v2513_v61 = vsel %vm2501_vm5, %v2509_v56, 0.0  ;;  %v3428_v2 = vfloor.f32 %v251_v30  ;;  %v338_v46 = vrot.slane %v3410_v53, %v3084_v19 }
  0x60   : > { %v2539_v62 = vadd.f32 %v2535_v57, %v2511_v60  ;;  %v2541_v63 = vadd.f32 %v2537_v58, %v2513_v61  ;;  %2986 = vpow2.f32 %v2900_v35  ;;  %vm354_vm0 = vcmp.eq.f32.partialorder %v3079_v14, %v352_v42  ;;  %v219_v35 = vld [vmem:[%s3069_s17 + $0x38] sm:$0x7] }
  0x61   : > { %v3437_v3 = vsub.f32 %v251_v30, %v3428_v2  ;;  %v3440_v6 = vadd.f32 1.0, %v3428_v2  ;;  %v2493_v8 = vrot.slane %v3428_v2, %v3081_v16  ;;  %2988 = vpow2.f32 %v2901_v38 }
  0x62   : > { %v2607_v1 = vpack.c.bf16 %v2541_v63, %v2539_v62  ;;  %v3561_v57 = vrot.slane %v3428_v2, %v3088_v21  ;;  %v3576_v62 = vrot.slane %v3388_v37, %v3086_v20  ;;  %vm356_vm5 = vcmp.eq.f32.partialorder %v3092_v23, %v352_v42 }
  0x63   : > { %v3443_v7 = vsub.f32 1.0, %v3437_v3  ;;  %v2517_v9 = vrot.slane %v3440_v6, %v3081_v16  ;;  %v2529_v11 = vrot.slane %v3437_v3, %v3081_v16  ;;  %vm2498_vm9 = vcmp.eq.f32.partialorder %v3079_v14, %v2493_v8 }
  0x64   : > { %2923 = vmatmul.mubr.msk.bf16.gmra.mxu1 %vm407_vm6, %v3222_v51  ;;  %2622 = vmatprep.subr.bf16.mxu0 %v2607_v1  ;;  %vm2500_vm10 = vcmp.eq.f32.partialorder %v3092_v23, %v2493_v8  ;;  %v348_v40 = vrot.slane %v3440_v6, %v3084_v19  ;;  %v360_v45 = vrot.slane %v3437_v3, %v3084_v19 }
  0x65   : > { %2927 = vmatmul.mubr.msk.bf16.gmra.mxu0 %vm407_vm6, %v3222_v51  ;;  %1277 = vmatprep.mubr.bf16.mxu1 %v3026_v0  ;;  %v2505_v10 = vrot.slane %v3443_v7, %v3081_v16  ;;  %vm2522_vm11 = vcmp.eq.f32.partialorder %v3079_v14, %v2517_v9  ;;  %vm2524_vm12 = vcmp.eq.f32.partialorder %v3092_v23, %v2517_v9  ;;  %v218_v9 = vld [vmem:[%s3069_s17 + $0x30] sm:$0x7] }
  0x66   : > { %1548 = vmatprep.mubr.bf16.mxu0 %v3026_v0  ;;  %v2534_v13 = vsel %vm2522_vm11, %v2529_v11, 0.0  ;;  %v2536_v39 = vsel %vm2524_vm12, %v2529_v11, 0.0  ;;  %v334_v44 = vrot.slane %v3443_v7, %v3084_v19  ;;  %vm353_vm14 = vcmp.eq.f32.partialorder %v3079_v14, %v348_v40 }
  0x67   : > { %v2510_v24 = vsel %vm2498_vm9, %v2505_v10, 0.0  ;;  %v2512_v12 = vsel %vm2500_vm10, %v2505_v10, 0.0  ;;  %vm355_vm2 = vcmp.eq.f32.partialorder %v3092_v23, %v348_v40  ;;  %v3547_v34 = vrot.slane %v3440_v6, %v3086_v20 }
  0x68   : > { %v2538_v33 = vadd.f32 %v2534_v13, %v2510_v24  ;;  %v2540_v17 = vadd.f32 %v2536_v39, %v2512_v12  ;;  %v365_v48 = vsel %vm353_vm14, %v360_v45, 0.0  ;;  %v367_v55 = vsel %vm355_vm2, %v360_v45, 0.0 }
  0x69   : > { %v656_v56 = vrot.slane %v3437_v3, %v3086_v20  ;;  %vm649_vm4 = vcmp.eq.f32.partialorder %v3079_v14, %v3547_v34  ;;  %v3567_v60 = vrot.slane %v3440_v6, %v3088_v21  ;;  %v3581_v1 = vrot.slane %v3351_v59, %v3088_v21 }
  0x6a   : > { %v2606_v18 = vpack.c.bf16 %v2540_v17, %v2538_v33  ;;  %v3585_v8 = vrot.slane %v3388_v37, %v3088_v21  ;;  %vm896_vm7 = vcmp.eq.f32.partialorder %v3079_v14, %v3561_v57  ;;  %v903_v11 = vrot.slane %v3443_v7, %v3088_v21 }
  0x6b   : > { %v661_v10 = vsel %vm649_vm4, %v656_v56, 0.0  ;;  %v927_v24 = vrot.slane %v3437_v3, %v3088_v21  ;;  %vm920_vm8 = vcmp.eq.f32.partialorder %v3079_v14, %v3567_v60  ;;  %v3602_v13 = vrot.slane %v3410_v53, %v3086_v20 }
  0x6c   : > { %2924 = vmatmul.mubr.msk.bf16.gmra.mxu1 %vm407_vm6, %v3178_v5  ;;  %v3606_v39 = vrot.slane %v3401_v29, %v3086_v20  ;;  %vm650_vm10 = vcmp.eq.f32.partialorder %v3079_v14, %v3576_v62  ;;  %v3612_v33 = vrot.slane %v3410_v53, %v3088_v21  ;;  %v3616_v17 = vrot.slane %v3401_v29, %v3088_v21 }
  0x6d   : > { %2928 = vmatmul.mubr.msk.bf16.gmra.mxu0 %vm407_vm6, %v3178_v5  ;;  %1287 = vmatprep.mubr.bf16.mxu1 %v3026_v0  ;;  %v2987_v41 = vpop.eup %2986  ;;  %vm897_vm11 = vcmp.eq.f32.partialorder %v3079_v14, %v3581_v1  ;;  %vm921_vm12 = vcmp.eq.f32.partialorder %v3079_v14, %v3585_v8  ;;  %v908_v40 = vsel %vm896_vm7, %v903_v11, 0.0  ;;  %v2935_v45 = vmul.f32 -1.442695, %v219_v35 }
  0x6e   : > { %1558 = vmatprep.mubr.bf16.mxu0 %v3026_v0  ;;  %v2989_v43 = vpop.eup %2988  ;;  %v231_v25 = vadd.f32 1.0, %v2987_v41  ;;  %vm651_vm14 = vcmp.eq.f32.partialorder %v3092_v23, %v3547_v34  ;;  %vm652_vm2 = vcmp.eq.f32.partialorder %v3092_v23, %v3576_v62  ;;  %vm923_vm4 = vcmp.eq.f32.partialorder %v3092_v23, %v3585_v8 }
  0x6f   : > { %v232_v36 = vadd.f32 1.0, %v2989_v43  ;;  %v663_v35 = vsel %vm651_vm14, %v656_v56, 0.0  ;;  %v3692_v56 = vrot.slane %v3428_v2, %v3090_v22  ;;  %v1198_v62 = vrot.slane %v3437_v3, %v3090_v22 }
  0x70   : > { %2990 = vrcp.f32 %v231_v25 }
  0x71   : > { %2992 = vrcp.f32 %v232_v36  ;;  %v932_v36 = vsel %vm920_vm8, %v927_v24, 0.0 }
  0x74   : > { %2925 = vmatmul.mubr.msk.bf16.gmra.mxu1 %vm407_vm6, %v3225_v52 }
  0x75   : > { %2929 = vmatmul.mubr.msk.bf16.gmra.mxu0 %vm407_vm6, %v3225_v52  ;;  %1799 = vmatprep.mubr.bf16.mxu1 %v3026_v0 }
  0x76   : > { %2082 = vmatprep.mubr.bf16.mxu0 %v3026_v0 }
  0x7c   : > { %2930 = vmatmul.mubr.msk.bf16.vlgmr.msra.gmra.mxu1 %vm407_vm6, %v3175_v4 }
  0x7d   : > { %2936 = vmatmul.mubr.msk.bf16.vlgmr.msra.gmra.mxu0 %vm407_vm6, %v3175_v4  ;;  %2352 = vmatpush1.bf16.msra.mxu1 %v2335_v15  ;;  %v632_v15 = vrot.slane %v3443_v7, %v3086_v20  ;;  %v3594_v12 = vpop.eup %2990 }
  0x7e   : > { %2623 = vmatpush1.bf16.msra.mxu0 %v2606_v18  ;;  %1809 = vmatprep.mubr.bf16.mxu1 %v3026_v0  ;;  %v2934_v18 = vmul.f32 -1.442695, %v218_v9  ;;  %v3627_v43 = vpop.eup %2992  ;;  %v376_v25 = vrot.slane %v3594_v12, %v3086_v20 }
  0x7f   : > { %2092 = vmatprep.mubr.bf16.mxu0 %v3026_v0 }
  0x80   : > { %2994 = vpow2.f32 %v2934_v18 }
  0x81   : > { %2996 = vpow2.f32 %v2935_v45 }
  0x84   : > { %2931 = vmatmul.mubr.msk.bf16.gmra.mxu1 %vm407_vm6, %v3222_v51 }
  0x85   : > { %2937 = vmatmul.mubr.msk.bf16.gmra.mxu0 %vm407_vm6, %v3222_v51  ;;  %1819 = vmatprep.mubr.bf16.mxu1 %v3026_v0 }
  0x86   : > { %2102 = vmatprep.mubr.bf16.mxu0 %v3026_v0 }
  0x8c   : > { %2932 = vmatmul.mubr.msk.bf16.gmra.mxu1 %vm407_vm6, %v3178_v5 }
  0x8d   : > { %2938 = vmatmul.mubr.msk.bf16.gmra.mxu0 %vm407_vm6, %v3178_v5  ;;  %1829 = vmatprep.mubr.bf16.mxu1 %v3026_v0  ;;  %v2995_v45 = vpop.eup %2994 }
  0x8e   : > { %2112 = vmatprep.mubr.bf16.mxu0 %v3026_v0 }
  0x94   : > { %2933 = vmatmul.mubr.msk.bf16.gmra.mxu1 %vm407_vm6, %v3225_v52 }
  0x95   : > { %2939 = vmatmul.mubr.msk.bf16.gmra.mxu0 %vm407_vm6, %v3225_v52  ;;  %2369 = vmatprep.mubr.bf16.mxu1 %v3026_v0 }
  0x96   : > { %2640 = vmatprep.mubr.bf16.mxu0 %v3026_v0 }
  0x9c   : > { %2942 = vmatmul.mubr.msk.bf16.vlgmr.msra.gmra.mxu1 %vm407_vm6, %v3175_v4 }
  0x9d   : > { %2946 = vmatmul.mubr.msk.bf16.vlgmr.msra.gmra.mxu0 %vm407_vm6, %v3175_v4  ;;  %2379 = vmatprep.mubr.bf16.mxu1 %v3026_v0  ;;  %v322_v4 = vrot.slane %v3428_v2, %v3084_v19 }
  0x9e   : > { %2650 = vmatprep.mubr.bf16.mxu0 %v3026_v0 }
  0x9f   : > { %vm327_vm13 = vcmp.eq.f32.partialorder %v3079_v14, %v322_v4  ;;  %vm329_vm1 = vcmp.eq.f32.partialorder %v3092_v23, %v322_v4 }
  0xa0   : > { %v339_v47 = vsel %vm327_vm13, %v334_v44, 0.0  ;;  %v341_v54 = vsel %vm329_vm1, %v334_v44, 0.0  ;;  %v662_v44 = vsel %vm650_vm10, %v3606_v39, 0.0 }
  0xa1   : > { %v369_v58 = vadd.f32 %v365_v48, %v339_v47  ;;  %v371_v30 = vadd.f32 %v367_v55, %v341_v54  ;;  %v933_v47 = vsel %vm921_vm12, %v3616_v17, 0.0  ;;  %v380_v48 = vrot.slane %v3627_v43, %v3086_v20 }
  0xa2   : > { %v3663_v55 = vrot.slane %v3627_v43, %v3088_v21 }
  0xa4   : > { %2943 = vmatmul.mubr.msk.bf16.gmra.mxu1 %vm407_vm6, %v3222_v51 }
  0xa5   : > { %2947 = vmatmul.mubr.msk.bf16.gmra.mxu0 %vm407_vm6, %v3222_v51  ;;  %2389 = vmatprep.mubr.bf16.mxu1 %v3026_v0  ;;  %v326_v51 = vrot.slane %v3351_v59, %v3084_v19 }
  0xa6   : > { %2660 = vmatprep.mubr.bf16.mxu0 %v3026_v0 }
  0xa7   : > { %vm328_vm15 = vcmp.eq.f32.partialorder %v3079_v14, %v326_v51 }
  0xa8   : > { %v340_v49 = vsel %vm328_vm15, %v338_v46, 0.0  ;;  %vm898_vm15 = vcmp.eq.f32.partialorder %v3092_v23, %v3561_v57  ;;  %v3696_v57 = vrot.slane %v3440_v6, %v3090_v22 }
  0xaa   : > { %vm1193_vm14 = vcmp.eq.f32.partialorder %v3092_v23, %v3696_v57 }
  0xac   : > { %2944 = vmatmul.mubr.msk.bf16.gmra.mxu1 %vm407_vm6, %v3178_v5 }
  0xad   : > { %2948 = vmatmul.mubr.msk.bf16.gmra.mxu0 %vm407_vm6, %v3178_v5  ;;  %2399 = vmatprep.mubr.bf16.mxu1 %v3026_v0  ;;  %v364_v5 = vrot.slane %v3401_v29, %v3084_v19 }
  0xae   : > { %2670 = vmatprep.mubr.bf16.mxu0 %v3026_v0  ;;  %v3543_v0 = vrot.slane %v3428_v2, %v3086_v20 }
  0xaf   : > { %v366_v50 = vsel %vm354_vm0, %v364_v5, 0.0  ;;  %v368_v41 = vsel %vm356_vm5, %v364_v5, 0.0  ;;  %v909_v5 = vsel %vm897_vm11, %v3612_v33, 0.0  ;;  %vm922_vm0 = vcmp.eq.f32.partialorder %v3092_v23, %v3567_v60 }
  0xb0   : > { %vm625_vm3 = vcmp.eq.f32.partialorder %v3079_v14, %v3543_v0  ;;  %v370_v61 = vadd.f32 %v366_v50, %v340_v49  ;;  %v936_v49 = vadd.f32 %v932_v36, %v908_v40  ;;  %vm627_vm13 = vcmp.eq.f32.partialorder %v3092_v23, %v3543_v0 }
  0xb1   : > { %v637_v63 = vsel %vm625_vm3, %v632_v15, 0.0  ;;  %v937_v9 = vadd.f32 %v933_v47, %v909_v5  ;;  %v639_v18 = vsel %vm627_vm13, %v632_v15, 0.0  ;;  %vm899_vm3 = vcmp.eq.f32.partialorder %v3092_v23, %v3581_v1 }
  0xb2   : > { %v665_v4 = vadd.f32 %v661_v10, %v637_v63  ;;  %v3665_v63 = vmul.f32 %v376_v25, %v369_v58  ;;  %v3669_v10 = vrot.slane %v3627_v43, %v3090_v22  ;;  %v3675_v0 = vmul.f32 %v380_v48, %v370_v61 }
  0xb3   : > { %v667_v61 = vadd.f32 %v663_v35, %v639_v18  ;;  %vm1191_vm5 = vcmp.eq.f32.partialorder %v3079_v14, %v3696_v57  ;;  %v3731_v1 = vrot.slane %v3388_v37, %v3090_v22  ;;  %v1445_v40 = vrot.slane %v3443_v7, %v3098_v26 }
  0xb4   : > { %2945 = vmatmul.mubr.msk.bf16.gmra.mxu1 %vm407_vm6, %v3225_v52  ;;  %v3699_v60 = vmul.f32 %v3669_v10, %v937_v9  ;;  %v1469_v36 = vrot.slane %v3437_v3, %v3098_v26  ;;  %v1203_v5 = vsel %vm1191_vm5, %v1198_v62, 0.0  ;;  %v3751_v47 = vrot.slane %v3401_v29, %v3090_v22 }
  0xb5   : > { %2949 = vmatmul.mubr.msk.bf16.gmra.mxu0 %vm407_vm6, %v3225_v52  ;;  %v3571_v52 = vrot.slane %v3351_v59, %v3086_v20  ;;  %vm330_vm6 = vcmp.eq.f32.partialorder %v3092_v23, %v326_v51  ;;  %v3639_v51 = vrot.slane %v3594_v12, %v3088_v21  ;;  %v3677_v21 = vmul.f32 %v376_v25, %v371_v30 }
  0xb6   : > { %v342_v38 = vsel %vm330_vm6, %v338_v46, 0.0  ;;  %v3651_v46 = vrot.slane %v3594_v12, %v3090_v22  ;;  %4650 = vst [vmem:[#allocation10_spill] sm:$0xff] %v3699_v60  ;;  %v910_v30 = vsel %vm898_vm15, %v903_v11, 0.0  ;;  %v3707_v25 = vrot.slane %v3428_v2, %v3098_v26 }
  0xb7   : > { %vm626_vm9 = vcmp.eq.f32.partialorder %v3079_v14, %v3571_v52  ;;  %v372_v50 = vadd.f32 %v368_v41, %v342_v38  ;;  %v3680_v34 = vmul.f32 %v3639_v51, %v665_v4  ;;  %v934_v41 = vsel %vm922_vm0, %v927_v24, 0.0 }
  0xb8   : > { %v638_v42 = vsel %vm626_vm9, %v3602_v13, 0.0  ;;  %v3683_v58 = vmul.f32 %v3651_v46, %v936_v49  ;;  %vm628_vm1 = vcmp.eq.f32.partialorder %v3092_v23, %v3571_v52  ;;  %v3711_v4 = vrot.slane %v3440_v6, %v3098_v26 }
  0xb9   : > { %v666_v54 = vadd.f32 %v662_v44, %v638_v42  ;;  %4647 = vst [vmem:[#allocation7_spill] sm:$0xff] %v3680_v34  ;;  %v3685_v38 = vmul.f32 %v380_v48, %v372_v50  ;;  %v1174_v52 = vrot.slane %v3443_v7, %v3090_v22  ;;  %vm1167_vm6 = vcmp.eq.f32.partialorder %v3079_v14, %v3692_v56 }
  0xba   : > { %4648 = vst [vmem:[#allocation8_spill] sm:$0xff] %v3683_v58  ;;  %v3727_v11 = vrot.slane %v3351_v59, %v3090_v22  ;;  %v640_v8 = vsel %vm628_vm1, %v3602_v13, 0.0  ;;  %v664_v24 = vsel %vm652_vm2, %v3606_v39, 0.0  ;;  %v911_v42 = vsel %vm899_vm3, %v3612_v33, 0.0 }
  0xbb   : > { %v3688_v15 = vmul.f32 %v3663_v55, %v666_v54  ;;  %v935_v44 = vsel %vm923_vm4, %v3616_v17, 0.0  ;;  %vm1438_vm7 = vcmp.eq.f32.partialorder %v3079_v14, %v3707_v25  ;;  %vm1462_vm8 = vcmp.eq.f32.partialorder %v3079_v14, %v3711_v4  ;;  %v2997_v54 = vpop.eup %2996 }
  0xbc   : > { %v1179_v13 = vsel %vm1167_vm6, %v1174_v52, 0.0  ;;  %v3747_v39 = vrot.slane %v3410_v53, %v3090_v22  ;;  %vm1168_vm9 = vcmp.eq.f32.partialorder %v3079_v14, %v3727_v11  ;;  %vm1192_vm10 = vcmp.eq.f32.partialorder %v3079_v14, %v3731_v1 }
  0xbd   : > { %4649 = vst [vmem:[#allocation9_spill] sm:$0xff] %v3688_v15  ;;  %v3759_v33 = vrot.slane %v3351_v59, %v3098_v26  ;;  %v3763_v17 = vrot.slane %v3388_v37, %v3098_v26  ;;  %v3766_v48 = vmul.f32 %v3639_v51, %v667_v61  ;;  %v938_v49 = vadd.f32 %v934_v41, %v910_v30 }
  0xbe   : > { %v1450_v22 = vsel %vm1438_vm7, %v1445_v40, 0.0  ;;  %v1474_v50 = vsel %vm1462_vm8, %v1469_v36, 0.0  ;;  %v668_v9 = vadd.f32 %v664_v24, %v640_v8  ;;  %v939_v18 = vadd.f32 %v935_v44, %v911_v42 }
  0xbf   : > { %v1207_v35 = vadd.f32 %v1203_v5, %v1179_v13  ;;  %v1926_v20 = vadd.f32 1.0, %v2995_v45  ;;  %v1180_v60 = vsel %vm1168_vm9, %v3747_v39, 0.0  ;;  %v1204_v15 = vsel %vm1192_vm10, %v3751_v47, 0.0 }
  0xc0   : > { %v1449_v58 = vrot.slane %v3410_v53, %v3098_v26  ;;  %v1473_v34 = vrot.slane %v3401_v29, %v3098_v26  ;;  %v3776_v51 = vrot.slane %v3594_v12, %v3098_v26  ;;  %v1478_v61 = vadd.f32 %v1474_v50, %v1450_v22 }
  0xc1   : > { %vm1439_vm11 = vcmp.eq.f32.partialorder %v3079_v14, %v3759_v33  ;;  %vm1463_vm12 = vcmp.eq.f32.partialorder %v3079_v14, %v3763_v17  ;;  %v3784_v30 = vrot.slane %v3594_v12, %v3100_v27  ;;  %vm1169_vm13 = vcmp.eq.f32.partialorder %v3092_v23, %v3692_v56 }
  0xc2   : > { %v1927_v41 = vadd.f32 1.0, %v2997_v54  ;;  %v3791_v8 = vmul.f32 %v3651_v46, %v938_v49  ;;  %v1208_v24 = vadd.f32 %v1204_v15, %v1180_v60  ;;  %v3795_v42 = vrot.slane %v3627_v43, %v3098_v26 }
  0xc3   : > { %2998 = vrcp.f32 %v1926_v20  ;;  %v3798_v44 = vmul.f32 %v3663_v55, %v668_v9  ;;  %v3801_v45 = vmul.f32 %v3669_v10, %v939_v18  ;;  %v1451_v56 = vsel %vm1439_vm11, %v1449_v58, 0.0 }
  0xc4   : > { %v1475_v13 = vsel %vm1463_vm12, %v1473_v34, 0.0  ;;  %v3804_v57 = vmul.f32 %v3776_v51, %v1207_v35  ;;  %v1181_v5 = vsel %vm1169_vm13, %v1174_v52, 0.0  ;;  %v1205_v46 = vsel %vm1193_vm14, %v1198_v62, 0.0 }
  0xc5   : > { %vm1440_vm15 = vcmp.eq.f32.partialorder %v3092_v23, %v3707_v25  ;;  %v3809_v26 = vmul.f32 %v3784_v30, %v1478_v61  ;;  %vm1464_vm0 = vcmp.eq.f32.partialorder %v3092_v23, %v3711_v4  ;;  %v3815_v20 = vrot.slane %v3428_v2, %v3100_v27 }
  0xc6   : > { %3000 = vrcp.f32 %v1927_v41  ;;  %v3818_v55 = vmul.f32 %v3795_v42, %v1208_v24  ;;  %v1479_v10 = vadd.f32 %v1475_v13, %v1451_v56  ;;  %v1489_v15 = vrot.slane %v3627_v43, %v3100_v27 }
  0xc7   : > { %v3824_v60 = vrot.slane %v3440_v6, %v3100_v27  ;;  %v1209_v25 = vadd.f32 %v1205_v46, %v1181_v5  ;;  %v1452_v52 = vsel %vm1440_vm15, %v1445_v40, 0.0  ;;  %v3828_v4 = vrot.slane %v3428_v2, %v3102_v28 }
  0xc8   : > { %v3832_v62 = vrot.slane %v3440_v6, %v3102_v28  ;;  %v1476_v49 = vsel %vm1464_vm0, %v1469_v36, 0.0  ;;  %vm1170_vm1 = vcmp.eq.f32.partialorder %v3092_v23, %v3727_v11  ;;  %vm1194_vm2 = vcmp.eq.f32.partialorder %v3092_v23, %v3731_v1 }
  0xc9   : > { %vm1441_vm3 = vcmp.eq.f32.partialorder %v3092_v23, %v3759_v33  ;;  %vm1465_vm4 = vcmp.eq.f32.partialorder %v3092_v23, %v3763_v17  ;;  %vm1709_vm6 = vcmp.eq.f32.partialorder %v3079_v14, %v3815_v20  ;;  %v1716_v2 = vrot.slane %v3443_v7, %v3100_v27 }
  0xca   : > { %v3848_v6 = vrot.slane %v3437_v3, %v3100_v27  ;;  %vm1733_vm5 = vcmp.eq.f32.partialorder %v3079_v14, %v3824_v60  ;;  %v3854_v40 = vrot.slane %v3443_v7, %v3102_v28  ;;  %v3858_v36 = vrot.slane %v3437_v3, %v3102_v28 }
  0xcb   : > { %v3862_v22 = vrot.slane %v3351_v59, %v3100_v27  ;;  %v3864_v50 = vmul.f32 %v1489_v15, %v1479_v10  ;;  %vm1992_vm7 = vcmp.eq.f32.partialorder %v3079_v14, %v3828_v4  ;;  %vm2016_vm8 = vcmp.eq.f32.partialorder %v3079_v14, %v3832_v62 }
  0xcc   : > { %v3872_v7 = vrot.slane %v3388_v37, %v3100_v27  ;;  %v1480_v54 = vadd.f32 %v1476_v49, %v1452_v52  ;;  %v1182_v3 = vsel %vm1170_vm1, %v3747_v39, 0.0  ;;  %v1206_v9 = vsel %vm1194_vm2, %v3751_v47, 0.0 }
  0xcd   : > { %v1453_v18 = vsel %vm1441_vm3, %v1449_v58, 0.0  ;;  %v1477_v35 = vsel %vm1465_vm4, %v1473_v34, 0.0  ;;  %v1721_v61 = vsel %vm1709_vm6, %v1716_v2, 0.0  ;;  %v1745_v11 = vsel %vm1733_vm5, %v3848_v6, 0.0 }
  0xce   : > { %v1720_v39 = vrot.slane %v3410_v53, %v3100_v27  ;;  %v2004_v1 = vsel %vm1992_vm7, %v3854_v40, 0.0  ;;  %v2028_v47 = vsel %vm2016_vm8, %v3858_v36, 0.0  ;;  %vm1710_vm9 = vcmp.eq.f32.partialorder %v3079_v14, %v3862_v22 }
  0xcf   : > { %v1744_v58 = vrot.slane %v3401_v29, %v3100_v27  ;;  %v1210_v33 = vadd.f32 %v1206_v9, %v1182_v3  ;;  %vm1734_vm10 = vcmp.eq.f32.partialorder %v3079_v14, %v3872_v7  ;;  %v1991_v17 = vrot.slane %v3351_v59, %v3102_v28 }
  0xd0   : > { %v3900_v34 = vpop.eup %2998  ;;  %v2015_v41 = vrot.slane %v3388_v37, %v3102_v28  ;;  %v1481_v24 = vadd.f32 %v1477_v35, %v1453_v18  ;;  %v1749_v56 = vadd.f32 %v1745_v11, %v1721_v61  ;;  %v3910_v13 = vrot.slane %v3594_v12, %v3102_v28 }
  0xd1   : > { %4651 = vst [vmem:[#allocation11_spill] sm:$0xff] %v3900_v34  ;;  %v2203_v27 = vadd.f32 1.0, %v3488_v32  ;;  %v3914_v5 = vmul.f32 %v3776_v51, %v1209_v25  ;;  %v2032_v46 = vadd.f32 %v2028_v47, %v2004_v1  ;;  %v1722_v10 = vsel %vm1710_vm9, %v1720_v39, 0.0 }
  0xd2   : > { %v2003_v52 = vrot.slane %v3410_v53, %v3102_v28  ;;  %v3922_v37 = vrot.slane %v3900_v34, %v3081_v16  ;;  %v1746_v49 = vsel %vm1734_vm10, %v1744_v58, 0.0  ;;  %v2027_v12 = vrot.slane %v3401_v29, %v3102_v28 }
  0xd3   : > { %v3918_v59 = vpop.eup %3000  ;;  %v2205_v3 = vmul.f32 16.0, %v2203_v27  ;;  %v3927_v32 = vmul.f32 %v3784_v30, %v1480_v54  ;;  %v3930_v51 = vmul.f32 %v3795_v42, %v1210_v33  ;;  %vm1993_vm11 = vcmp.eq.f32.partialorder %v3079_v14, %v1991_v17 }
  0xd4   : > { %4652 = vst [vmem:[#allocation12_spill] sm:$0xff] %v3918_v59  ;;  %vm2017_vm12 = vcmp.eq.f32.partialorder %v3079_v14, %v2015_v41  ;;  %v3934_v53 = vmul.f32 %v1489_v15, %v1481_v24  ;;  %v3937_v25 = vmul.f32 %v3910_v13, %v1749_v56  ;;  %vm1711_vm13 = vcmp.eq.f32.partialorder %v3092_v23, %v3815_v20 }
  0xd5   : > { %v2940_v29 = vadd.f32 -1.0, %v2205_v3  ;;  %v1750_v9 = vadd.f32 %v1746_v49, %v1722_v10  ;;  %v3943_v30 = vrot.slane %v3627_v43, %v3102_v28  ;;  %v3947_v42 = vrot.slane %v3918_v59, %v3081_v16 }
  0xd6   : > { %4653 = vst [vmem:[#allocation13_spill] sm:$0xff] %v3937_v25  ;;  %v2204_v54 = vadd.f32 1.0, %v3497_v31  ;;  %v3951_v15 = vmul.f32 %v3922_v37, %v2032_v46  ;;  %v2005_v18 = vsel %vm1993_vm11, %v2003_v52, 0.0  ;;  %v2029_v35 = vsel %vm2017_vm12, %v2027_v12, 0.0 }
  0xd7   : > { %v2209_v61 = vmul.f32 0.5, %v2940_v29  ;;  %v1723_v11 = vsel %vm1711_vm13, %v1716_v2, 0.0  ;;  %vm1735_vm14 = vcmp.eq.f32.partialorder %v3092_v23, %v3824_v60  ;;  %vm1994_vm15 = vcmp.eq.f32.partialorder %v3092_v23, %v3828_v4 }
  0xd8   : > { %4654 = vst [vmem:[#allocation14_spill] sm:$0xff] %v3951_v15  ;;  %v2206_v28 = vmul.f32 16.0, %v2204_v54  ;;  %vm2018_vm0 = vcmp.eq.f32.partialorder %v3092_v23, %v3832_v62  ;;  %vm1712_vm1 = vcmp.eq.f32.partialorder %v3092_v23, %v3862_v22  ;;  %vm1736_vm2 = vcmp.eq.f32.partialorder %v3092_v23, %v3872_v7 }
  0xd9   : > { %v3963_v31 = vfloor.f32 %v2209_v61  ;;  %v2033_v43 = vadd.f32 %v2029_v35, %v2005_v18  ;;  %vm1995_vm3 = vcmp.eq.f32.partialorder %v3092_v23, %v1991_v17  ;;  %vm2019_vm4 = vcmp.eq.f32.partialorder %v3092_v23, %v2015_v41 }
  0xda   : > { %v2941_v20 = vadd.f32 -1.0, %v2206_v28  ;;  %v3968_v60 = vmul.f32 %v3943_v30, %v1750_v9  ;;  %v1747_v4 = vsel %vm1735_vm14, %v3848_v6, 0.0  ;;  %v2006_v62 = vsel %vm1994_vm15, %v3854_v40, 0.0 }
  0xdb   : > { %v3973_v2 = vsub.f32 %v2209_v61, %v3963_v31  ;;  %v2030_v1 = vsel %vm2018_vm0, %v3858_v36, 0.0  ;;  %v1724_v47 = vsel %vm1712_vm1, %v1720_v39, 0.0  ;;  %v1748_v33 = vsel %vm1736_vm2, %v1744_v58, 0.0 }
  0xdc   : > { %4655 = vst [vmem:[#allocation15_spill] sm:$0xff] %v3968_v60  ;;  %v2293_v17 = vadd.f32 1.0, %v3963_v31  ;;  %v2007_v41 = vsel %vm1995_vm3, %v2003_v52, 0.0  ;;  %v2031_v24 = vsel %vm2019_vm4, %v2027_v12, 0.0  ;;  %v2210_v27 = vmul.f32 0.5, %v2941_v20 }
  0xdd   : > { %4656 = vst [vmem:[#allocation16_spill] sm:$0xff] %v3973_v2  ;;  %v2215_v56 = vsub.f32 1.0, %v3973_v2  ;;  %v3979_v40 = vmul.f32 %v3947_v42, %v2033_v43  ;;  %v1751_v10 = vadd.f32 %v1747_v4, %v1723_v11  ;;  %v3983_v49 = vrot.slane %v3963_v31, %v3081_v16 }
  0xde   : > { %v3986_v36 = vrot.slane %v2293_v17, %v3081_v16  ;;  %v2034_v39 = vadd.f32 %v2030_v1, %v2006_v62  ;;  %v1752_v58 = vadd.f32 %v1748_v33, %v1724_v47  ;;  %v3993_v12 = vrot.slane %v3973_v2, %v3081_v16 }
  0xdf   : > { %4657 = vst [vmem:[#allocation17_spill] sm:$0xff] %v3979_v40  ;;  %4658 = vst [vmem:[#allocation18_spill] sm:$0xff] %v3983_v49  ;;  %v3989_v52 = vrot.slane %v2215_v56, %v3081_v16  ;;  %v2035_v54 = vadd.f32 %v2031_v24, %v2007_v41  ;;  %vm2277_vm6 = vcmp.eq.f32.partialorder %v3079_v14, %v3983_v49  ;;  %v4003_v11 = vfloor.f32 %v2210_v27 }
  0xe0   : > { %4659 = vst [vmem:[#allocation19_spill] sm:$0xff] %v3986_v36  ;;  %4661 = vst [vmem:[#allocation21_spill] sm:$0xff] %v3993_v12  ;;  %vm2303_vm5 = vcmp.eq.f32.partialorder %v3079_v14, %v3986_v36 }
  0xe1   : > { %4660 = vst [vmem:[#allocation20_spill] sm:$0xff] %v3989_v52  ;;  %4662 = vst [vmem:[#allocation22_spill] sm:$0xff] %v4003_v11  ;;  %v2289_v62 = vsel %vm2277_vm6, %v3989_v52, 0.0  ;;  %vm2774_vm6 = vcmask 1041409  }
  0xec   : > { %v454_v22 = vpop.f32.mrf.mxu0  ;;  %v474_v7 = vpop.f32.mrf.mxu1 }
  0xed   : > { %v493_v3 = vmul.f32 %v454_v22, %v3665_v63  ;;  %v501_v18 = vmul.f32 %v474_v7, %v3665_v63  ;;  %v2315_v22 = vsel %vm2303_vm5, %v3993_v12, 0.0  ;;  %vm2776_vm5 = vcmask 1045509  }
  0xee   : > { %v456_v46 = vpop.f32.mrf.mxu0  ;;  %v476_v6 = vpop.f32.mrf.mxu1  ;;  %v4023_v12 = vadd.f32 %v2315_v22, %v2289_v62  ;;  %v4039_v22 = vrot.slane %v2215_v56, %v3084_v19 }
  0xef   : > { %v494_v28 = vmul.f32 %v456_v46, %v3675_v0  ;;  %v502_v43 = vmul.f32 %v476_v6, %v3675_v0  ;;  %v4015_v46 = vmul.f32 %v3922_v37, %v2034_v39  ;;  %v4018_v6 = vmul.f32 %v3943_v30, %v1752_v58 }
  0xf0   : > { %v458_v29 = vpop.f32.mrf.mxu0  ;;  %v478_v9 = vpop.f32.mrf.mxu1  ;;  %4667 = vst [vmem:[#allocation27_spill] sm:$0xff] %v4023_v12  ;;  %v4031_v37 = vrot.slane %v3963_v31, %v3084_v19  ;;  %v4034_v30 = vsub.f32 %v2210_v27, %v4003_v11  ;;  %4671 = vst [vmem:[#allocation31_spill] sm:$0xff] %v4039_v22 }
  0xf1   : > { %v495_v35 = vmul.f32 %v458_v29, %v3677_v21  ;;  %v503_v61 = vmul.f32 %v478_v9, %v3677_v21  ;;  %v4012_v29 = vmul.f32 %v3910_v13, %v1751_v10  ;;  %4664 = vst [vmem:[#allocation24_spill] sm:$0xff] %v4015_v46  ;;  %4665 = vst [vmem:[#allocation25_spill] sm:$0xff] %v4018_v6 }
  0xf2   : > { %v460_v20 = vpop.f32.mrf.mxu0  ;;  %v480_v4 = vpop.f32.mrf.mxu1  ;;  %v4021_v9 = vmul.f32 %v3947_v42, %v2035_v54  ;;  %v4027_v13 = vrot.slane %v3900_v34, %v3084_v19  ;;  %4669 = vst [vmem:[#allocation29_spill] sm:$0xff] %v4031_v37  ;;  %4670 = vst [vmem:[#allocation30_spill] sm:$0xff] %v4034_v30  ;;  %vm2550_vm7 = vcmp.eq.f32.partialorder %v3079_v14, %v4031_v37 }
  0xf3   : > { %v509_v1 = vadd.f32 %v495_v35, %v493_v3  ;;  %v537_v47 = vadd.f32 %v503_v61, %v501_v18  ;;  %v496_v7 = vmul.f32 %v460_v20, %v3685_v38  ;;  %v504_v33 = vmul.f32 %v480_v4, %v3685_v38  ;;  %4663 = vst [vmem:[#allocation23_spill] sm:$0xff] %v4012_v29 }
  0xf4   : > { %v464_v41 = vpop.f32.mrf.mxu0  ;;  %v484_v24 = vpop.f32.mrf.mxu1  ;;  %4666 = vst [vmem:[#allocation26_spill] sm:$0xff] %v4021_v9  ;;  %4668 = vst [vmem:[#allocation28_spill] sm:$0xff] %v4027_v13 }
  0xf5   : > { %v510_v3 = vrot.slane %v509_v1, 4  ;;  %v538_v18 = vrot.slane %v537_v47, 4  ;;  %v516_v35 = vadd.f32 %v496_v7, %v494_v28  ;;  %v544_v61 = vadd.f32 %v504_v33, %v502_v43 }
  0xf6   : > { %v466_v20 = vpop.f32.mrf.mxu0  ;;  %v486_v4 = vpop.f32.mrf.mxu1  ;;  %v497_v54 = vmul.f32 %v464_v41, %v3665_v63  ;;  %v505_v28 = vmul.f32 %v484_v24, %v3665_v63  ;;  %v4042_v7 = vrot.slane %v2293_v17, %v3084_v19 }
  0xf7   : > { %v511_v42 = vadd.f32 %v510_v3, %v509_v1  ;;  %v539_v10 = vadd.f32 %v538_v18, %v537_v47  ;;  %v517_v39 = vrot.slane %v516_v35, 4  ;;  %v545_v58 = vrot.slane %v544_v61, 4 }
  0xf8   : > { %v468_v43 = vpop.f32.mrf.mxu0  ;;  %v488_v62 = vpop.f32.mrf.mxu1  ;;  %4672 = vst [vmem:[#allocation32_spill] sm:$0xff] %v4042_v7  ;;  %v498_v1 = vmul.f32 %v466_v20, %v3675_v0  ;;  %v506_v47 = vmul.f32 %v486_v4, %v3675_v0 }
  0xf9   : > { %v512_v31 = vrot.slane %v511_v42, 2  ;;  %v540_v33 = vrot.slane %v539_v10, 2  ;;  %v518_v27 = vadd.f32 %v517_v39, %v516_v35  ;;  %v546_v52 = vadd.f32 %v545_v58, %v544_v61 }
  0xfa   : > { %v499_v41 = vmul.f32 %v468_v43, %v3677_v21  ;;  %v507_v63 = vmul.f32 %v488_v62, %v3677_v21  ;;  %v470_v24 = vpop.f32.mrf.mxu0  ;;  %v490_v3 = vpop.f32.mrf.mxu1 }
  0xfb   : > { %v513_v18 = vadd.f32 %v512_v31, %v511_v42  ;;  %v541_v56 = vadd.f32 %v540_v33, %v539_v10  ;;  %v519_v36 = vrot.slane %v518_v27, 2  ;;  %v547_v23 = vrot.slane %v546_v52, 2 }
  0xfc   : > { %v523_v17 = vadd.f32 %v499_v41, %v497_v54  ;;  %v551_v49 = vadd.f32 %v507_v63, %v505_v28  ;;  %v500_v59 = vmul.f32 %v470_v24, %v3685_v38  ;;  %v508_v35 = vmul.f32 %v490_v3, %v3685_v38  ;;  %v717_v61 = vpop.f32.mrf.mxu1  ;;  %v988_v20 = vpop.f32.mrf.mxu0 }
  0xfd   : > { %v514_v39 = vrot.slane %v513_v18, 1  ;;  %v542_v0 = vrot.slane %v541_v56, 1  ;;  %v520_v4 = vadd.f32 %v519_v36, %v518_v27  ;;  %v548_v58 = vadd.f32 %v547_v23, %v546_v52  ;;  %v4674_v27 = vld [vmem:[#allocation8_spill] sm:$0xff] }
  0xfe   : > { %v524_v43 = vrot.slane %v523_v17, 4  ;;  %v552_v21 = vrot.slane %v551_v49, 4  ;;  %v530_v62 = vadd.f32 %v500_v59, %v498_v1  ;;  %v558_v11 = vadd.f32 %v508_v35, %v506_v47  ;;  %v719_v42 = vpop.f32.mrf.mxu1  ;;  %v990_v10 = vpop.f32.mrf.mxu0  ;;  %v4673_v59 = vld [vmem:[#allocation7_spill] sm:$0xff] }
  0xff   : > { %v4050_v31 = vadd.f32 %v514_v39, %v513_v18  ;;  %v4052_v54 = vadd.f32 %v542_v0, %v541_v56  ;;  %v521_v28 = vrot.slane %v520_v4, 1  ;;  %v549_v33 = vrot.slane %v548_v58, 1 }
 0x100   : > { %v525_v41 = vadd.f32 %v524_v43, %v523_v17  ;;  %v553_v38 = vadd.f32 %v552_v21, %v551_v49  ;;  %v531_v63 = vrot.slane %v530_v62, 4  ;;  %v559_v24 = vrot.slane %v558_v11, 4  ;;  %v721_v3 = vpop.f32.mrf.mxu1  ;;  %v992_v16 = vpop.f32.mrf.mxu0  ;;  %v4675_v17 = vld [vmem:[#allocation9_spill] sm:$0xff]  ;;  %v4676_v43 = vld [vmem:[#allocation10_spill] sm:$0xff] }
 0x101   : > { %v4054_v36 = vadd.f32 %v521_v28, %v520_v4  ;;  %v4056_v23 = vadd.f32 %v549_v33, %v548_v58  ;;  %v756_v52 = vmul.f32 %v717_v61, %v4673_v59  ;;  %v1027_v1 = vmul.f32 %v988_v20, %v4674_v27 }
 0x102   : > { %v526_v47 = vrot.slane %v525_v41, 2  ;;  %v554_v18 = vrot.slane %v553_v38, 2  ;;  %v532_v56 = vadd.f32 %v531_v63, %v530_v62  ;;  %v560_v35 = vadd.f32 %v559_v24, %v558_v11  ;;  %v723_v39 = vpop.f32.mrf.mxu1  ;;  %v994_v0 = vpop.f32.mrf.mxu0 }
 0x103   : > { %v757_v49 = vmul.f32 %v719_v42, %v4675_v17  ;;  %v1028_v21 = vmul.f32 %v990_v10, %v4676_v43  ;;  %v758_v30 = vmul.f32 %v721_v3, %v3766_v48  ;;  %v1029_v4 = vmul.f32 %v992_v16, %v3791_v8 }
 0x104   : > { %v527_v58 = vadd.f32 %v526_v47, %v525_v41  ;;  %v555_v28 = vadd.f32 %v554_v18, %v553_v38  ;;  %v533_v33 = vrot.slane %v532_v56, 2  ;;  %v561_v61 = vrot.slane %v560_v35, 2  ;;  %v727_v34 = vpop.f32.mrf.mxu1 }
 0x105   : > { %v772_v20 = vadd.f32 %v758_v30, %v756_v52  ;;  %v1043_v22 = vadd.f32 %v1029_v4, %v1027_v1  ;;  %v759_v62 = vmul.f32 %v723_v39, %v3798_v44  ;;  %v1030_v11 = vmul.f32 %v994_v0, %v3801_v45  ;;  %v998_v63 = vpop.f32.mrf.mxu0 }
 0x106   : > { %v528_v24 = vrot.slane %v527_v58, 1  ;;  %v556_v42 = vrot.slane %v555_v28, 1  ;;  %v534_v13 = vadd.f32 %v533_v33, %v532_v56  ;;  %v562_v10 = vadd.f32 %v561_v61, %v560_v35  ;;  %v729_v12 = vpop.f32.mrf.mxu1 }
 0x107   : > { %v773_v3 = vrot.slane %v772_v20, 4  ;;  %v1044_v9 = vrot.slane %v1043_v22, 4  ;;  %v779_v16 = vadd.f32 %v759_v62, %v757_v49  ;;  %v1050_v41 = vadd.f32 %v1030_v11, %v1028_v21  ;;  %v1000_v38 = vpop.f32.mrf.mxu0 }
 0x108   : > { %v4066_v47 = vadd.f32 %v528_v24, %v527_v58  ;;  %v4068_v18 = vadd.f32 %v556_v42, %v555_v28  ;;  %v535_v30 = vrot.slane %v534_v13, 1  ;;  %v563_v52 = vrot.slane %v562_v10, 1  ;;  %v731_v1 = vpop.f32.mrf.mxu1 }
 0x109   : > { %v774_v39 = vadd.f32 %v773_v3, %v772_v20  ;;  %v1045_v0 = vadd.f32 %v1044_v9, %v1043_v22  ;;  %v780_v4 = vrot.slane %v779_v16, 4  ;;  %v1051_v6 = vrot.slane %v1050_v41, 4  ;;  %v1002_v40 = vpop.f32.mrf.mxu0 }
 0x10a   : > { %v4070_v56 = vadd.f32 %v535_v30, %v534_v13  ;;  %v4072_v35 = vadd.f32 %v563_v52, %v562_v10  ;;  %v760_v49 = vmul.f32 %v727_v34, %v4673_v59  ;;  %v1031_v21 = vmul.f32 %v998_v63, %v4674_v27  ;;  %v733_v58 = vpop.f32.mrf.mxu1 }
 0x10b   : > { %v775_v33 = vrot.slane %v774_v39, 2  ;;  %v1046_v28 = vrot.slane %v1045_v0, 2  ;;  %v781_v61 = vadd.f32 %v780_v4, %v779_v16  ;;  %v1052_v62 = vadd.f32 %v1051_v6, %v1050_v41  ;;  %v1004_v11 = vpop.f32.mrf.mxu0 }
 0x10c   : > { %v761_v20 = vmul.f32 %v729_v12, %v4675_v17  ;;  %v1032_v9 = vmul.f32 %v1000_v38, %v4676_v43  ;;  %v762_v22 = vmul.f32 %v731_v1, %v3766_v48  ;;  %v1033_v13 = vmul.f32 %v1002_v40, %v3791_v8  ;;  %v737_v24 = vpop.f32.mrf.mxu1 }
 0x10d   : > { %v776_v42 = vadd.f32 %v775_v33, %v774_v39  ;;  %v1047_v10 = vadd.f32 %v1046_v28, %v1045_v0  ;;  %v782_v34 = vrot.slane %v781_v61, 2  ;;  %v1053_v3 = vrot.slane %v1052_v62, 2  ;;  %v1008_v63 = vpop.f32.mrf.mxu0 }
 0x10e   : > { %v786_v30 = vadd.f32 %v762_v22, %v760_v49  ;;  %v1057_v52 = vadd.f32 %v1033_v13, %v1031_v21  ;;  %v763_v16 = vmul.f32 %v733_v58, %v3798_v44  ;;  %v1034_v6 = vmul.f32 %v1004_v11, %v3801_v45  ;;  %v739_v41 = vpop.f32.mrf.mxu1 }
 0x10f   : > { %v777_v12 = vrot.slane %v776_v42, 1  ;;  %v1048_v4 = vrot.slane %v1047_v10, 1  ;;  %v783_v38 = vadd.f32 %v782_v34, %v781_v61  ;;  %v1054_v60 = vadd.f32 %v1053_v3, %v1052_v62  ;;  %v1010_v1 = vpop.f32.mrf.mxu0 }
 0x110   : > { %v787_v46 = vrot.slane %v786_v30, 4  ;;  %v1058_v40 = vrot.slane %v1057_v52, 4  ;;  %v793_v29 = vadd.f32 %v763_v16, %v761_v20  ;;  %v1064_v39 = vadd.f32 %v1034_v6, %v1032_v9  ;;  %v741_v0 = vpop.f32.mrf.mxu1 }
 0x111   : > { %v778_v33 = vadd.f32 %v777_v12, %v776_v42  ;;  %v1049_v28 = vadd.f32 %v1048_v4, %v1047_v10  ;;  %v784_v15 = vrot.slane %v783_v38, 1  ;;  %v1055_v49 = vrot.slane %v1054_v60, 1  ;;  %v1012_v21 = vpop.f32.mrf.mxu0 }
 0x112   : > { %v788_v22 = vadd.f32 %v787_v46, %v786_v30  ;;  %v1059_v58 = vadd.f32 %v1058_v40, %v1057_v52  ;;  %v794_v13 = vrot.slane %v793_v29, 4  ;;  %v1065_v11 = vrot.slane %v1064_v39, 4  ;;  %v743_v25 = vpop.f32.mrf.mxu1 }
 0x113   : > { %v828_v7 = vadd.f32 %v778_v33, %v4050_v31  ;;  %v785_v61 = vadd.f32 %v784_v15, %v783_v38  ;;  %v1056_v62 = vadd.f32 %v1055_v49, %v1054_v60  ;;  %v764_v34 = vmul.f32 %v737_v24, %v4673_v59  ;;  %v1014_v3 = vpop.f32.mrf.mxu0 }
 0x114   : > { %v789_v20 = vrot.slane %v788_v22, 2  ;;  %v1060_v9 = vrot.slane %v1059_v58, 2  ;;  %v795_v16 = vadd.f32 %v794_v13, %v793_v29  ;;  %v1066_v42 = vadd.f32 %v1065_v11, %v1064_v39  ;;  %v747_v10 = vpop.f32.mrf.mxu1 }
 0x115   : > { %v4084_v6 = vadd.f32 %v1049_v28, %v828_v7  ;;  %v829_v46 = vadd.f32 %v785_v61, %v4054_v36  ;;  %v1035_v30 = vmul.f32 %v1008_v63, %v4674_v27  ;;  %v765_v52 = vmul.f32 %v739_v41, %v4675_v17  ;;  %v1018_v12 = vpop.f32.mrf.mxu0 }
 0x116   : > { %v790_v31 = vadd.f32 %v789_v20, %v788_v22  ;;  %v1061_v15 = vadd.f32 %v1060_v9, %v1059_v58  ;;  %v796_v60 = vrot.slane %v795_v16, 2  ;;  %v1067_v4 = vrot.slane %v1066_v42, 2  ;;  %v749_v24 = vpop.f32.mrf.mxu1 }
 0x117   : > { %v4089_v38 = vadd.f32 %v1056_v62, %v829_v46  ;;  %v1036_v29 = vmul.f32 %v1010_v1, %v4676_v43  ;;  %v766_v40 = vmul.f32 %v741_v0, %v3766_v48  ;;  %v1037_v7 = vmul.f32 %v1012_v21, %v3791_v8  ;;  %v1020_v39 = vpop.f32.mrf.mxu0 }
 0x118   : > { %v791_v36 = vrot.slane %v790_v31, 1  ;;  %v1062_v33 = vrot.slane %v1061_v15, 1  ;;  %v797_v63 = vadd.f32 %v796_v60, %v795_v16  ;;  %v1068_v28 = vadd.f32 %v1067_v4, %v1066_v42  ;;  %v751_v41 = vpop.f32.mrf.mxu1 }
 0x119   : > { %v800_v49 = vadd.f32 %v766_v40, %v764_v34  ;;  %v1071_v22 = vadd.f32 %v1037_v7, %v1035_v30  ;;  %v767_v58 = vmul.f32 %v743_v25, %v3798_v44  ;;  %v1038_v13 = vmul.f32 %v1014_v3, %v3801_v45  ;;  %v1022_v11 = vpop.f32.mrf.mxu0 }
 0x11a   : > { %v792_v61 = vadd.f32 %v791_v36, %v790_v31  ;;  %v1063_v62 = vadd.f32 %v1062_v33, %v1061_v15  ;;  %v798_v1 = vrot.slane %v797_v63, 1  ;;  %v1069_v20 = vrot.slane %v1068_v28, 1  ;;  %v753_v0 = vpop.f32.mrf.mxu1 }
 0x11b   : > { %v801_v9 = vrot.slane %v800_v49, 4  ;;  %v1072_v21 = vrot.slane %v1071_v22, 4  ;;  %v807_v46 = vadd.f32 %v767_v58, %v765_v52  ;;  %v1078_v2 = vadd.f32 %v1038_v13, %v1036_v29  ;;  %v1024_v19 = vpop.f32.mrf.mxu0 }
 0x11c   : > { %v830_v16 = vadd.f32 %v792_v61, %v4066_v47  ;;  %v799_v42 = vadd.f32 %v798_v1, %v797_v63  ;;  %v1070_v34 = vadd.f32 %v1069_v20, %v1068_v28  ;;  %v768_v30 = vmul.f32 %v747_v10, %v4673_v59  ;;  %v1259_v25 = vpop.f32.mrf.mxu1 }
 0x11d   : > { %v802_v60 = vadd.f32 %v801_v9, %v800_v49  ;;  %v1073_v3 = vadd.f32 %v1072_v21, %v1071_v22  ;;  %v808_v4 = vrot.slane %v807_v46, 4  ;;  %v1079_v31 = vrot.slane %v1078_v2, 4  ;;  %v1530_v15 = vpop.f32.mrf.mxu0 }
 0x11e   : > { %v4098_v40 = vadd.f32 %v1063_v62, %v830_v16  ;;  %v831_v7 = vadd.f32 %v799_v42, %v4070_v56  ;;  %v1039_v52 = vmul.f32 %v1018_v12, %v4674_v27  ;;  %v769_v29 = vmul.f32 %v749_v24, %v4675_v17  ;;  %v1261_v36 = vpop.f32.mrf.mxu1 }
 0x11f   : > { %v803_v47 = vrot.slane %v802_v60, 2  ;;  %v1074_v33 = vrot.slane %v1073_v3, 2  ;;  %v809_v63 = vadd.f32 %v808_v4, %v807_v46  ;;  %v1080_v28 = vadd.f32 %v1079_v31, %v1078_v2  ;;  %v1532_v59 = vpop.f32.mrf.mxu0 }
 0x120   : > { %v4103_v10 = vadd.f32 %v1070_v34, %v831_v7  ;;  %v1040_v49 = vmul.f32 %v1020_v39, %v4676_v43  ;;  %v770_v22 = vmul.f32 %v751_v41, %v3766_v48  ;;  %v1041_v58 = vmul.f32 %v1022_v11, %v3791_v8  ;;  %v1263_v13 = vpop.f32.mrf.mxu1 }
 0x121   : > { %v804_v56 = vadd.f32 %v803_v47, %v802_v60  ;;  %v1075_v61 = vadd.f32 %v1074_v33, %v1073_v3  ;;  %v810_v27 = vrot.slane %v809_v63, 2  ;;  %v1081_v12 = vrot.slane %v1080_v28, 2  ;;  %v1534_v17 = vpop.f32.mrf.mxu0 }
 0x122   : > { %v814_v24 = vadd.f32 %v770_v22, %v768_v30  ;;  %v1085_v62 = vadd.f32 %v1041_v58, %v1039_v52  ;;  %v771_v1 = vmul.f32 %v753_v0, %v3798_v44  ;;  %v1042_v2 = vmul.f32 %v1024_v19, %v3801_v45  ;;  %v1265_v20 = vpop.f32.mrf.mxu1 }
 0x123   : > { %v805_v9 = vrot.slane %v804_v56, 1  ;;  %v1076_v21 = vrot.slane %v1075_v61, 1  ;;  %v811_v43 = vadd.f32 %v810_v27, %v809_v63  ;;  %v1082_v39 = vadd.f32 %v1081_v12, %v1080_v28  ;;  %v1536_v48 = vpop.f32.mrf.mxu0 }
 0x124   : > { %v815_v41 = vrot.slane %v814_v24, 4  ;;  %v1086_v8 = vrot.slane %v1085_v62, 4  ;;  %v821_v11 = vadd.f32 %v771_v1, %v769_v29  ;;  %v1092_v46 = vadd.f32 %v1042_v2, %v1040_v49  ;;  %v1269_v16 = vpop.f32.mrf.mxu1 }
 0x125   : > { %v806_v42 = vadd.f32 %v805_v9, %v804_v56  ;;  %v1077_v34 = vadd.f32 %v1076_v21, %v1075_v61  ;;  %v812_v60 = vrot.slane %v811_v43, 1  ;;  %v1083_v30 = vrot.slane %v1082_v39, 1  ;;  %v4110_v3 = vpop.f32.mrf.mxu0 }
 0x126   : > { %v816_v44 = vadd.f32 %v815_v41, %v814_v24  ;;  %v1087_v0 = vadd.f32 %v1086_v8, %v1085_v62  ;;  %v822_v19 = vrot.slane %v821_v11, 4  ;;  %v1093_v45 = vrot.slane %v1092_v46, 4  ;;  %v1271_v4 = vpop.f32.mrf.mxu1 }
 0x127   : > { %v832_v31 = vadd.f32 %v806_v42, %v4052_v54  ;;  %v813_v7 = vadd.f32 %v812_v60, %v811_v43  ;;  %v1084_v52 = vadd.f32 %v1083_v30, %v1082_v39  ;;  %v1298_v47 = vmul.f32 %v1259_v25, %v3804_v57  ;;  %v1542_v29 = vpop.f32.mrf.mxu0 }
 0x128   : > { %v817_v33 = vrot.slane %v816_v44, 2  ;;  %v1088_v63 = vrot.slane %v1087_v0, 2  ;;  %v823_v28 = vadd.f32 %v822_v19, %v821_v11  ;;  %v1094_v49 = vadd.f32 %v1093_v45, %v1092_v46  ;;  %v1273_v22 = vpop.f32.mrf.mxu1 }
 0x129   : > { %v4114_v58 = vadd.f32 %v1077_v34, %v832_v31  ;;  %v833_v56 = vadd.f32 %v813_v7, %v4056_v23  ;;  %v1569_v61 = vmul.f32 %v1530_v15, %v3809_v26  ;;  %v1299_v27 = vmul.f32 %v1261_v36, %v3818_v55  ;;  %v1544_v12 = vpop.f32.mrf.mxu0 }
 0x12a   : > { %v818_v54 = vadd.f32 %v817_v33, %v816_v44  ;;  %v1089_v24 = vadd.f32 %v1088_v63, %v1087_v0  ;;  %v824_v62 = vrot.slane %v823_v28, 2  ;;  %v1095_v1 = vrot.slane %v1094_v49, 2  ;;  %v1275_v25 = vpop.f32.mrf.mxu1 }
 0x12b   : > { %v4119_v2 = vadd.f32 %v1084_v52, %v833_v56  ;;  %v1570_v9 = vmul.f32 %v1532_v59, %v3864_v50  ;;  %v1300_v21 = vmul.f32 %v1263_v13, %v3914_v5  ;;  %v1571_v43 = vmul.f32 %v1534_v17, %v3927_v32  ;;  %v1546_v39 = vpop.f32.mrf.mxu0 }
 0x12c   : > { %v819_v23 = vrot.slane %v818_v54, 1  ;;  %v1090_v41 = vrot.slane %v1089_v24, 1  ;;  %v825_v15 = vadd.f32 %v824_v62, %v823_v28  ;;  %v1096_v8 = vadd.f32 %v1095_v1, %v1094_v49  ;;  %v4124_v36 = vpop.f32.mrf.mxu1 }
 0x12d   : > { %v1314_v11 = vadd.f32 %v1300_v21, %v1298_v47  ;;  %v1585_v46 = vadd.f32 %v1571_v43, %v1569_v61  ;;  %v1301_v42 = vmul.f32 %v1265_v20, %v3930_v51  ;;  %v1572_v34 = vmul.f32 %v1536_v48, %v3934_v53  ;;  %v4128_v60 = vpop.f32.mrf.mxu0 }
 0x12e   : > { %v820_v59 = vadd.f32 %v819_v23, %v818_v54  ;;  %v1091_v30 = vadd.f32 %v1090_v41, %v1089_v24  ;;  %v826_v13 = vrot.slane %v825_v15, 1  ;;  %v1097_v44 = vrot.slane %v1096_v8, 1  ;;  %v4130_v17 = vpop.f32.mrf.mxu1 }
 0x12f   : > { %v1315_v0 = vrot.slane %v1314_v11, 4  ;;  %v1586_v19 = vrot.slane %v1585_v46, 4  ;;  %v1321_v45 = vadd.f32 %v1301_v42, %v1299_v27  ;;  %v1592_v31 = vadd.f32 %v1572_v34, %v1570_v9  ;;  %v4132_v7 = vpop.f32.mrf.mxu0 }
 0x130   : > { %v834_v52 = vadd.f32 %v820_v59, %v4068_v18  ;;  %v827_v47 = vadd.f32 %v826_v13, %v825_v15  ;;  %v1098_v20 = vadd.f32 %v1097_v44, %v1096_v8  ;;  %v1302_v48 = vmul.f32 %v1269_v16, %v3804_v57  ;;  %v4136_v33 = vpop.f32.mrf.mxu1 }
 0x131   : > { %v1316_v63 = vadd.f32 %v1315_v0, %v1314_v11  ;;  %v1587_v28 = vadd.f32 %v1586_v19, %v1585_v46  ;;  %v1322_v49 = vrot.slane %v1321_v45, 4  ;;  %v1593_v56 = vrot.slane %v1592_v31, 4  ;;  %v4138_v61 = vpop.f32.mrf.mxu0 }
 0x132   : > { %v4140_v54 = vadd.f32 %v1091_v30, %v834_v52  ;;  %v835_v27 = vadd.f32 %v827_v47, %v4072_v35  ;;  %v1573_v24 = vmul.f32 %v4110_v3, %v3809_v26  ;;  %v1303_v18 = vmul.f32 %v1271_v4, %v3818_v55  ;;  %v4146_v62 = vpop.f32.mrf.mxu1 }
 0x133   : > { %v1317_v16 = vrot.slane %v1316_v63, 2  ;;  %v1588_v1 = vrot.slane %v1587_v28, 2  ;;  %v1323_v9 = vadd.f32 %v1322_v49, %v1321_v45  ;;  %v1594_v21 = vadd.f32 %v1593_v56, %v1592_v31  ;;  %v4148_v43 = vpop.f32.mrf.mxu0 }
 0x134   : > { %v4150_v23 = vadd.f32 %v1098_v20, %v835_v27  ;;  %v1574_v41 = vmul.f32 %v1542_v29, %v3864_v50  ;;  %v1304_v15 = vmul.f32 %v1273_v22, %v3914_v5  ;;  %v1575_v35 = vmul.f32 %v1544_v12, %v3927_v32  ;;  %v4155_v8 = vpop.f32.mrf.mxu1 }
 0x135   : > { %v1318_v3 = vadd.f32 %v1317_v16, %v1316_v63  ;;  %v1589_v4 = vadd.f32 %v1588_v1, %v1587_v28  ;;  %v1324_v11 = vrot.slane %v1323_v9, 2  ;;  %v1595_v46 = vrot.slane %v1594_v21, 2  ;;  %v4157_v42 = vpop.f32.mrf.mxu0 }
 0x136   : > { %v1328_v34 = vadd.f32 %v1304_v15, %v1302_v48  ;;  %v1599_v59 = vadd.f32 %v1575_v35, %v1573_v24  ;;  %v1305_v30 = vmul.f32 %v1275_v25, %v3930_v51  ;;  %v1576_v13 = vmul.f32 %v1546_v39, %v3934_v53  ;;  %v4161_v44 = vpop.f32.mrf.mxu1 }
 0x137   : > { %v1319_v29 = vrot.slane %v1318_v3, 1  ;;  %v1590_v22 = vrot.slane %v1589_v4, 1  ;;  %v1325_v0 = vadd.f32 %v1324_v11, %v1323_v9  ;;  %v1596_v12 = vadd.f32 %v1595_v46, %v1594_v21  ;;  %v4163_v19 = vpop.f32.mrf.mxu0 }
 0x138   : > { %v1329_v45 = vrot.slane %v1328_v34, 4  ;;  %v1600_v31 = vrot.slane %v1599_v59, 4  ;;  %v1335_v52 = vadd.f32 %v1305_v30, %v1303_v18  ;;  %v1606_v47 = vadd.f32 %v1576_v13, %v1574_v41  ;;  %v4165_v20 = vpop.f32.mrf.mxu1 }
 0x139   : > { %v1320_v48 = vadd.f32 %v1319_v29, %v1318_v3  ;;  %v1591_v63 = vadd.f32 %v1590_v22, %v1589_v4  ;;  %v1326_v28 = vrot.slane %v1325_v0, 1  ;;  %v1597_v25 = vrot.slane %v1596_v12, 1  ;;  %v4167_v49 = vpop.f32.mrf.mxu0 }
 0x13a   : > { %v1330_v39 = vadd.f32 %v1329_v45, %v1328_v34  ;;  %v1601_v56 = vadd.f32 %v1600_v31, %v1599_v59  ;;  %v1336_v27 = vrot.slane %v1335_v52, 4  ;;  %v1607_v24 = vrot.slane %v1606_v47, 4  ;;  %v4169_v16 = vpop.f32.mrf.mxu1 }
 0x13b   : > { %v1370_v1 = vadd.f32 %v1320_v48, %v4084_v6  ;;  %v1327_v9 = vadd.f32 %v1326_v28, %v1325_v0  ;;  %v1598_v21 = vadd.f32 %v1597_v25, %v1596_v12  ;;  %v1306_v18 = vmul.f32 %v4124_v36, %v3804_v57  ;;  %v4174_v41 = vpop.f32.mrf.mxu0 }
 0x13c   : > { %v1331_v15 = vrot.slane %v1330_v39, 2  ;;  %v1602_v35 = vrot.slane %v1601_v56, 2  ;;  %v1337_v3 = vadd.f32 %v1336_v27, %v1335_v52  ;;  %v1608_v4 = vadd.f32 %v1607_v24, %v1606_v47  ;;  %v4176_v11 = vpop.f32.mrf.mxu1 }
 0x13d   : > { %v4178_v46 = vadd.f32 %v1591_v63, %v1370_v1  ;;  %v1371_v34 = vadd.f32 %v1327_v9, %v4089_v38  ;;  %v1577_v6 = vmul.f32 %v4128_v60, %v3809_v26  ;;  %v1307_v59 = vmul.f32 %v4130_v17, %v3818_v55  ;;  %v4185_v30 = vpop.f32.mrf.mxu0 }
 0x13e   : > { %v1332_v36 = vadd.f32 %v1331_v15, %v1330_v39  ;;  %v1603_v13 = vadd.f32 %v1602_v35, %v1601_v56  ;;  %v1338_v29 = vrot.slane %v1337_v3, 2  ;;  %v1609_v22 = vrot.slane %v1608_v4, 2  ;;  %v4187_v0 = vpop.f32.mrf.mxu1 }
 0x13f   : > { %v4189_v12 = vadd.f32 %v1598_v21, %v1371_v34  ;;  %v1578_v45 = vmul.f32 %v4132_v7, %v3864_v50  ;;  %v1308_v38 = vmul.f32 %v4136_v33, %v3914_v5  ;;  %v1579_v60 = vmul.f32 %v4138_v61, %v3927_v32  ;;  %v4197_v17 = vpop.f32.mrf.mxu0 }
 0x140   : > { %v1333_v31 = vrot.slane %v1332_v36, 1  ;;  %v1604_v52 = vrot.slane %v1603_v13, 1  ;;  %v1339_v47 = vadd.f32 %v1338_v29, %v1337_v3  ;;  %v1610_v48 = vadd.f32 %v1609_v22, %v1608_v4  ;;  %v4199_v63 = vpop.f32.mrf.mxu1 }
 0x141   : > { %v1342_v28 = vadd.f32 %v1308_v38, %v1306_v18  ;;  %v1613_v25 = vadd.f32 %v1579_v60, %v1577_v6  ;;  %v1309_v39 = vmul.f32 %v4146_v62, %v3930_v51  ;;  %v1580_v7 = vmul.f32 %v4148_v43, %v3934_v53  ;;  %v4205_v33 = vpop.f32.mrf.mxu0 }
 0x142   : > { %v1334_v56 = vadd.f32 %v1333_v31, %v1332_v36  ;;  %v1605_v61 = vadd.f32 %v1604_v52, %v1603_v13  ;;  %v1340_v27 = vrot.slane %v1339_v47, 1  ;;  %v1611_v24 = vrot.slane %v1610_v48, 1  ;;  %v4207_v1 = vpop.f32.mrf.mxu1 }
 0x143   : > { %v1343_v9 = vrot.slane %v1342_v28, 4  ;;  %v1614_v21 = vrot.slane %v1613_v25, 4  ;;  %v1349_v15 = vadd.f32 %v1309_v39, %v1307_v59  ;;  %v1620_v35 = vadd.f32 %v1580_v7, %v1578_v45  ;;  %v4209_v18 = vpop.f32.mrf.mxu0 }
 0x144   : > { %v1372_v3 = vadd.f32 %v1334_v56, %v4098_v40  ;;  %v1341_v62 = vadd.f32 %v1340_v27, %v1339_v47  ;;  %v1612_v4 = vadd.f32 %v1611_v24, %v1610_v48  ;;  %v1310_v43 = vmul.f32 %v4155_v8, %v3804_v57  ;;  %v4214_v34 = vpop.f32.mrf.mxu1 }
 0x145   : > { %v1344_v6 = vadd.f32 %v1343_v9, %v1342_v28  ;;  %v1615_v36 = vadd.f32 %v1614_v21, %v1613_v25  ;;  %v1350_v13 = vrot.slane %v1349_v15, 4  ;;  %v1621_v29 = vrot.slane %v1620_v35, 4  ;;  %v4216_v22 = vpop.f32.mrf.mxu0 }
 0x146   : > { %v4218_v38 = vadd.f32 %v1605_v61, %v1372_v3  ;;  %v1373_v59 = vadd.f32 %v1341_v62, %v4103_v10  ;;  %v1581_v40 = vmul.f32 %v4157_v42, %v3809_v26  ;;  %v1311_v45 = vmul.f32 %v4161_v44, %v3818_v55  ;;  %v4225_v60 = vpop.f32.mrf.mxu1 }
 0x147   : > { %v1345_v57 = vrot.slane %v1344_v6, 2  ;;  %v1616_v8 = vrot.slane %v1615_v36, 2  ;;  %v1351_v31 = vadd.f32 %v1350_v13, %v1349_v15  ;;  %v1622_v52 = vadd.f32 %v1621_v29, %v1620_v35  ;;  %v4227_v47 = vpop.f32.mrf.mxu0 }
 0x148   : > { %v4229_v48 = vadd.f32 %v1612_v4, %v1373_v59  ;;  %v1582_v28 = vmul.f32 %v4163_v19, %v3864_v50  ;;  %v1312_v10 = vmul.f32 %v4165_v20, %v3914_v5  ;;  %v1583_v26 = vmul.f32 %v4167_v49, %v3927_v32  ;;  %v4237_v55 = vpop.f32.mrf.mxu1 }
 0x149   : > { %v1346_v42 = vadd.f32 %v1345_v57, %v1344_v6  ;;  %v1617_v44 = vadd.f32 %v1616_v8, %v1615_v36  ;;  %v1352_v25 = vrot.slane %v1351_v31, 2  ;;  %v1623_v39 = vrot.slane %v1622_v52, 2  ;;  %v4239_v7 = vpop.f32.mrf.mxu0 }
 0x14a   : > { %v1356_v56 = vadd.f32 %v1312_v10, %v1310_v43  ;;  %v1627_v61 = vadd.f32 %v1583_v26, %v1581_v40  ;;  %v1313_v27 = vmul.f32 %v4169_v16, %v3930_v51  ;;  %v1584_v50 = vmul.f32 %v4174_v41, %v3934_v53  ;;  %v4245_v5 = vpop.f32.mrf.mxu1  ;;  %v4677_v53 = vld [vmem:[#allocation4_spill] sm:$0xff] }
 0x14b   : > { %v1347_v19 = vrot.slane %v1346_v42, 1  ;;  %v1618_v32 = vrot.slane %v1617_v44, 1  ;;  %v1353_v20 = vadd.f32 %v1352_v25, %v1351_v31  ;;  %v1624_v49 = vadd.f32 %v1623_v39, %v1622_v52  ;;  %v4247_v24 = vpop.f32.mrf.mxu0  ;;  %v4678_v41 = vld [vmem:[#allocation16_spill] sm:$0xff] }
 0x14c   : > { %v1357_v9 = vrot.slane %v1356_v56, 4  ;;  %v1628_v21 = vrot.slane %v1627_v61, 4  ;;  %v1363_v15 = vadd.f32 %v1313_v27, %v1311_v45  ;;  %v1634_v35 = vadd.f32 %v1584_v50, %v1582_v28  ;;  %v4249_v3 = vpop.f32.mrf.mxu1  ;;  %v4680_v31 = vld [vmem:[#allocation32_spill] sm:$0xff] }
 0x14d   : > { %v1348_v62 = vadd.f32 %v1347_v19, %v1346_v42  ;;  %v1354_v4 = vrot.slane %v1353_v20, 1  ;;  %v1625_v51 = vrot.slane %v1624_v49, 1  ;;  %v4251_v16 = vpop.f32.mrf.mxu0  ;;  %v4257_v43 = vrot.slane %v4678_v41, %v4677_v53 }
 0x14e   : > { %v1358_v6 = vadd.f32 %v1357_v9, %v1356_v56  ;;  %v1629_v36 = vadd.f32 %v1628_v21, %v1627_v61  ;;  %v1364_v13 = vrot.slane %v1363_v15, 4  ;;  %v1635_v29 = vrot.slane %v1634_v35, 4  ;;  %v4259_v59 = vpop.f32.mrf.mxu1  ;;  %v4682_v61 = vld [vmem:[#allocation13_spill] sm:$0xff]  ;;  %v4684_v9 = vld [vmem:[#allocation14_spill] sm:$0xff] }
 0x14f   : > { %4679 = vst [vmem:[#allocation7_spill] sm:$0xff] %v4257_v43  ;;  %v1374_v40 = vadd.f32 %v1348_v62, %v4114_v58  ;;  %v1619_v45 = vadd.f32 %v1618_v32, %v1617_v44  ;;  %v1355_v57 = vadd.f32 %v1354_v4, %v1353_v20  ;;  %v4262_v8 = vpop.f32.mrf.mxu0  ;;  %vm2574_vm8 = vcmp.eq.f32.partialorder %v3079_v14, %v4680_v31  ;;  %v4686_v62 = vld [vmem:[#allocation24_spill] sm:$0xff] }
 0x150   : > { %v1359_v52 = vrot.slane %v1358_v6, 2  ;;  %v1630_v28 = vrot.slane %v1629_v36, 2  ;;  %v1365_v10 = vadd.f32 %v1364_v13, %v1363_v15  ;;  %v1636_v26 = vadd.f32 %v1635_v29, %v1634_v35  ;;  %v4266_v42 = vpop.f32.mrf.mxu1  ;;  %v4685_v15 = vld [vmem:[#allocation23_spill] sm:$0xff] }
 0x151   : > { %v4268_v25 = vadd.f32 %v1619_v45, %v1374_v40  ;;  %v1375_v39 = vadd.f32 %v1355_v57, %v4119_v2  ;;  %v1626_v56 = vadd.f32 %v1625_v51, %v1624_v49  ;;  %v1840_v58 = vmul.f32 %v4176_v11, %v4682_v61  ;;  %v4273_v32 = vpop.f32.mrf.mxu0  ;;  %v4687_v51 = vld [vmem:[#allocation15_spill] sm:$0xff]  ;;  %v4689_v40 = vld [vmem:[#allocation25_spill] sm:$0xff]  ;;  %v4690_v45 = vld [vmem:[#allocation26_spill] sm:$0xff] }
 0x152   : > { %v1360_v44 = vadd.f32 %v1359_v52, %v1358_v6  ;;  %v1631_v27 = vadd.f32 %v1630_v28, %v1629_v36  ;;  %v1366_v50 = vrot.slane %v1365_v10, 2  ;;  %v1637_v19 = vrot.slane %v1636_v26, 2  ;;  %v4283_v49 = vpop.f32.mrf.mxu1  ;;  %v4688_v6 = vld [vmem:[#allocation17_spill] sm:$0xff] }
 0x153   : > { %4681 = vst [vmem:[#allocation8_spill] sm:$0xff] %v4268_v25  ;;  %v4275_v20 = vadd.f32 %v1626_v56, %v1375_v39  ;;  %v2123_v21 = vmul.f32 %v4185_v30, %v4684_v9  ;;  %v1842_v35 = vmul.f32 %v4199_v63, %v4685_v15  ;;  %v2125_v2 = vmul.f32 %v4205_v33, %v4686_v62  ;;  %v4293_v28 = vpop.f32.mrf.mxu0  ;;  %v4692_v39 = vld [vmem:[#allocation28_spill] sm:$0xff] }
 0x154   : > { %v1361_v11 = vrot.slane %v1360_v44, 1  ;;  %v1367_v4 = vadd.f32 %v1366_v50, %v1365_v10  ;;  %v1841_v41 = vmul.f32 %v4187_v0, %v4687_v51  ;;  %v2124_v36 = vmul.f32 %v4197_v17, %v4688_v6  ;;  %v4691_v10 = vld [vmem:[#allocation27_spill] sm:$0xff] }
 0x155   : > { %4683 = vst [vmem:[#allocation9_spill] sm:$0xff] %v4275_v20  ;;  %v1856_v13 = vadd.f32 %v1842_v35, %v1840_v58  ;;  %v2139_v29 = vadd.f32 %v2125_v2, %v2123_v21  ;;  %v1843_v30 = vmul.f32 %v4207_v1, %v4689_v40  ;;  %v2126_v63 = vmul.f32 %v4209_v18, %v4690_v45  ;;  %v4299_v21 = vpop.f32.mrf.mxu1  ;;  %v4694_v1 = vld [vmem:[#allocation31_spill] sm:$0xff] }
 0x156   : > { %v1632_v57 = vrot.slane %v1631_v27, 1  ;;  %v1368_v33 = vrot.slane %v1367_v4, 1  ;;  %v1638_v52 = vadd.f32 %v1637_v19, %v1636_v26  ;;  %v4297_v56 = vmul.f32 %v4692_v39, %v4691_v10  ;;  %v4695_v19 = vld [vmem:[#allocation5_spill] sm:$0xff]  ;;  %v4696_v2 = vld [vmem:[#allocation11_spill] sm:$0xff] }
 0x157   : > { %v1857_v0 = vrot.slane %v1856_v13, 4  ;;  %v2140_v50 = vrot.slane %v2139_v29, 4  ;;  %v1863_v17 = vadd.f32 %v1843_v30, %v1841_v41  ;;  %v2146_v58 = vadd.f32 %v2126_v63, %v2124_v36 }
 0x158   : > { %4693 = vst [vmem:[#allocation10_spill] sm:$0xff] %v4297_v56  ;;  %v1362_v35 = vadd.f32 %v1361_v11, %v1360_v44  ;;  %v2562_v18 = vsel %vm2550_vm7, %v4694_v1, 0.0  ;;  %v2586_v26 = vsel %vm2574_vm8, %v4257_v43, 0.0  ;;  %v4311_v10 = vrot.slane %v4696_v2, %v4695_v19  ;;  %v4315_v1 = vpop.f32.mrf.mxu0  ;;  %v4319_v2 = vpop.f32.mrf.mxu1 }
 0x159   : > { %v1858_v39 = vadd.f32 %v1857_v0, %v1856_v13  ;;  %v2141_v41 = vadd.f32 %v2140_v50, %v2139_v29  ;;  %v1864_v36 = vrot.slane %v1863_v17, 4  ;;  %v2147_v30 = vrot.slane %v2146_v58, 4 }
 0x15a   : > { %4697 = vst [vmem:[#allocation16_spill] sm:$0xff] %v4311_v10  ;;  %v1633_v63 = vadd.f32 %v1632_v57, %v1631_v27  ;;  %v1369_v44 = vadd.f32 %v1368_v33, %v1367_v4  ;;  %v1639_v11 = vrot.slane %v1638_v52, 1  ;;  %v1844_v37 = vmul.f32 %v4214_v34, %v4682_v61 }
 0x15b   : > { %v1859_v53 = vrot.slane %v1858_v39, 2  ;;  %v1865_v56 = vadd.f32 %v1864_v36, %v1863_v17  ;;  %v2148_v31 = vadd.f32 %v2147_v30, %v2146_v58  ;;  %v2127_v43 = vmul.f32 %v4216_v22, %v4684_v9  ;;  %v4333_v58 = vpop.f32.mrf.mxu0  ;;  %v4337_v36 = vpop.f32.mrf.mxu1 }
 0x15c   : > { %v2142_v13 = vrot.slane %v2141_v41, 2  ;;  %v1845_v29 = vmul.f32 %v4225_v60, %v4687_v51  ;;  %v1846_v27 = vmul.f32 %v4237_v55, %v4685_v15  ;;  %v2129_v34 = vmul.f32 %v4239_v7, %v4686_v62 }
 0x15d   : > { %v1860_v4 = vadd.f32 %v1859_v53, %v1858_v39  ;;  %v1866_v57 = vrot.slane %v1865_v56, 2  ;;  %v2149_v33 = vrot.slane %v2148_v31, 2  ;;  %v2128_v0 = vmul.f32 %v4227_v47, %v4688_v6  ;;  %v4339_v25 = vpop.f32.mrf.mxu0 }
 0x15e   : > { %v1870_v50 = vadd.f32 %v1846_v27, %v1844_v37  ;;  %v2153_v22 = vadd.f32 %v2129_v34, %v2127_v43  ;;  %v1847_v17 = vmul.f32 %v4245_v5, %v4689_v40  ;;  %v2130_v60 = vmul.f32 %v4247_v24, %v4690_v45 }
 0x15f   : > { %v1376_v55 = vadd.f32 %v1362_v35, %v4140_v54  ;;  %v1377_v7 = vadd.f32 %v1369_v44, %v4150_v23  ;;  %v1861_v53 = vrot.slane %v1860_v4, 1  ;;  %v1867_v39 = vadd.f32 %v1866_v57, %v1865_v56  ;;  %v4343_v56 = vpop.f32.mrf.mxu1  ;;  %v4698_v44 = vld [vmem:[#allocation30_spill] sm:$0xff] }
 0x160   : > { %v1871_v30 = vrot.slane %v1870_v50, 4  ;;  %v2154_v47 = vrot.slane %v2153_v22, 4  ;;  %v1877_v37 = vadd.f32 %v1847_v17, %v1845_v29  ;;  %v2160_v43 = vadd.f32 %v2130_v60, %v2128_v0 }
 0x161   : > { %v1862_v27 = vadd.f32 %v1861_v53, %v1860_v4  ;;  %v2143_v34 = vadd.f32 %v2142_v13, %v2141_v41  ;;  %v1868_v5 = vrot.slane %v1867_v39, 1  ;;  %v2150_v19 = vadd.f32 %v2149_v33, %v2148_v31 }
 0x162   : > { %v1872_v14 = vadd.f32 %v1871_v30, %v1870_v50  ;;  %v2155_v24 = vadd.f32 %v2154_v47, %v2153_v22  ;;  %v1878_v10 = vrot.slane %v1877_v37, 4  ;;  %v2161_v20 = vrot.slane %v2160_v43, 4 }
 0x163   : > { %v4341_v54 = vadd.f32 %v1633_v63, %v1376_v55  ;;  %v1640_v23 = vadd.f32 %v1639_v11, %v1638_v52  ;;  %v4345_v35 = vadd.f32 %v2586_v26, %v2562_v18  ;;  %v2216_v29 = vsub.f32 1.0, %v4698_v44  ;;  %v2120_v11 = vpop.f32.mrf.mxu0 }
 0x164   : > { %v1873_v57 = vrot.slane %v1872_v14, 2  ;;  %v2156_v4 = vrot.slane %v2155_v24, 2  ;;  %v1879_v41 = vadd.f32 %v1878_v10, %v1877_v37  ;;  %v2162_v13 = vadd.f32 %v2161_v20, %v2160_v43 }
 0x165   : > { %v4348_v31 = vadd.f32 %v1640_v23, %v1377_v7  ;;  %v1912_v33 = vadd.f32 %v1862_v27, %v4178_v46  ;;  %v2144_v0 = vrot.slane %v2143_v34, 1  ;;  %v2151_v50 = vrot.slane %v2150_v19, 1  ;;  %v4359_v46 = vpop.f32.mrf.mxu1  ;;  %v4369_v37 = vpop.f32.mrf.mxu0 }
 0x166   : > { %v1869_v22 = vadd.f32 %v1868_v5, %v1867_v39  ;;  %v1874_v63 = vadd.f32 %v1873_v57, %v1872_v14  ;;  %v2157_v17 = vadd.f32 %v2156_v4, %v2155_v24  ;;  %v1880_v52 = vrot.slane %v1879_v41, 2 }
 0x167   : > { %v1848_v18 = vmul.f32 %v4249_v3, %v4682_v61  ;;  %v2131_v26 = vmul.f32 %v4251_v16, %v4684_v9  ;;  %v1850_v20 = vmul.f32 %v4266_v42, %v4685_v15  ;;  %v2133_v10 = vmul.f32 %v4273_v32, %v4686_v62  ;;  %v4371_v24 = vpop.f32.mrf.mxu1 }
 0x168   : > { %v1881_v60 = vadd.f32 %v1880_v52, %v1879_v41  ;;  %v2163_v55 = vrot.slane %v2162_v13, 2  ;;  %v1849_v14 = vmul.f32 %v4259_v59, %v4687_v51  ;;  %v2132_v7 = vmul.f32 %v4262_v8, %v4688_v6 }
 0x169   : > { %v1884_v3 = vadd.f32 %v1850_v20, %v1848_v18  ;;  %v2167_v53 = vadd.f32 %v2133_v10, %v2131_v26  ;;  %v1851_v16 = vmul.f32 %v4283_v49, %v4689_v40  ;;  %v2134_v42 = vmul.f32 %v4293_v28, %v4690_v45  ;;  %v4378_v20 = vpop.f32.mrf.mxu0 }
 0x16a   : > { %v2145_v39 = vadd.f32 %v2144_v0, %v2143_v34  ;;  %v1875_v32 = vrot.slane %v1874_v63, 1  ;;  %v2158_v30 = vrot.slane %v2157_v17, 1  ;;  %v1882_v47 = vrot.slane %v1881_v60, 1 }
 0x16b   : > { %v1885_v43 = vrot.slane %v1884_v3, 4  ;;  %v2168_v27 = vrot.slane %v2167_v53, 4  ;;  %v1891_v59 = vadd.f32 %v1851_v16, %v1849_v14  ;;  %v2174_v5 = vadd.f32 %v2134_v42, %v2132_v7  ;;  %v4380_v16 = vpop.f32.mrf.mxu1 }
 0x16c   : > { %v4373_v8 = vadd.f32 %v2145_v39, %v1912_v33  ;;  %v1913_v23 = vadd.f32 %v1869_v22, %v4189_v12  ;;  %v2152_v49 = vadd.f32 %v2151_v50, %v2150_v19  ;;  %v2164_v57 = vadd.f32 %v2163_v55, %v2162_v13 }
 0x16d   : > { %v1886_v4 = vadd.f32 %v1885_v43, %v1884_v3  ;;  %v2169_v28 = vadd.f32 %v2168_v27, %v2167_v53  ;;  %v1892_v34 = vrot.slane %v1891_v59, 4  ;;  %v2175_v41 = vrot.slane %v2174_v5, 4 }
 0x16e   : > { %v1876_v0 = vadd.f32 %v1875_v32, %v1874_v63  ;;  %v2159_v52 = vadd.f32 %v2158_v30, %v2157_v17  ;;  %v1883_v18 = vadd.f32 %v1882_v47, %v1881_v60  ;;  %v1852_v26 = vmul.f32 %v4299_v21, %v4682_v61 }
 0x16f   : > { %v1887_v10 = vrot.slane %v1886_v4, 2  ;;  %v2170_v14 = vrot.slane %v2169_v28, 2  ;;  %v1893_v33 = vadd.f32 %v1892_v34, %v1891_v59  ;;  %v2176_v7 = vadd.f32 %v2175_v41, %v2174_v5 }
 0x170   : > { %v2135_v12 = vmul.f32 %v4315_v1, %v4684_v9  ;;  %v1853_v19 = vmul.f32 %v4319_v2, %v4687_v51  ;;  %v1854_v13 = vmul.f32 %v4337_v36, %v4685_v15  ;;  %v2137_v61 = vmul.f32 %v4339_v25, %v4686_v62  ;;  %v4395_v51 = vpop.f32.mrf.mxu0  ;;  %v4397_v25 = vpop.f32.mrf.mxu1 }
 0x171   : > { %v1888_v21 = vadd.f32 %v1887_v10, %v1886_v4  ;;  %v1894_v50 = vrot.slane %v1893_v33, 2  ;;  %v2177_v22 = vrot.slane %v2176_v7, 2  ;;  %v2136_v63 = vmul.f32 %v4333_v58, %v4688_v6  ;;  %v4700_v10 = vld [vmem:[#allocation9_spill] sm:$0xff] }
 0x172   : > { %v1898_v17 = vadd.f32 %v1854_v13, %v1852_v26  ;;  %v2181_v60 = vadd.f32 %v2137_v61, %v2135_v12  ;;  %v1855_v9 = vmul.f32 %v4343_v56, %v4689_v40  ;;  %v2138_v1 = vmul.f32 %v2120_v11, %v4690_v45  ;;  %v4400_v30 = vpop.f32.mrf.mxu0  ;;  %v4403_v5 = vpop.f32.mrf.mxu1  ;;  %v4703_v13 = vld [vmem:[#allocation16_spill] sm:$0xff] }
 0x173   : > { %v1889_v2 = vrot.slane %v1888_v21, 1  ;;  %v2171_v15 = vadd.f32 %v2170_v14, %v2169_v28  ;;  %v1895_v36 = vadd.f32 %v1894_v50, %v1893_v33  ;;  %v2178_v55 = vadd.f32 %v2177_v22, %v2176_v7  ;;  %v4701_v33 = vld [vmem:[#allocation3_spill] sm:$0xff]  ;;  %v4702_v7 = vld [vmem:[#allocation22_spill] sm:$0xff] }
 0x174   : > { %v1899_v62 = vrot.slane %v1898_v17, 4  ;;  %v2182_v3 = vrot.slane %v2181_v60, 4  ;;  %v1905_v53 = vadd.f32 %v1855_v9, %v1853_v19  ;;  %v2188_v42 = vadd.f32 %v2138_v1, %v2136_v63 }
 0x175   : > { %v1914_v6 = vadd.f32 %v1876_v0, %v4218_v38  ;;  %v2165_v58 = vrot.slane %v2164_v57, 1  ;;  %v1890_v39 = vadd.f32 %v1889_v2, %v1888_v21  ;;  %v1896_v32 = vrot.slane %v1895_v36, 1  ;;  %v4699_v0 = vld [vmem:[#allocation8_spill] sm:$0xff]  ;;  %v4419_v21 = vpop.f32.mrf.mxu0  ;;  %v4705_v2 = vld [vmem:[#allocation2_spill] sm:$0xff] }
 0x176   : > { %v1900_v40 = vadd.f32 %v1899_v62, %v1898_v17  ;;  %v2183_v56 = vadd.f32 %v2182_v3, %v2181_v60  ;;  %v1906_v45 = vrot.slane %v1905_v53, 4  ;;  %v2189_v11 = vrot.slane %v2188_v42, 4  ;;  %v4425_v17 = vpop.f32.mrf.mxu1 }
 0x177   : > { %v1915_v47 = vadd.f32 %v1883_v18, %v4229_v48  ;;  %v2172_v43 = vrot.slane %v2171_v15, 1  ;;  %v1897_v27 = vadd.f32 %v1896_v32, %v1895_v36  ;;  %v2179_v59 = vrot.slane %v2178_v55, 1  ;;  %v4448_v3 = vpop.f32.mrf.mxu0 }
 0x178   : > { %v1901_v4 = vrot.slane %v1900_v40, 2  ;;  %v2184_v28 = vrot.slane %v2183_v56, 2  ;;  %v1907_v34 = vadd.f32 %v1906_v45, %v1905_v53  ;;  %v2190_v38 = vadd.f32 %v2189_v11, %v2188_v42  ;;  %v4706_v42 = vld [vmem:[#allocation4_spill] sm:$0xff]  ;;  %v2385_v32 = vpop.f32.mrf.mxu1 }
 0x179   : > { %v2166_v41 = vadd.f32 %v2165_v58, %v2164_v57  ;;  %v1916_v26 = vadd.f32 %v1890_v39, %v4699_v0  ;;  %v1917_v14 = vadd.f32 %v1897_v27, %v4700_v10  ;;  %v4409_v12 = vrot.slane %v4702_v7, %v4701_v33  ;;  %v4707_v11 = vld [vmem:[#allocation12_spill] sm:$0xff]  ;;  %v4711_v0 = vld [vmem:[#allocation19_spill] sm:$0xff] }
 0x17a   : > { %v4411_v19 = vadd.f32 %v2152_v49, %v1913_v23  ;;  %v1902_v48 = vadd.f32 %v1901_v4, %v1900_v40  ;;  %v4413_v18 = vadd.f32 %v2184_v28, %v2183_v56  ;;  %v4417_v61 = vmul.f32 %v4703_v13, %v4345_v35  ;;  %v4704_v49 = vld [vmem:[#allocation10_spill] sm:$0xff]  ;;  %v2656_v28 = vpop.f32.mrf.mxu0 }
 0x17b   : > { %v4421_v57 = vadd.f32 %v2159_v52, %v1914_v6  ;;  %v4423_v50 = vadd.f32 %v2166_v41, %v1915_v47  ;;  %v2173_v22 = vadd.f32 %v2172_v43, %v2171_v15  ;;  %v2180_v63 = vadd.f32 %v2179_v59, %v2178_v55  ;;  %v4708_v59 = vld [vmem:[#allocation5_spill] sm:$0xff]  ;;  %v4710_v41 = vld [vmem:[#allocation6_spill] sm:$0xff] }
 0x17c   : > { %v1908_v60 = vrot.slane %v1907_v34, 2  ;;  %v2191_v23 = vrot.slane %v2190_v38, 2  ;;  %v4429_v9 = vmul.f32 %v4359_v46, %v4704_v49  ;;  %v2288_v35 = vrot.slane %v2216_v29, %v4701_v33 }
 0x17d   : > { %v4434_v1 = vadd.f32 %v2173_v22, %v1916_v26  ;;  %v4436_v52 = vadd.f32 %v2180_v63, %v1917_v14  ;;  %vm2278_vm9 = vcmp.eq.f32.partialorder %v4705_v2, %v4409_v12  ;;  %v2294_v15 = vadd.f32 1.0, %v4702_v7  ;;  %v2387_v26 = vpop.f32.mrf.mxu1 }
 0x17e   : > { %v1903_v36 = vrot.slane %v1902_v48, 1  ;;  %v2186_v55 = vrot.slane %v4413_v18, 1  ;;  %v4444_v46 = vmul.f32 %v4369_v37, %v4417_v61  ;;  %v2314_v62 = vrot.slane %v4698_v44, %v4701_v33 }
 0x17f   : > { %v2302_v53 = vrot.slane %v2294_v15, %v4701_v33  ;;  %v2549_v6 = vrot.slane %v4702_v7, %v4706_v42  ;;  %v2561_v58 = vrot.slane %v2216_v29, %v4706_v42  ;;  %v2573_v39 = vrot.slane %v2294_v15, %v4706_v42  ;;  %v4712_v33 = vld [vmem:[#allocation20_spill] sm:$0xff] }
 0x180   : > { %v4457_v40 = vadd.f32 %v1908_v60, %v1907_v34  ;;  %v4459_v37 = vadd.f32 %v2191_v23, %v2190_v38  ;;  %v2290_v56 = vsel %vm2278_vm9, %v2288_v35, 0.0  ;;  %v2585_v45 = vrot.slane %v4698_v44, %v4706_v42  ;;  %v4709_v44 = vld [vmem:[#allocation18_spill] sm:$0xff]  ;;  %v4714_v23 = vld [vmem:[#allocation29_spill] sm:$0xff] }
 0x181   : > { %vm2304_vm10 = vcmp.eq.f32.partialorder %v4705_v2, %v2302_v53  ;;  %v2330_v47 = vrot.slane %v4707_v11, %v4706_v42  ;;  %vm2551_vm11 = vcmp.eq.f32.partialorder %v4705_v2, %v2549_v6  ;;  %vm2575_vm12 = vcmp.eq.f32.partialorder %v4705_v2, %v2573_v39  ;;  %v4715_v2 = vld [vmem:[#allocation32_spill] sm:$0xff] }
 0x182   : > { %v4468_v29 = vadd.f32 %v1903_v36, %v1902_v48  ;;  %v2316_v43 = vsel %vm2304_vm10, %v2314_v62, 0.0  ;;  %v2563_v27 = vsel %vm2551_vm11, %v2561_v58, 0.0  ;;  %v2601_v4 = vrot.slane %v4707_v11, %v4708_v59  ;;  %v4713_v48 = vld [vmem:[#allocation21_spill] sm:$0xff]  ;;  %v4716_v36 = vld [vmem:[#allocation31_spill] sm:$0xff]  ;;  %v4718_v59 = vld [vmem:[#allocation28_spill] sm:$0xff] }
 0x183   : > { %v2320_v34 = vadd.f32 %v2316_v43, %v2290_v56  ;;  %v2587_v38 = vsel %vm2575_vm12, %v2585_v45, 0.0  ;;  %vm2279_vm13 = vcmp.eq.f32.partialorder %v4710_v41, %v4709_v44  ;;  %vm2305_vm14 = vcmp.eq.f32.partialorder %v4710_v41, %v4711_v0  ;;  %v4717_v56 = vld [vmem:[#allocation7_spill] sm:$0xff]  ;;  %v2658_v43 = vpop.f32.mrf.mxu0  ;;  %v4495_v0 = vpop.f32.mrf.mxu1 }
 0x184   : > { %v1910_v10 = vrot.slane %v4457_v40, 1  ;;  %v2591_v14 = vadd.f32 %v2587_v38, %v2563_v27  ;;  %v2291_v7 = vsel %vm2279_vm13, %v4712_v33, 0.0  ;;  %v2317_v22 = vsel %vm2305_vm14, %v4713_v48, 0.0 }
 0x185   : > { %v4479_v63 = vmul.f32 %v2330_v47, %v2320_v34  ;;  %v2321_v60 = vadd.f32 %v2317_v22, %v2291_v7  ;;  %vm2552_vm15 = vcmp.eq.f32.partialorder %v4710_v41, %v4714_v23  ;;  %vm2576_vm0 = vcmp.eq.f32.partialorder %v4710_v41, %v4715_v2 }
 0x186   : > { %v4485_v15 = vmul.f32 %v2601_v4, %v2591_v14  ;;  %v2564_v42 = vsel %vm2552_vm15, %v4716_v36, 0.0  ;;  %v2588_v11 = vsel %vm2576_vm0, %v4717_v56, 0.0  ;;  %vm2280_vm1 = vcmp.eq.f32.partialorder %v4710_v41, %v4409_v12 }
 0x187   : > { %v2193_v27 = vrot.slane %v4459_v37, 1  ;;  %v4493_v34 = vmul.f32 %v4718_v59, %v2321_v60  ;;  %v2592_v38 = vadd.f32 %v2588_v11, %v2564_v42  ;;  %v2292_v44 = vsel %vm2280_vm1, %v2288_v35, 0.0 }
 0x188   : > { %v2411_v14 = vmul.f32 %v4371_v24, %v4479_v63  ;;  %vm2306_vm2 = vcmp.eq.f32.partialorder %v4710_v41, %v2302_v53  ;;  %vm2553_vm3 = vcmp.eq.f32.partialorder %v4710_v41, %v2549_v6  ;;  %vm2577_vm4 = vcmp.eq.f32.partialorder %v4710_v41, %v2573_v39  ;;  %v4511_v53 = vpop.f32.mrf.mxu0 }
 0x189   : > { %v2412_v12 = vmul.f32 %v4380_v16, %v4493_v34  ;;  %v4505_v33 = vmul.f32 %v4703_v13, %v2592_v38  ;;  %v2318_v7 = vsel %vm2306_vm2, %v2314_v62, 0.0  ;;  %v2565_v48 = vsel %vm2553_vm3, %v2561_v58, 0.0  ;;  %v4518_v62 = vpop.f32.mrf.mxu1 }
 0x18a   : > { %v2682_v35 = vmul.f32 %v4378_v20, %v4485_v15  ;;  %v2322_v22 = vadd.f32 %v2318_v7, %v2292_v44  ;;  %v2589_v60 = vsel %vm2577_vm4, %v2585_v45, 0.0  ;;  %v2414_v24 = vmul.f32 %v4403_v5, %v4704_v49 }
 0x18b   : > { %v2426_v6 = vadd.f32 %v2412_v12, %v4429_v9  ;;  %v2683_v16 = vmul.f32 %v4395_v51, %v4505_v33  ;;  %v2593_v39 = vadd.f32 %v2589_v60, %v2565_v48  ;;  %v2685_v13 = vmul.f32 %v4419_v21, %v4417_v61 }
 0x18c   : > { %v4520_v58 = vmul.f32 %v2330_v47, %v2322_v22  ;;  %v2415_v20 = vmul.f32 %v4425_v17, %v4479_v63  ;;  %v2416_v5 = vmul.f32 %v2385_v32, %v4493_v34  ;;  %v2687_v45 = vmul.f32 %v2656_v28, %v4505_v33  ;;  %v4534_v17 = vpop.f32.mrf.mxu0 }
 0x18d   : > { %v2427_v41 = vrot.slane %v2426_v6, 4  ;;  %v2697_v9 = vadd.f32 %v2683_v16, %v4444_v46  ;;  %v4527_v23 = vmul.f32 %v2601_v4, %v2593_v39  ;;  %v2686_v51 = vmul.f32 %v4448_v3, %v4485_v15  ;;  %v4539_v4 = vpop.f32.mrf.mxu1 }
 0x18e   : > { %v2413_v21 = vmul.f32 %v4397_v25, %v4520_v58  ;;  %v2440_v47 = vadd.f32 %v2416_v5, %v2414_v24  ;;  %v2711_v2 = vadd.f32 %v2687_v45, %v2685_v13  ;;  %v2417_v36 = vmul.f32 %v2387_v26, %v4520_v58  ;;  %v2666_v60 = vpop.f32.mrf.mxu0 }
 0x18f   : > { %v2428_v32 = vadd.f32 %v2427_v41, %v2426_v6  ;;  %v2698_v42 = vrot.slane %v2697_v9, 4  ;;  %v2684_v28 = vmul.f32 %v4400_v30, %v4527_v23  ;;  %v2688_v46 = vmul.f32 %v2658_v43, %v4527_v23  ;;  %v2397_v43 = vpop.f32.mrf.mxu1 }
 0x190   : > { %v2433_v56 = vadd.f32 %v2413_v21, %v2411_v14  ;;  %v2441_v3 = vrot.slane %v2440_v47, 4  ;;  %v2712_v11 = vrot.slane %v2711_v2, 4  ;;  %v2447_v59 = vadd.f32 %v2417_v36, %v2415_v20 }
 0x191   : > { %v2429_v25 = vrot.slane %v2428_v32, 2  ;;  %v2699_v38 = vadd.f32 %v2698_v42, %v2697_v9  ;;  %v2704_v44 = vadd.f32 %v2684_v28, %v2682_v35  ;;  %v2718_v12 = vadd.f32 %v2688_v46, %v2686_v51  ;;  %v2401_v46 = vpop.f32.mrf.mxu1 }
 0x192   : > { %v2434_v26 = vrot.slane %v2433_v56, 4  ;;  %v2442_v7 = vadd.f32 %v2441_v3, %v2440_v47  ;;  %v2713_v48 = vadd.f32 %v2712_v11, %v2711_v2  ;;  %v2448_v22 = vrot.slane %v2447_v59, 4  ;;  %v2668_v2 = vpop.f32.mrf.mxu0 }
 0x193   : > { %v2430_v24 = vadd.f32 %v2429_v25, %v2428_v32  ;;  %v2700_v6 = vrot.slane %v2699_v38, 2  ;;  %v2705_v30 = vrot.slane %v2704_v44, 4  ;;  %v2719_v16 = vrot.slane %v2718_v12, 4 }
 0x194   : > { %v2435_v39 = vadd.f32 %v2434_v26, %v2433_v56  ;;  %v2443_v13 = vrot.slane %v2442_v7, 2  ;;  %v2714_v14 = vrot.slane %v2713_v48, 2  ;;  %v2449_v5 = vadd.f32 %v2448_v22, %v2447_v59 }
 0x195   : > { %v2431_v45 = vrot.slane %v2430_v24, 1  ;;  %v2701_v20 = vadd.f32 %v2700_v6, %v2699_v38  ;;  %v2706_v41 = vadd.f32 %v2705_v30, %v2704_v44  ;;  %v2720_v9 = vadd.f32 %v2719_v16, %v2718_v12 }
 0x196   : > { %v2436_v35 = vrot.slane %v2435_v39, 2  ;;  %v2444_v51 = vadd.f32 %v2443_v13, %v2442_v7  ;;  %v2715_v21 = vadd.f32 %v2714_v14, %v2713_v48  ;;  %v2450_v47 = vrot.slane %v2449_v5, 2 }
 0x197   : > { %v2432_v36 = vadd.f32 %v2431_v45, %v2430_v24  ;;  %v2702_v42 = vrot.slane %v2701_v20, 1  ;;  %v2707_v32 = vrot.slane %v2706_v41, 2  ;;  %v2721_v28 = vrot.slane %v2720_v9, 2  ;;  %v2672_v24 = vpop.f32.mrf.mxu0 }
 0x198   : > { %v2437_v3 = vadd.f32 %v2436_v35, %v2435_v39  ;;  %v2445_v11 = vrot.slane %v2444_v51, 1  ;;  %v2716_v56 = vrot.slane %v2715_v21, 1  ;;  %v2451_v25 = vadd.f32 %v2450_v47, %v2449_v5  ;;  %v2403_v39 = vpop.f32.mrf.mxu1 }
 0x199   : > { %v4544_v59 = vadd.f32 %v1910_v10, %v4457_v40  ;;  %v2482_v38 = vadd.f32 %v2432_v36, %v4373_v8  ;;  %v2708_v44 = vadd.f32 %v2707_v32, %v2706_v41  ;;  %v2722_v12 = vadd.f32 %v2721_v28, %v2720_v9 }
 0x19a   : > { %v2703_v26 = vadd.f32 %v2702_v42, %v2701_v20  ;;  %v2438_v7 = vrot.slane %v2437_v3, 1  ;;  %v2446_v48 = vadd.f32 %v2445_v11, %v2444_v51  ;;  %v2452_v22 = vrot.slane %v2451_v25, 1  ;;  %v2405_v36 = vpop.f32.mrf.mxu1 }
 0x19b   : > { %v2709_v6 = vrot.slane %v2708_v44, 1  ;;  %v2717_v30 = vadd.f32 %v2716_v56, %v2715_v21  ;;  %v2723_v16 = vrot.slane %v2722_v12, 1  ;;  %v2418_v8 = vmul.f32 %v4495_v0, %v4704_v49 }
 0x19c   : > { %v2753_v13 = vadd.f32 %v2703_v26, %v2482_v38  ;;  %v2439_v14 = vadd.f32 %v2438_v7, %v2437_v3  ;;  %v2484_v5 = vadd.f32 %v2446_v48, %v4421_v57  ;;  %v2453_v40 = vadd.f32 %v2452_v22, %v2451_v25  ;;  %v2674_v57 = vpop.f32.mrf.mxu0 }
 0x19d   : > { %v2710_v10 = vadd.f32 %v2709_v6, %v2708_v44  ;;  %v2724_v45 = vadd.f32 %v2723_v16, %v2722_v12  ;;  %v2689_v20 = vmul.f32 %v4511_v53, %v4417_v61  ;;  %v2419_v35 = vmul.f32 %v4518_v62, %v4479_v63  ;;  %v2407_v44 = vpop.f32.mrf.mxu1 }
 0x19e   : > { %v2483_v41 = vadd.f32 %v2439_v14, %v4411_v19  ;;  %v2485_v9 = vadd.f32 %v2453_v40, %v4423_v50  ;;  %v2690_v51 = vmul.f32 %v4534_v17, %v4485_v15  ;;  %v2420_v21 = vmul.f32 %v4539_v4, %v4493_v34 }
 0x19f   : > { %v2691_v47 = vmul.f32 %v2666_v60, %v4505_v33  ;;  %v2421_v0 = vmul.f32 %v2397_v43, %v4520_v58  ;;  %v2692_v53 = vmul.f32 %v2668_v2, %v4527_v23  ;;  %v2755_v42 = vadd.f32 %v2717_v30, %v2484_v5  ;;  %v2676_v60 = vpop.f32.mrf.mxu0 }
 0x1a0   : > { %v2754_v19 = vadd.f32 %v2710_v10, %v2483_v41  ;;  %v2756_v50 = vadd.f32 %v2724_v45, %v2485_v9  ;;  %v2454_v32 = vadd.f32 %v2420_v21, %v2418_v8  ;;  %v2422_v56 = vmul.f32 %v2401_v46, %v4704_v49 }
 0x1a1   : > { %v2725_v62 = vadd.f32 %v2691_v47, %v2689_v20  ;;  %v2461_v28 = vadd.f32 %v2421_v0, %v2419_v35  ;;  %v2732_v3 = vadd.f32 %v2692_v53, %v2690_v51  ;;  %v2693_v4 = vmul.f32 %v2672_v24, %v4417_v61 }
 0x1a2   : > { %v2769_v17 = vcombine.low %v2753_v13, %v2754_v19  ;;  %v2770_v11 = vcombine.low %v2755_v42, %v2756_v50  ;;  %v2455_v25 = vrot.slane %v2454_v32, 4  ;;  %v2423_v26 = vmul.f32 %v2403_v39, %v4479_v63  ;;  %v2678_v13 = vpop.f32.mrf.mxu0 }
 0x1a3   : > { %v2726_v43 = vrot.slane %v2725_v62, 4  ;;  %v2462_v38 = vrot.slane %v2461_v28, 4  ;;  %v2733_v2 = vrot.slane %v2732_v3, 4  ;;  %v2694_v7 = vmul.f32 %v2674_v57, %v4485_v15 }
 0x1a4   : > { %v2773_v12 = vrot.slane %v2770_v11, 7  ;;  %v2424_v48 = vmul.f32 %v2405_v36, %v4493_v34  ;;  %v2456_v22 = vadd.f32 %v2455_v25, %v2454_v32  ;;  %v2695_v46 = vmul.f32 %v2676_v60, %v4505_v33 }
 0x1a5   : > { %v2727_v6 = vadd.f32 %v2726_v43, %v2725_v62  ;;  %v2463_v30 = vadd.f32 %v2462_v38, %v2461_v28  ;;  %v2734_v16 = vadd.f32 %v2733_v2, %v2732_v3  ;;  %v2425_v24 = vmul.f32 %v2407_v44, %v4520_v58 }
 0x1a6   : > { %v2775_v49 = vsel %vm2774_vm6, %v2773_v12, %v2769_v17  ;;  %v2468_v61 = vadd.f32 %v2424_v48, %v2422_v56  ;;  %v2457_v5 = vrot.slane %v2456_v22, 2  ;;  %v2739_v34 = vadd.f32 %v2695_v46, %v2693_v4 }
 0x1a7   : > { %v2777_v14 = vsel %vm2776_vm5, %v2773_v12, %v2775_v49  ;;  %v2728_v63 = vrot.slane %v2727_v6, 2  ;;  %v2464_v39 = vrot.slane %v2463_v30, 2  ;;  %v2735_v15 = vrot.slane %v2734_v16, 2 }
 0x1a8   : > { %v2469_v40 = vrot.slane %v2468_v61, 4  ;;  %v2475_v10 = vadd.f32 %v2425_v24, %v2423_v26  ;;  %v2458_v45 = vadd.f32 %v2457_v5, %v2456_v22  ;;  %v2696_v41 = vmul.f32 %v2678_v13, %v4527_v23 }
 0x1a9   : > { %v2729_v8 = vadd.f32 %v2728_v63, %v2727_v6  ;;  %v2465_v20 = vadd.f32 %v2464_v39, %v2463_v30  ;;  %v2736_v9 = vadd.f32 %v2735_v15, %v2734_v16  ;;  %v2740_v33 = vrot.slane %v2739_v34, 4 }
 0x1aa   : > { %v2470_v35 = vadd.f32 %v2469_v40, %v2468_v61  ;;  %v2476_v51 = vrot.slane %v2475_v10, 4  ;;  %v2459_v58 = vrot.slane %v2458_v45, 1  ;;  %v2746_v47 = vadd.f32 %v2696_v41, %v2694_v7 }
 0x1ab   : > { %v2730_v57 = vrot.slane %v2729_v8, 1  ;;  %v2466_v21 = vrot.slane %v2465_v20, 1  ;;  %v2737_v0 = vrot.slane %v2736_v9, 1  ;;  %v2741_v36 = vadd.f32 %v2740_v33, %v2739_v34 }
 0x1ac   : > { %v2471_v53 = vrot.slane %v2470_v35, 2  ;;  %v2477_v19 = vadd.f32 %v2476_v51, %v2475_v10  ;;  %v1918_v42 = vadd.f32 %v4468_v29, %v4341_v54  ;;  %v2460_v50 = vadd.f32 %v2459_v58, %v2458_v45 }
 0x1ad   : > { %v2467_v32 = vadd.f32 %v2466_v21, %v2465_v20  ;;  %v2747_v62 = vrot.slane %v2746_v47, 4  ;;  %v2731_v28 = vadd.f32 %v2730_v57, %v2729_v8  ;;  %v2742_v3 = vrot.slane %v2741_v36, 2 }
 0x1ae   : > { %v2472_v23 = vadd.f32 %v2471_v53, %v2470_v35  ;;  %v2478_v17 = vrot.slane %v2477_v19, 2  ;;  %v2486_v11 = vadd.f32 %v2460_v50, %v4434_v1  ;;  %v2738_v4 = vadd.f32 %v2737_v0, %v2736_v9 }
 0x1af   : > { %v2487_v56 = vadd.f32 %v2467_v32, %v4436_v52  ;;  %v2748_v60 = vadd.f32 %v2747_v62, %v2746_v47  ;;  %v1919_v25 = vadd.f32 %v4544_v59, %v4348_v31  ;;  %v2743_v38 = vadd.f32 %v2742_v3, %v2741_v36 }
 0x1b0   : > { %v2473_v43 = vrot.slane %v2472_v23, 1  ;;  %v2479_v2 = vadd.f32 %v2478_v17, %v2477_v19  ;;  %v2187_v54 = vadd.f32 %v2186_v55, %v4413_v18  ;;  %v2757_v29 = vadd.f32 %v2731_v28, %v2486_v11 }
 0x1b1   : > { %v2758_v44 = vadd.f32 %v2738_v4, %v2487_v56  ;;  %v2749_v12 = vrot.slane %v2748_v60, 2  ;;  %v2194_v1 = vadd.f32 %v2193_v27, %v4459_v37  ;;  %v2744_v22 = vrot.slane %v2743_v38, 1 }
 0x1b2   : > { %v2474_v52 = vadd.f32 %v2473_v43, %v2472_v23  ;;  %v2480_v26 = vrot.slane %v2479_v2, 1  ;;  %v2201_v7 = vadd.f32 %v2187_v54, %v1918_v42  ;;  %vm2779_vm7 = vcmask 1042434  }
 0x1b3   : > { %v2771_v48 = vcombine.low %v2757_v29, %v2758_v44  ;;  %v2750_v31 = vadd.f32 %v2749_v12, %v2748_v60  ;;  %v2202_v59 = vadd.f32 %v2194_v1, %v1919_v25  ;;  %vm2781_vm8 = vcmask 1046534  }
 0x1b4   : > { %v2481_v6 = vadd.f32 %v2480_v26, %v2479_v2  ;;  %v2488_v18 = vadd.f32 %v2474_v52, %v2201_v7  ;;  %v2745_v61 = vadd.f32 %v2744_v22, %v2743_v38  ;;  %vm2784_vm9 = vcmask 1043459  }
 0x1b5   : > { %v2778_v30 = vrot.slane %v2771_v48, 6  ;;  %v2751_v55 = vrot.slane %v2750_v31, 1  ;;  %vm2786_vm10 = vcmask 1047559  }
 0x1b6   : > { %v2489_v16 = vadd.f32 %v2481_v6, %v2202_v59  ;;  %v2759_v37 = vadd.f32 %v2745_v61, %v2488_v18 }
 0x1b7   : > { %v2780_v49 = vsel %vm2779_vm7, %v2778_v30, %v2777_v14  ;;  %v2752_v46 = vadd.f32 %v2751_v55, %v2750_v31 }
 0x1b8   : > { %v2782_v24 = vsel %vm2781_vm8, %v2778_v30, %v2780_v49 }
 0x1b9   : > { %v2760_v27 = vadd.f32 %v2752_v46, %v2489_v16 }
 0x1bb   : > { %v2772_v13 = vcombine.low %v2759_v37, %v2760_v27 }
 0x1bd   : > { %v2783_v5 = vrot.slane %v2772_v13, 5 }
 0x1bf   : > { %v2785_v63 = vsel %vm2784_vm9, %v2783_v5, %v2782_v24 }
 0x1c0   : > { %v2787_v39 = vsel %vm2786_vm10, %v2783_v5, %v2785_v63 }
 0x1c1   : > { %2789 = vst [vmem:[%s201_s24] sm:$0xff] %v2787_v39 }
 0x1c2 PF: > { %s12_s11 = sadd.s32 1, %s3024_s11   ;;  %s4719_s9 = smov %s3020_s10 }
 0x1c3   : > { %p9_p5 = scmp.ge.s32.totalorder %s12_s11, 4   ;;  %s4720_s10 = smov %s4722_s12 }
 0x1c5   :  { %11 = sbr.rel (!%p9_p5) target bundleno = 2 (0x2), region = 61 }

</bundles_post_ra>
